<compile_context>
chip_gen: v6e
topology: v6e:2x2x1
jax: 0.10.0
libtpu: 0.0.40
codegen_flags: <defaults>
</compile_context>

<pallas_src>
import jax
import jax.numpy as jnp
from jax.experimental import pallas as pl
from jax.experimental.pallas import tpu as pltpu

NUM_USERS = 50
NUM_ITEMS = 2079
EMBED = 32      # embedding_size
BATCH = 64      # demo batch (any size works; wrapper pads)


def _make_gmf_kernel(tile_b: int, embed: int, pack: int):
    """GMF kernel for one batch tile of `tile_b` rows.

    Tables are VMEM-resident; gather is done with in-VMEM dynamic row slices.
    Gathered rows are written lane-packed (`pack` rows per 128-lane output
    row) so both the multiply and the HBM writeback are fully lane-dense.
    """

    def gmf_kernel(user_idx_ref, item_idx_ref,    # SMEM int32 (scalar prefetch)
                   user_tab_ref, item_tab_ref,    # VMEM-resident tables
                   out_ref,                       # VMEM [tile_b//pack, pack*embed]
                   u_buf, i_buf):                 # VMEM scratch (lane packed)
        base = pl.program_id(0) * tile_b

        # Fully unrolled: static sublane/lane destination offsets, only the
        # table row index is dynamic (cheap VMEM vld, no HBM DMAs).
        for j in range(tile_b):
            uid = user_idx_ref[base + j]
            iid = item_idx_ref[base + j]
            r = j // pack                  # destination sublane (static)
            c = (j % pack) * embed         # destination lane offset (static)
            u_buf[pl.ds(r, 1), pl.ds(c, embed)] = user_tab_ref[pl.ds(uid, 1), :]
            i_buf[pl.ds(r, 1), pl.ds(c, embed)] = item_tab_ref[pl.ds(iid, 1), :]

        # One dense multiply + one lane-dense store for the whole tile.
        out_ref[...] = u_buf[...] * i_buf[...]

    return gmf_kernel


def gmf_forward(user_indices, item_indices, user_table, item_table, *,
                tile_b=None):
    B = user_indices.shape[0]
    n_users, E = user_table.shape
    n_items, E_i = item_table.shape
    assert E == E_i, "user/item embedding sizes must match"

    # Lane-pack factor: fold `pack` batch rows into one 128-lane output row.
    pack = 128 // E if (E <= 128 and 128 % E == 0) else 1

    # Keep (8,128)-divisible output blocks if the grid ever has >1 step.
    row_quantum = 8 * pack
    if tile_b is None:
        # Single grid step for small/medium batches; a few big tiles otherwise.
        tile_b = min(2048, -(-B // row_quantum) * row_quantum)
    tile_b = max(row_quantum, (tile_b // row_quantum) * row_quantum)

    # Pad batch to a multiple of tile_b (padded rows gather index 0, sliced off).
    pad = (-B) % tile_b
    if pad:
        user_indices = jnp.concatenate(
            [user_indices, jnp.zeros((pad,), user_indices.dtype)])
        item_indices = jnp.concatenate(
            [item_indices, jnp.zeros((pad,), item_indices.dtype)])
    Bp = B + pad

    # Clamp: in-VMEM dynamic slices have no runtime bounds check.
    user_indices = jnp.clip(user_indices.astype(jnp.int32), 0, n_users - 1)
    item_indices = jnp.clip(item_indices.astype(jnp.int32), 0, n_items - 1)

    n_steps = Bp // tile_b
    out_rows = Bp // pack
    out_cols = pack * E            # 128 for E=32 -> lane-dense writeback

    grid_spec = pltpu.PrefetchScalarGridSpec(
        num_scalar_prefetch=2,     # user_indices, item_indices -> SMEM
        grid=(n_steps,),
        in_specs=[
            # Full tables with a constant index_map: DMA'd into VMEM once and
            # resident across every grid step (no per-step re-fetch, no
            # per-row HBM gathers).
            pl.BlockSpec((n_users, E), lambda t, u_ids, i_ids: (0, 0)),
            pl.BlockSpec((n_items, E), lambda t, u_ids, i_ids: (0, 0)),
        ],
        out_specs=pl.BlockSpec((tile_b // pack, out_cols),
                               lambda t, u_ids, i_ids: (t, 0)),
        scratch_shapes=[
            pltpu.VMEM((tile_b // pack, out_cols), user_table.dtype),
            pltpu.VMEM((tile_b // pack, out_cols), item_table.dtype),
        ],
    )

    out_packed = pl.pallas_call(
        _make_gmf_kernel(tile_b, E, pack),
        out_shape=jax.ShapeDtypeStruct((out_rows, out_cols), user_table.dtype),
        grid_spec=grid_spec,
        compiler_params=pltpu.CompilerParams(
            # Only worth megacore-sharding when there are multiple big tiles.
            dimension_semantics=(("parallel",) if n_steps > 1
                                 else ("arbitrary",))),
    )(user_indices, item_indices, user_table, item_table)

    # Row-major un-pack: out_packed[g, k*E:(k+1)*E] is batch row g*pack + k.
    out = out_packed.reshape(Bp, E)
    return out[:B] if pad else out


if __name__ == "__main__":
    key = jax.random.PRNGKey(0)
    k_ut, k_it, k_ui, k_ii = jax.random.split(key, 4)

    # nn.Embedding default init ~ N(0, 1); deterministic synthetic weights.
    user_table = jax.random.normal(k_ut, (NUM_USERS, EMBED), dtype=jnp.float32)
    item_table = jax.random.normal(k_it, (NUM_ITEMS, EMBED), dtype=jnp.float32)

    user_idx = jax.random.randint(k_ui, (BATCH,), 0, NUM_USERS, dtype=jnp.int32)
    item_idx = jax.random.randint(k_ii, (BATCH,), 0, NUM_ITEMS, dtype=jnp.int32)

    out = gmf_forward(user_idx, item_idx, user_table, item_table)
    out = jax.block_until_ready(out)

    ref = user_table[user_idx] * item_table[item_idx]
    assert out.shape == (BATCH, EMBED)
    assert jnp.allclose(out, ref, atol=1e-6), "Pallas GMF output mismatch vs reference"

    print("KERNEL_OK")
</pallas_src>

<mosaic_0001>
module attributes {stable_mosaic.version = 11 : i64} {
  func.func @gmf_kernel(%arg0: i32, %arg1: memref<64xi32, #tpu.memory_space<smem>>, %arg2: memref<64xi32, #tpu.memory_space<smem>>, %arg3: memref<50x32xf32, #tpu.memory_space<vmem>>, %arg4: memref<2079x32xf32, #tpu.memory_space<vmem>>, %arg5: memref<16x128xf32, #tpu.memory_space<vmem>>, %arg6: memref<16x128xf32, #tpu.memory_space<vmem>>, %arg7: memref<16x128xf32, #tpu.memory_space<vmem>>) attributes {dimension_semantics = [#tpu.dimension_semantics<arbitrary>], iteration_bounds = array<i64: 1>, scalar_prefetch = 2 : i64, scratch_operands = 2 : i64, tpu.core_type = #tpu.core_type<tc>, window_params = [{pipeline_mode = #tpu.pipeline_mode<synchronous>, transform_indices = @transform_0, window_bounds = array<i64: 50, 32>}, {pipeline_mode = #tpu.pipeline_mode<synchronous>, transform_indices = @transform_1, window_bounds = array<i64: 2079, 32>}, {transform_indices = @transform_2, window_bounds = array<i64: 16, 128>}]} {
    %c64_i32 = arith.constant 64 : i32
    %0 = arith.muli %arg0, %c64_i32 : i32
    %c0_i32 = arith.constant 0 : i32
    %1 = arith.addi %0, %c0_i32 : i32
    %2 = arith.index_cast %1 : i32 to index
    %3 = memref.load %arg1[%2] : memref<64xi32, #tpu.memory_space<smem>>
    %c0_i32_0 = arith.constant 0 : i32
    %4 = arith.addi %0, %c0_i32_0 : i32
    %5 = arith.index_cast %4 : i32 to index
    %6 = memref.load %arg2[%5] : memref<64xi32, #tpu.memory_space<smem>>
    %7 = arith.index_cast %3 : i32 to index
    %c0 = arith.constant 0 : index
    %8 = vector.load %arg3[%7, %c0] : memref<50x32xf32, #tpu.memory_space<vmem>>, vector<1x32xf32>
    %c0_1 = arith.constant 0 : index
    %c0_2 = arith.constant 0 : index
    %9 = vector.load %arg6[%c0_1, %c0_2] : memref<16x128xf32, #tpu.memory_space<vmem>>, vector<1x32xf32>
    tpu.vector_store %arg6[%c0_1, %c0_2], %8 {strides = array<i32>} : memref<16x128xf32, #tpu.memory_space<vmem>>, vector<1x32xf32>,
    %10 = arith.index_cast %6 : i32 to index
    %c0_3 = arith.constant 0 : index
    %11 = vector.load %arg4[%10, %c0_3] : memref<2079x32xf32, #tpu.memory_space<vmem>>, vector<1x32xf32>
    %c0_4 = arith.constant 0 : index
    %c0_5 = arith.constant 0 : index
    %12 = vector.load %arg7[%c0_4, %c0_5] : memref<16x128xf32, #tpu.memory_space<vmem>>, vector<1x32xf32>
    tpu.vector_store %arg7[%c0_4, %c0_5], %11 {strides = array<i32>} : memref<16x128xf32, #tpu.memory_space<vmem>>, vector<1x32xf32>,
    %c1_i32 = arith.constant 1 : i32
    %13 = arith.addi %0, %c1_i32 : i32
    %14 = arith.index_cast %13 : i32 to index
    %15 = memref.load %arg1[%14] : memref<64xi32, #tpu.memory_space<smem>>
    %c1_i32_6 = arith.constant 1 : i32
    %16 = arith.addi %0, %c1_i32_6 : i32
    %17 = arith.index_cast %16 : i32 to index
    %18 = memref.load %arg2[%17] : memref<64xi32, #tpu.memory_space<smem>>
    %19 = arith.index_cast %15 : i32 to index
    %c0_7 = arith.constant 0 : index
    %20 = vector.load %arg3[%19, %c0_7] : memref<50x32xf32, #tpu.memory_space<vmem>>, vector<1x32xf32>
    %c0_8 = arith.constant 0 : index
    %c32 = arith.constant 32 : index
    %21 = vector.load %arg6[%c0_8, %c32] : memref<16x128xf32, #tpu.memory_space<vmem>>, vector<1x32xf32>
    tpu.vector_store %arg6[%c0_8, %c32], %20 {strides = array<i32>} : memref<16x128xf32, #tpu.memory_space<vmem>>, vector<1x32xf32>,
    %22 = arith.index_cast %18 : i32 to index
    %c0_9 = arith.constant 0 : index
    %23 = vector.load %arg4[%22, %c0_9] : memref<2079x32xf32, #tpu.memory_space<vmem>>, vector<1x32xf32>
    %c0_10 = arith.constant 0 : index
    %c32_11 = arith.constant 32 : index
    %24 = vector.load %arg7[%c0_10, %c32_11] : memref<16x128xf32, #tpu.memory_space<vmem>>, vector<1x32xf32>
    tpu.vector_store %arg7[%c0_10, %c32_11], %23 {strides = array<i32>} : memref<16x128xf32, #tpu.memory_space<vmem>>, vector<1x32xf32>,
    %c2_i32 = arith.constant 2 : i32
    %25 = arith.addi %0, %c2_i32 : i32
    %26 = arith.index_cast %25 : i32 to index
    %27 = memref.load %arg1[%26] : memref<64xi32, #tpu.memory_space<smem>>
    %c2_i32_12 = arith.constant 2 : i32
    %28 = arith.addi %0, %c2_i32_12 : i32
    %29 = arith.index_cast %28 : i32 to index
    %30 = memref.load %arg2[%29] : memref<64xi32, #tpu.memory_space<smem>>
    %31 = arith.index_cast %27 : i32 to index
    %c0_13 = arith.constant 0 : index
    %32 = vector.load %arg3[%31, %c0_13] : memref<50x32xf32, #tpu.memory_space<vmem>>, vector<1x32xf32>
    %c0_14 = arith.constant 0 : index
    %c64 = arith.constant 64 : index
    %33 = vector.load %arg6[%c0_14, %c64] : memref<16x128xf32, #tpu.memory_space<vmem>>, vector<1x32xf32>
    tpu.vector_store %arg6[%c0_14, %c64], %32 {strides = array<i32>} : memref<16x128xf32, #tpu.memory_space<vmem>>, vector<1x32xf32>,
    %34 = arith.index_cast %30 : i32 to index
    %c0_15 = arith.constant 0 : index
    %35 = vector.load %arg4[%34, %c0_15] : memref<2079x32xf32, #tpu.memory_space<vmem>>, vector<1x32xf32>
    %c0_16 = arith.constant 0 : index
    %c64_17 = arith.constant 64 : index
    %36 = vector.load %arg7[%c0_16, %c64_17] : memref<16x128xf32, #tpu.memory_space<vmem>>, vector<1x32xf32>
    tpu.vector_store %arg7[%c0_16, %c64_17], %35 {strides = array<i32>} : memref<16x128xf32, #tpu.memory_space<vmem>>, vector<1x32xf32>,
    %c3_i32 = arith.constant 3 : i32
    %37 = arith.addi %0, %c3_i32 : i32
    %38 = arith.index_cast %37 : i32 to index
    %39 = memref.load %arg1[%38] : memref<64xi32, #tpu.memory_space<smem>>
    %c3_i32_18 = arith.constant 3 : i32
    %40 = arith.addi %0, %c3_i32_18 : i32
    %41 = arith.index_cast %40 : i32 to index
    %42 = memref.load %arg2[%41] : memref<64xi32, #tpu.memory_space<smem>>
    %43 = arith.index_cast %39 : i32 to index
    %c0_19 = arith.constant 0 : index
    %44 = vector.load %arg3[%43, %c0_19] : memref<50x32xf32, #tpu.memory_space<vmem>>, vector<1x32xf32>
    %c0_20 = arith.constant 0 : index
    %c96 = arith.constant 96 : index
    %45 = vector.load %arg6[%c0_20, %c96] : memref<16x128xf32, #tpu.memory_space<vmem>>, vector<1x32xf32>
    tpu.vector_store %arg6[%c0_20, %c96], %44 {strides = array<i32>} : memref<16x128xf32, #tpu.memory_space<vmem>>, vector<1x32xf32>,
    %46 = arith.index_cast %42 : i32 to index
    %c0_21 = arith.constant 0 : index
    %47 = vector.load %arg4[%46, %c0_21] : memref<2079x32xf32, #tpu.memory_space<vmem>>, vector<1x32xf32>
    %c0_22 = arith.constant 0 : index
    %c96_23 = arith.constant 96 : index
    %48 = vector.load %arg7[%c0_22, %c96_23] : memref<16x128xf32, #tpu.memory_space<vmem>>, vector<1x32xf32>
    tpu.vector_store %arg7[%c0_22, %c96_23], %47 {strides = array<i32>} : memref<16x128xf32, #tpu.memory_space<vmem>>, vector<1x32xf32>,
    %c4_i32 = arith.constant 4 : i32
    %49 = arith.addi %0, %c4_i32 : i32
    %50 = arith.index_cast %49 : i32 to index
    %51 = memref.load %arg1[%50] : memref<64xi32, #tpu.memory_space<smem>>
    %c4_i32_24 = arith.constant 4 : i32
    %52 = arith.addi %0, %c4_i32_24 : i32
    %53 = arith.index_cast %52 : i32 to index
    %54 = memref.load %arg2[%53] : memref<64xi32, #tpu.memory_space<smem>>
    %55 = arith.index_cast %51 : i32 to index
    %c0_25 = arith.constant 0 : index
    %56 = vector.load %arg3[%55, %c0_25] : memref<50x32xf32, #tpu.memory_space<vmem>>, vector<1x32xf32>
    %c1 = arith.constant 1 : index
    %c0_26 = arith.constant 0 : index
    %57 = vector.load %arg6[%c1, %c0_26] : memref<16x128xf32, #tpu.memory_space<vmem>>, vector<1x32xf32>
    tpu.vector_store %arg6[%c1, %c0_26], %56 {strides = array<i32>} : memref<16x128xf32, #tpu.memory_space<vmem>>, vector<1x32xf32>,
    %58 = arith.index_cast %54 : i32 to index
    %c0_27 = arith.constant 0 : index
    %59 = vector.load %arg4[%58, %c0_27] : memref<2079x32xf32, #tpu.memory_space<vmem>>, vector<1x32xf32>
    %c1_28 = arith.constant 1 : index
    %c0_29 = arith.constant 0 : index
    %60 = vector.load %arg7[%c1_28, %c0_29] : memref<16x128xf32, #tpu.memory_space<vmem>>, vector<1x32xf32>
    tpu.vector_store %arg7[%c1_28, %c0_29], %59 {strides = array<i32>} : memref<16x128xf32, #tpu.memory_space<vmem>>, vector<1x32xf32>,
    %c5_i32 = arith.constant 5 : i32
    %61 = arith.addi %0, %c5_i32 : i32
    %62 = arith.index_cast %61 : i32 to index
    %63 = memref.load %arg1[%62] : memref<64xi32, #tpu.memory_space<smem>>
    %c5_i32_30 = arith.constant 5 : i32
    %64 = arith.addi %0, %c5_i32_30 : i32
    %65 = arith.index_cast %64 : i32 to index
    %66 = memref.load %arg2[%65] : memref<64xi32, #tpu.memory_space<smem>>
    %67 = arith.index_cast %63 : i32 to index
    %c0_31 = arith.constant 0 : index
    %68 = vector.load %arg3[%67, %c0_31] : memref<50x32xf32, #tpu.memory_space<vmem>>, vector<1x32xf32>
    %c1_32 = arith.constant 1 : index
    %c32_33 = arith.constant 32 : index
    %69 = vector.load %arg6[%c1_32, %c32_33] : memref<16x128xf32, #tpu.memory_space<vmem>>, vector<1x32xf32>
    tpu.vector_store %arg6[%c1_32, %c32_33], %68 {strides = array<i32>} : memref<16x128xf32, #tpu.memory_space<vmem>>, vector<1x32xf32>,
    %70 = arith.index_cast %66 : i32 to index
    %c0_34 = arith.constant 0 : index
    %71 = vector.load %arg4[%70, %c0_34] : memref<2079x32xf32, #tpu.memory_space<vmem>>, vector<1x32xf32>
    %c1_35 = arith.constant 1 : index
    %c32_36 = arith.constant 32 : index
    %72 = vector.load %arg7[%c1_35, %c32_36] : memref<16x128xf32, #tpu.memory_space<vmem>>, vector<1x32xf32>
    tpu.vector_store %arg7[%c1_35, %c32_36], %71 {strides = array<i32>} : memref<16x128xf32, #tpu.memory_space<vmem>>, vector<1x32xf32>,
    %c6_i32 = arith.constant 6 : i32
    %73 = arith.addi %0, %c6_i32 : i32
    %74 = arith.index_cast %73 : i32 to index
    %75 = memref.load %arg1[%74] : memref<64xi32, #tpu.memory_space<smem>>
    %c6_i32_37 = arith.constant 6 : i32
    %76 = arith.addi %0, %c6_i32_37 : i32
    %77 = arith.index_cast %76 : i32 to index
    %78 = memref.load %arg2[%77] : memref<64xi32, #tpu.memory_space<smem>>
    %79 = arith.index_cast %75 : i32 to index
    %c0_38 = arith.constant 0 : index
    %80 = vector.load %arg3[%79, %c0_38] : memref<50x32xf32, #tpu.memory_space<vmem>>, vector<1x32xf32>
    %c1_39 = arith.constant 1 : index
    %c64_40 = arith.constant 64 : index
    %81 = vector.load %arg6[%c1_39, %c64_40] : memref<16x128xf32, #tpu.memory_space<vmem>>, vector<1x32xf32>
    tpu.vector_store %arg6[%c1_39, %c64_40], %80 {strides = array<i32>} : memref<16x128xf32, #tpu.memory_space<vmem>>, vector<1x32xf32>,
    %82 = arith.index_cast %78 : i32 to index
    %c0_41 = arith.constant 0 : index
    %83 = vector.load %arg4[%82, %c0_41] : memref<2079x32xf32, #tpu.memory_space<vmem>>, vector<1x32xf32>
    %c1_42 = arith.constant 1 : index
    %c64_43 = arith.constant 64 : index
    %84 = vector.load %arg7[%c1_42, %c64_43] : memref<16x128xf32, #tpu.memory_space<vmem>>, vector<1x32xf32>
    tpu.vector_store %arg7[%c1_42, %c64_43], %83 {strides = array<i32>} : memref<16x128xf32, #tpu.memory_space<vmem>>, vector<1x32xf32>,
    %c7_i32 = arith.constant 7 : i32
    %85 = arith.addi %0, %c7_i32 : i32
    %86 = arith.index_cast %85 : i32 to index
    %87 = memref.load %arg1[%86] : memref<64xi32, #tpu.memory_space<smem>>
    %c7_i32_44 = arith.constant 7 : i32
    %88 = arith.addi %0, %c7_i32_44 : i32
    %89 = arith.index_cast %88 : i32 to index
    %90 = memref.load %arg2[%89] : memref<64xi32, #tpu.memory_space<smem>>
    %91 = arith.index_cast %87 : i32 to index
    %c0_45 = arith.constant 0 : index
    %92 = vector.load %arg3[%91, %c0_45] : memref<50x32xf32, #tpu.memory_space<vmem>>, vector<1x32xf32>
    %c1_46 = arith.constant 1 : index
    %c96_47 = arith.constant 96 : index
    %93 = vector.load %arg6[%c1_46, %c96_47] : memref<16x128xf32, #tpu.memory_space<vmem>>, vector<1x32xf32>
    tpu.vector_store %arg6[%c1_46, %c96_47], %92 {strides = array<i32>} : memref<16x128xf32, #tpu.memory_space<vmem>>, vector<1x32xf32>,
    %94 = arith.index_cast %90 : i32 to index
    %c0_48 = arith.constant 0 : index
    %95 = vector.load %arg4[%94, %c0_48] : memref<2079x32xf32, #tpu.memory_space<vmem>>, vector<1x32xf32>
    %c1_49 = arith.constant 1 : index
    %c96_50 = arith.constant 96 : index
    %96 = vector.load %arg7[%c1_49, %c96_50] : memref<16x128xf32, #tpu.memory_space<vmem>>, vector<1x32xf32>
    tpu.vector_store %arg7[%c1_49, %c96_50], %95 {strides = array<i32>} : memref<16x128xf32, #tpu.memory_space<vmem>>, vector<1x32xf32>,
    %c8_i32 = arith.constant 8 : i32
    %97 = arith.addi %0, %c8_i32 : i32
    %98 = arith.index_cast %97 : i32 to index
    %99 = memref.load %arg1[%98] : memref<64xi32, #tpu.memory_space<smem>>
    %c8_i32_51 = arith.constant 8 : i32
    %100 = arith.addi %0, %c8_i32_51 : i32
    %101 = arith.index_cast %100 : i32 to index
    %102 = memref.load %arg2[%101] : memref<64xi32, #tpu.memory_space<smem>>
    %103 = arith.index_cast %99 : i32 to index
    %c0_52 = arith.constant 0 : index
    %104 = vector.load %arg3[%103, %c0_52] : memref<50x32xf32, #tpu.memory_space<vmem>>, vector<1x32xf32>
    %c2 = arith.constant 2 : index
    %c0_53 = arith.constant 0 : index
    %105 = vector.load %arg6[%c2, %c0_53] : memref<16x128xf32, #tpu.memory_space<vmem>>, vector<1x32xf32>
    tpu.vector_store %arg6[%c2, %c0_53], %104 {strides = array<i32>} : memref<16x128xf32, #tpu.memory_space<vmem>>, vector<1x32xf32>,
    %106 = arith.index_cast %102 : i32 to index
    %c0_54 = arith.constant 0 : index
    %107 = vector.load %arg4[%106, %c0_54] : memref<2079x32xf32, #tpu.memory_space<vmem>>, vector<1x32xf32>
    %c2_55 = arith.constant 2 : index
    %c0_56 = arith.constant 0 : index
    %108 = vector.load %arg7[%c2_55, %c0_56] : memref<16x128xf32, #tpu.memory_space<vmem>>, vector<1x32xf32>
    tpu.vector_store %arg7[%c2_55, %c0_56], %107 {strides = array<i32>} : memref<16x128xf32, #tpu.memory_space<vmem>>, vector<1x32xf32>,
    %c9_i32 = arith.constant 9 : i32
    %109 = arith.addi %0, %c9_i32 : i32
    %110 = arith.index_cast %109 : i32 to index
    %111 = memref.load %arg1[%110] : memref<64xi32, #tpu.memory_space<smem>>
    %c9_i32_57 = arith.constant 9 : i32
    %112 = arith.addi %0, %c9_i32_57 : i32
    %113 = arith.index_cast %112 : i32 to index
    %114 = memref.load %arg2[%113] : memref<64xi32, #tpu.memory_space<smem>>
    %115 = arith.index_cast %111 : i32 to index
    %c0_58 = arith.constant 0 : index
    %116 = vector.load %arg3[%115, %c0_58] : memref<50x32xf32, #tpu.memory_space<vmem>>, vector<1x32xf32>
    %c2_59 = arith.constant 2 : index
    %c32_60 = arith.constant 32 : index
    %117 = vector.load %arg6[%c2_59, %c32_60] : memref<16x128xf32, #tpu.memory_space<vmem>>, vector<1x32xf32>
    tpu.vector_store %arg6[%c2_59, %c32_60], %116 {strides = array<i32>} : memref<16x128xf32, #tpu.memory_space<vmem>>, vector<1x32xf32>,
    %118 = arith.index_cast %114 : i32 to index
    %c0_61 = arith.constant 0 : index
    %119 = vector.load %arg4[%118, %c0_61] : memref<2079x32xf32, #tpu.memory_space<vmem>>, vector<1x32xf32>
    %c2_62 = arith.constant 2 : index
    %c32_63 = arith.constant 32 : index
    %120 = vector.load %arg7[%c2_62, %c32_63] : memref<16x128xf32, #tpu.memory_space<vmem>>, vector<1x32xf32>
    tpu.vector_store %arg7[%c2_62, %c32_63], %119 {strides = array<i32>} : memref<16x128xf32, #tpu.memory_space<vmem>>, vector<1x32xf32>,
    %c10_i32 = arith.constant 10 : i32
    %121 = arith.addi %0, %c10_i32 : i32
    %122 = arith.index_cast %121 : i32 to index
    %123 = memref.load %arg1[%122] : memref<64xi32, #tpu.memory_space<smem>>
    %c10_i32_64 = arith.constant 10 : i32
    %124 = arith.addi %0, %c10_i32_64 : i32
    %125 = arith.index_cast %124 : i32 to index
    %126 = memref.load %arg2[%125] : memref<64xi32, #tpu.memory_space<smem>>
    %127 = arith.index_cast %123 : i32 to index
    %c0_65 = arith.constant 0 : index
    %128 = vector.load %arg3[%127, %c0_65] : memref<50x32xf32, #tpu.memory_space<vmem>>, vector<1x32xf32>
    %c2_66 = arith.constant 2 : index
    %c64_67 = arith.constant 64 : index
    %129 = vector.load %arg6[%c2_66, %c64_67] : memref<16x128xf32, #tpu.memory_space<vmem>>, vector<1x32xf32>
    tpu.vector_store %arg6[%c2_66, %c64_67], %128 {strides = array<i32>} : memref<16x128xf32, #tpu.memory_space<vmem>>, vector<1x32xf32>,
    %130 = arith.index_cast %126 : i32 to index
    %c0_68 = arith.constant 0 : index
    %131 = vector.load %arg4[%130, %c0_68] : memref<2079x32xf32, #tpu.memory_space<vmem>>, vector<1x32xf32>
    %c2_69 = arith.constant 2 : index
    %c64_70 = arith.constant 64 : index
    %132 = vector.load %arg7[%c2_69, %c64_70] : memref<16x128xf32, #tpu.memory_space<vmem>>, vector<1x32xf32>
    tpu.vector_store %arg7[%c2_69, %c64_70], %131 {strides = array<i32>} : memref<16x128xf32, #tpu.memory_space<vmem>>, vector<1x32xf32>,
    %c11_i32 = arith.constant 11 : i32
    %133 = arith.addi %0, %c11_i32 : i32
    %134 = arith.index_cast %133 : i32 to index
    %135 = memref.load %arg1[%134] : memref<64xi32, #tpu.memory_space<smem>>
    %c11_i32_71 = arith.constant 11 : i32
    %136 = arith.addi %0, %c11_i32_71 : i32
    %137 = arith.index_cast %136 : i32 to index
    %138 = memref.load %arg2[%137] : memref<64xi32, #tpu.memory_space<smem>>
    %139 = arith.index_cast %135 : i32 to index
    %c0_72 = arith.constant 0 : index
    %140 = vector.load %arg3[%139, %c0_72] : memref<50x32xf32, #tpu.memory_space<vmem>>, vector<1x32xf32>
    %c2_73 = arith.constant 2 : index
    %c96_74 = arith.constant 96 : index
    %141 = vector.load %arg6[%c2_73, %c96_74] : memref<16x128xf32, #tpu.memory_space<vmem>>, vector<1x32xf32>
    tpu.vector_store %arg6[%c2_73, %c96_74], %140 {strides = array<i32>} : memref<16x128xf32, #tpu.memory_space<vmem>>, vector<1x32xf32>,
    %142 = arith.index_cast %138 : i32 to index
    %c0_75 = arith.constant 0 : index
    %143 = vector.load %arg4[%142, %c0_75] : memref<2079x32xf32, #tpu.memory_space<vmem>>, vector<1x32xf32>
    %c2_76 = arith.constant 2 : index
    %c96_77 = arith.constant 96 : index
    %144 = vector.load %arg7[%c2_76, %c96_77] : memref<16x128xf32, #tpu.memory_space<vmem>>, vector<1x32xf32>
    tpu.vector_store %arg7[%c2_76, %c96_77], %143 {strides = array<i32>} : memref<16x128xf32, #tpu.memory_space<vmem>>, vector<1x32xf32>,
    %c12_i32 = arith.constant 12 : i32
    %145 = arith.addi %0, %c12_i32 : i32
    %146 = arith.index_cast %145 : i32 to index
    %147 = memref.load %arg1[%146] : memref<64xi32, #tpu.memory_space<smem>>
    %c12_i32_78 = arith.constant 12 : i32
    %148 = arith.addi %0, %c12_i32_78 : i32
    %149 = arith.index_cast %148 : i32 to index
    %150 = memref.load %arg2[%149] : memref<64xi32, #tpu.memory_space<smem>>
    %151 = arith.index_cast %147 : i32 to index
    %c0_79 = arith.constant 0 : index
    %152 = vector.load %arg3[%151, %c0_79] : memref<50x32xf32, #tpu.memory_space<vmem>>, vector<1x32xf32>
    %c3 = arith.constant 3 : index
    %c0_80 = arith.constant 0 : index
    %153 = vector.load %arg6[%c3, %c0_80] : memref<16x128xf32, #tpu.memory_space<vmem>>, vector<1x32xf32>
    tpu.vector_store %arg6[%c3, %c0_80], %152 {strides = array<i32>} : memref<16x128xf32, #tpu.memory_space<vmem>>, vector<1x32xf32>,
    %154 = arith.index_cast %150 : i32 to index
    %c0_81 = arith.constant 0 : index
    %155 = vector.load %arg4[%154, %c0_81] : memref<2079x32xf32, #tpu.memory_space<vmem>>, vector<1x32xf32>
    %c3_82 = arith.constant 3 : index
    %c0_83 = arith.constant 0 : index
    %156 = vector.load %arg7[%c3_82, %c0_83] : memref<16x128xf32, #tpu.memory_space<vmem>>, vector<1x32xf32>
    tpu.vector_store %arg7[%c3_82, %c0_83], %155 {strides = array<i32>} : memref<16x128xf32, #tpu.memory_space<vmem>>, vector<1x32xf32>,
    %c13_i32 = arith.constant 13 : i32
    %157 = arith.addi %0, %c13_i32 : i32
    %158 = arith.index_cast %157 : i32 to index
    %159 = memref.load %arg1[%158] : memref<64xi32, #tpu.memory_space<smem>>
    %c13_i32_84 = arith.constant 13 : i32
    %160 = arith.addi %0, %c13_i32_84 : i32
    %161 = arith.index_cast %160 : i32 to index
    %162 = memref.load %arg2[%161] : memref<64xi32, #tpu.memory_space<smem>>
    %163 = arith.index_cast %159 : i32 to index
    %c0_85 = arith.constant 0 : index
    %164 = vector.load %arg3[%163, %c0_85] : memref<50x32xf32, #tpu.memory_space<vmem>>, vector<1x32xf32>
    %c3_86 = arith.constant 3 : index
    %c32_87 = arith.constant 32 : index
    %165 = vector.load %arg6[%c3_86, %c32_87] : memref<16x128xf32, #tpu.memory_space<vmem>>, vector<1x32xf32>
    tpu.vector_store %arg6[%c3_86, %c32_87], %164 {strides = array<i32>} : memref<16x128xf32, #tpu.memory_space<vmem>>, vector<1x32xf32>,
    %166 = arith.index_cast %162 : i32 to index
    %c0_88 = arith.constant 0 : index
    %167 = vector.load %arg4[%166, %c0_88] : memref<2079x32xf32, #tpu.memory_space<vmem>>, vector<1x32xf32>
    %c3_89 = arith.constant 3 : index
    %c32_90 = arith.constant 32 : index
    %168 = vector.load %arg7[%c3_89, %c32_90] : memref<16x128xf32, #tpu.memory_space<vmem>>, vector<1x32xf32>
    tpu.vector_store %arg7[%c3_89, %c32_90], %167 {strides = array<i32>} : memref<16x128xf32, #tpu.memory_space<vmem>>, vector<1x32xf32>,
    %c14_i32 = arith.constant 14 : i32
    %169 = arith.addi %0, %c14_i32 : i32
    %170 = arith.index_cast %169 : i32 to index
    %171 = memref.load %arg1[%170] : memref<64xi32, #tpu.memory_space<smem>>
    %c14_i32_91 = arith.constant 14 : i32
    %172 = arith.addi %0, %c14_i32_91 : i32
    %173 = arith.index_cast %172 : i32 to index
    %174 = memref.load %arg2[%173] : memref<64xi32, #tpu.memory_space<smem>>
    %175 = arith.index_cast %171 : i32 to index
    %c0_92 = arith.constant 0 : index
    %176 = vector.load %arg3[%175, %c0_92] : memref<50x32xf32, #tpu.memory_space<vmem>>, vector<1x32xf32>
    %c3_93 = arith.constant 3 : index
    %c64_94 = arith.constant 64 : index
    %177 = vector.load %arg6[%c3_93, %c64_94] : memref<16x128xf32, #tpu.memory_space<vmem>>, vector<1x32xf32>
    tpu.vector_store %arg6[%c3_93, %c64_94], %176 {strides = array<i32>} : memref<16x128xf32, #tpu.memory_space<vmem>>, vector<1x32xf32>,
    %178 = arith.index_cast %174 : i32 to index
    %c0_95 = arith.constant 0 : index
    %179 = vector.load %arg4[%178, %c0_95] : memref<2079x32xf32, #tpu.memory_space<vmem>>, vector<1x32xf32>
    %c3_96 = arith.constant 3 : index
    %c64_97 = arith.constant 64 : index
    %180 = vector.load %arg7[%c3_96, %c64_97] : memref<16x128xf32, #tpu.memory_space<vmem>>, vector<1x32xf32>
    tpu.vector_store %arg7[%c3_96, %c64_97], %179 {strides = array<i32>} : memref<16x128xf32, #tpu.memory_space<vmem>>, vector<1x32xf32>,
    %c15_i32 = arith.constant 15 : i32
    %181 = arith.addi %0, %c15_i32 : i32
    %182 = arith.index_cast %181 : i32 to index
    %183 = memref.load %arg1[%182] : memref<64xi32, #tpu.memory_space<smem>>
    %c15_i32_98 = arith.constant 15 : i32
    %184 = arith.addi %0, %c15_i32_98 : i32
    %185 = arith.index_cast %184 : i32 to index
    %186 = memref.load %arg2[%185] : memref<64xi32, #tpu.memory_space<smem>>
    %187 = arith.index_cast %183 : i32 to index
    %c0_99 = arith.constant 0 : index
    %188 = vector.load %arg3[%187, %c0_99] : memref<50x32xf32, #tpu.memory_space<vmem>>, vector<1x32xf32>
    %c3_100 = arith.constant 3 : index
    %c96_101 = arith.constant 96 : index
    %189 = vector.load %arg6[%c3_100, %c96_101] : memref<16x128xf32, #tpu.memory_space<vmem>>, vector<1x32xf32>
    tpu.vector_store %arg6[%c3_100, %c96_101], %188 {strides = array<i32>} : memref<16x128xf32, #tpu.memory_space<vmem>>, vector<1x32xf32>,
    %190 = arith.index_cast %186 : i32 to index
    %c0_102 = arith.constant 0 : index
    %191 = vector.load %arg4[%190, %c0_102] : memref<2079x32xf32, #tpu.memory_space<vmem>>, vector<1x32xf32>
    %c3_103 = arith.constant 3 : index
    %c96_104 = arith.constant 96 : index
    %192 = vector.load %arg7[%c3_103, %c96_104] : memref<16x128xf32, #tpu.memory_space<vmem>>, vector<1x32xf32>
    tpu.vector_store %arg7[%c3_103, %c96_104], %191 {strides = array<i32>} : memref<16x128xf32, #tpu.memory_space<vmem>>, vector<1x32xf32>,
    %c16_i32 = arith.constant 16 : i32
    %193 = arith.addi %0, %c16_i32 : i32
    %194 = arith.index_cast %193 : i32 to index
    %195 = memref.load %arg1[%194] : memref<64xi32, #tpu.memory_space<smem>>
    %c16_i32_105 = arith.constant 16 : i32
    %196 = arith.addi %0, %c16_i32_105 : i32
    %197 = arith.index_cast %196 : i32 to index
    %198 = memref.load %arg2[%197] : memref<64xi32, #tpu.memory_space<smem>>
    %199 = arith.index_cast %195 : i32 to index
    %c0_106 = arith.constant 0 : index
    %200 = vector.load %arg3[%199, %c0_106] : memref<50x32xf32, #tpu.memory_space<vmem>>, vector<1x32xf32>
    %c4 = arith.constant 4 : index
    %c0_107 = arith.constant 0 : index
    %201 = vector.load %arg6[%c4, %c0_107] : memref<16x128xf32, #tpu.memory_space<vmem>>, vector<1x32xf32>
    tpu.vector_store %arg6[%c4, %c0_107], %200 {strides = array<i32>} : memref<16x128xf32, #tpu.memory_space<vmem>>, vector<1x32xf32>,
    %202 = arith.index_cast %198 : i32 to index
    %c0_108 = arith.constant 0 : index
    %203 = vector.load %arg4[%202, %c0_108] : memref<2079x32xf32, #tpu.memory_space<vmem>>, vector<1x32xf32>
    %c4_109 = arith.constant 4 : index
    %c0_110 = arith.constant 0 : index
    %204 = vector.load %arg7[%c4_109, %c0_110] : memref<16x128xf32, #tpu.memory_space<vmem>>, vector<1x32xf32>
    tpu.vector_store %arg7[%c4_109, %c0_110], %203 {strides = array<i32>} : memref<16x128xf32, #tpu.memory_space<vmem>>, vector<1x32xf32>,
    %c17_i32 = arith.constant 17 : i32
    %205 = arith.addi %0, %c17_i32 : i32
    %206 = arith.index_cast %205 : i32 to index
    %207 = memref.load %arg1[%206] : memref<64xi32, #tpu.memory_space<smem>>
    %c17_i32_111 = arith.constant 17 : i32
    %208 = arith.addi %0, %c17_i32_111 : i32
    %209 = arith.index_cast %208 : i32 to index
    %210 = memref.load %arg2[%209] : memref<64xi32, #tpu.memory_space<smem>>
    %211 = arith.index_cast %207 : i32 to index
    %c0_112 = arith.constant 0 : index
    %212 = vector.load %arg3[%211, %c0_112] : memref<50x32xf32, #tpu.memory_space<vmem>>, vector<1x32xf32>
    %c4_113 = arith.constant 4 : index
    %c32_114 = arith.constant 32 : index
    %213 = vector.load %arg6[%c4_113, %c32_114] : memref<16x128xf32, #tpu.memory_space<vmem>>, vector<1x32xf32>
    tpu.vector_store %arg6[%c4_113, %c32_114], %212 {strides = array<i32>} : memref<16x128xf32, #tpu.memory_space<vmem>>, vector<1x32xf32>,
    %214 = arith.index_cast %210 : i32 to index
    %c0_115 = arith.constant 0 : index
    %215 = vector.load %arg4[%214, %c0_115] : memref<2079x32xf32, #tpu.memory_space<vmem>>, vector<1x32xf32>
    %c4_116 = arith.constant 4 : index
    %c32_117 = arith.constant 32 : index
    %216 = vector.load %arg7[%c4_116, %c32_117] : memref<16x128xf32, #tpu.memory_space<vmem>>, vector<1x32xf32>
    tpu.vector_store %arg7[%c4_116, %c32_117], %215 {strides = array<i32>} : memref<16x128xf32, #tpu.memory_space<vmem>>, vector<1x32xf32>,
    %c18_i32 = arith.constant 18 : i32
    %217 = arith.addi %0, %c18_i32 : i32
    %218 = arith.index_cast %217 : i32 to index
    %219 = memref.load %arg1[%218] : memref<64xi32, #tpu.memory_space<smem>>
    %c18_i32_118 = arith.constant 18 : i32
    %220 = arith.addi %0, %c18_i32_118 : i32
    %221 = arith.index_cast %220 : i32 to index
    %222 = memref.load %arg2[%221] : memref<64xi32, #tpu.memory_space<smem>>
    %223 = arith.index_cast %219 : i32 to index
    %c0_119 = arith.constant 0 : index
    %224 = vector.load %arg3[%223, %c0_119] : memref<50x32xf32, #tpu.memory_space<vmem>>, vector<1x32xf32>
    %c4_120 = arith.constant 4 : index
    %c64_121 = arith.constant 64 : index
    %225 = vector.load %arg6[%c4_120, %c64_121] : memref<16x128xf32, #tpu.memory_space<vmem>>, vector<1x32xf32>
    tpu.vector_store %arg6[%c4_120, %c64_121], %224 {strides = array<i32>} : memref<16x128xf32, #tpu.memory_space<vmem>>, vector<1x32xf32>,
    %226 = arith.index_cast %222 : i32 to index
    %c0_122 = arith.constant 0 : index
    %227 = vector.load %arg4[%226, %c0_122] : memref<2079x32xf32, #tpu.memory_space<vmem>>, vector<1x32xf32>
    %c4_123 = arith.constant 4 : index
    %c64_124 = arith.constant 64 : index
    %228 = vector.load %arg7[%c4_123, %c64_124] : memref<16x128xf32, #tpu.memory_space<vmem>>, vector<1x32xf32>
    tpu.vector_store %arg7[%c4_123, %c64_124], %227 {strides = array<i32>} : memref<16x128xf32, #tpu.memory_space<vmem>>, vector<1x32xf32>,
    %c19_i32 = arith.constant 19 : i32
    %229 = arith.addi %0, %c19_i32 : i32
    %230 = arith.index_cast %229 : i32 to index
    %231 = memref.load %arg1[%230] : memref<64xi32, #tpu.memory_space<smem>>
    %c19_i32_125 = arith.constant 19 : i32
    %232 = arith.addi %0, %c19_i32_125 : i32
    %233 = arith.index_cast %232 : i32 to index
    %234 = memref.load %arg2[%233] : memref<64xi32, #tpu.memory_space<smem>>
    %235 = arith.index_cast %231 : i32 to index
    %c0_126 = arith.constant 0 : index
    %236 = vector.load %arg3[%235, %c0_126] : memref<50x32xf32, #tpu.memory_space<vmem>>, vector<1x32xf32>
    %c4_127 = arith.constant 4 : index
    %c96_128 = arith.constant 96 : index
    %237 = vector.load %arg6[%c4_127, %c96_128] : memref<16x128xf32, #tpu.memory_space<vmem>>, vector<1x32xf32>
    tpu.vector_store %arg6[%c4_127, %c96_128], %236 {strides = array<i32>} : memref<16x128xf32, #tpu.memory_space<vmem>>, vector<1x32xf32>,
    %238 = arith.index_cast %234 : i32 to index
    %c0_129 = arith.constant 0 : index
    %239 = vector.load %arg4[%238, %c0_129] : memref<2079x32xf32, #tpu.memory_space<vmem>>, vector<1x32xf32>
    %c4_130 = arith.constant 4 : index
    %c96_131 = arith.constant 96 : index
    %240 = vector.load %arg7[%c4_130, %c96_131] : memref<16x128xf32, #tpu.memory_space<vmem>>, vector<1x32xf32>
    tpu.vector_store %arg7[%c4_130, %c96_131], %239 {strides = array<i32>} : memref<16x128xf32, #tpu.memory_space<vmem>>, vector<1x32xf32>,
    %c20_i32 = arith.constant 20 : i32
    %241 = arith.addi %0, %c20_i32 : i32
    %242 = arith.index_cast %241 : i32 to index
    %243 = memref.load %arg1[%242] : memref<64xi32, #tpu.memory_space<smem>>
    %c20_i32_132 = arith.constant 20 : i32
    %244 = arith.addi %0, %c20_i32_132 : i32
    %245 = arith.index_cast %244 : i32 to index
    %246 = memref.load %arg2[%245] : memref<64xi32, #tpu.memory_space<smem>>
    %247 = arith.index_cast %243 : i32 to index
    %c0_133 = arith.constant 0 : index
    %248 = vector.load %arg3[%247, %c0_133] : memref<50x32xf32, #tpu.memory_space<vmem>>, vector<1x32xf32>
    %c5 = arith.constant 5 : index
    %c0_134 = arith.constant 0 : index
    %249 = vector.load %arg6[%c5, %c0_134] : memref<16x128xf32, #tpu.memory_space<vmem>>, vector<1x32xf32>
    tpu.vector_store %arg6[%c5, %c0_134], %248 {strides = array<i32>} : memref<16x128xf32, #tpu.memory_space<vmem>>, vector<1x32xf32>,
    %250 = arith.index_cast %246 : i32 to index
    %c0_135 = arith.constant 0 : index
    %251 = vector.load %arg4[%250, %c0_135] : memref<2079x32xf32, #tpu.memory_space<vmem>>, vector<1x32xf32>
    %c5_136 = arith.constant 5 : index
    %c0_137 = arith.constant 0 : index
    %252 = vector.load %arg7[%c5_136, %c0_137] : memref<16x128xf32, #tpu.memory_space<vmem>>, vector<1x32xf32>
    tpu.vector_store %arg7[%c5_136, %c0_137], %251 {strides = array<i32>} : memref<16x128xf32, #tpu.memory_space<vmem>>, vector<1x32xf32>,
    %c21_i32 = arith.constant 21 : i32
    %253 = arith.addi %0, %c21_i32 : i32
    %254 = arith.index_cast %253 : i32 to index
    %255 = memref.load %arg1[%254] : memref<64xi32, #tpu.memory_space<smem>>
    %c21_i32_138 = arith.constant 21 : i32
    %256 = arith.addi %0, %c21_i32_138 : i32
    %257 = arith.index_cast %256 : i32 to index
    %258 = memref.load %arg2[%257] : memref<64xi32, #tpu.memory_space<smem>>
    %259 = arith.index_cast %255 : i32 to index
    %c0_139 = arith.constant 0 : index
    %260 = vector.load %arg3[%259, %c0_139] : memref<50x32xf32, #tpu.memory_space<vmem>>, vector<1x32xf32>
    %c5_140 = arith.constant 5 : index
    %c32_141 = arith.constant 32 : index
    %261 = vector.load %arg6[%c5_140, %c32_141] : memref<16x128xf32, #tpu.memory_space<vmem>>, vector<1x32xf32>
    tpu.vector_store %arg6[%c5_140, %c32_141], %260 {strides = array<i32>} : memref<16x128xf32, #tpu.memory_space<vmem>>, vector<1x32xf32>,
    %262 = arith.index_cast %258 : i32 to index
    %c0_142 = arith.constant 0 : index
    %263 = vector.load %arg4[%262, %c0_142] : memref<2079x32xf32, #tpu.memory_space<vmem>>, vector<1x32xf32>
    %c5_143 = arith.constant 5 : index
    %c32_144 = arith.constant 32 : index
    %264 = vector.load %arg7[%c5_143, %c32_144] : memref<16x128xf32, #tpu.memory_space<vmem>>, vector<1x32xf32>
    tpu.vector_store %arg7[%c5_143, %c32_144], %263 {strides = array<i32>} : memref<16x128xf32, #tpu.memory_space<vmem>>, vector<1x32xf32>,
    %c22_i32 = arith.constant 22 : i32
    %265 = arith.addi %0, %c22_i32 : i32
    %266 = arith.index_cast %265 : i32 to index
    %267 = memref.load %arg1[%266] : memref<64xi32, #tpu.memory_space<smem>>
    %c22_i32_145 = arith.constant 22 : i32
    %268 = arith.addi %0, %c22_i32_145 : i32
    %269 = arith.index_cast %268 : i32 to index
    %270 = memref.load %arg2[%269] : memref<64xi32, #tpu.memory_space<smem>>
    %271 = arith.index_cast %267 : i32 to index
    %c0_146 = arith.constant 0 : index
    %272 = vector.load %arg3[%271, %c0_146] : memref<50x32xf32, #tpu.memory_space<vmem>>, vector<1x32xf32>
    %c5_147 = arith.constant 5 : index
    %c64_148 = arith.constant 64 : index
    %273 = vector.load %arg6[%c5_147, %c64_148] : memref<16x128xf32, #tpu.memory_space<vmem>>, vector<1x32xf32>
    tpu.vector_store %arg6[%c5_147, %c64_148], %272 {strides = array<i32>} : memref<16x128xf32, #tpu.memory_space<vmem>>, vector<1x32xf32>,
    %274 = arith.index_cast %270 : i32 to index
    %c0_149 = arith.constant 0 : index
    %275 = vector.load %arg4[%274, %c0_149] : memref<2079x32xf32, #tpu.memory_space<vmem>>, vector<1x32xf32>
    %c5_150 = arith.constant 5 : index
    %c64_151 = arith.constant 64 : index
    %276 = vector.load %arg7[%c5_150, %c64_151] : memref<16x128xf32, #tpu.memory_space<vmem>>, vector<1x32xf32>
    tpu.vector_store %arg7[%c5_150, %c64_151], %275 {strides = array<i32>} : memref<16x128xf32, #tpu.memory_space<vmem>>, vector<1x32xf32>,
    %c23_i32 = arith.constant 23 : i32
    %277 = arith.addi %0, %c23_i32 : i32
    %278 = arith.index_cast %277 : i32 to index
    %279 = memref.load %arg1[%278] : memref<64xi32, #tpu.memory_space<smem>>
    %c23_i32_152 = arith.constant 23 : i32
    %280 = arith.addi %0, %c23_i32_152 : i32
    %281 = arith.index_cast %280 : i32 to index
    %282 = memref.load %arg2[%281] : memref<64xi32, #tpu.memory_space<smem>>
    %283 = arith.index_cast %279 : i32 to index
    %c0_153 = arith.constant 0 : index
    %284 = vector.load %arg3[%283, %c0_153] : memref<50x32xf32, #tpu.memory_space<vmem>>, vector<1x32xf32>
    %c5_154 = arith.constant 5 : index
    %c96_155 = arith.constant 96 : index
    %285 = vector.load %arg6[%c5_154, %c96_155] : memref<16x128xf32, #tpu.memory_space<vmem>>, vector<1x32xf32>
    tpu.vector_store %arg6[%c5_154, %c96_155], %284 {strides = array<i32>} : memref<16x128xf32, #tpu.memory_space<vmem>>, vector<1x32xf32>,
    %286 = arith.index_cast %282 : i32 to index
    %c0_156 = arith.constant 0 : index
    %287 = vector.load %arg4[%286, %c0_156] : memref<2079x32xf32, #tpu.memory_space<vmem>>, vector<1x32xf32>
    %c5_157 = arith.constant 5 : index
    %c96_158 = arith.constant 96 : index
    %288 = vector.load %arg7[%c5_157, %c96_158] : memref<16x128xf32, #tpu.memory_space<vmem>>, vector<1x32xf32>
    tpu.vector_store %arg7[%c5_157, %c96_158], %287 {strides = array<i32>} : memref<16x128xf32, #tpu.memory_space<vmem>>, vector<1x32xf32>,
    %c24_i32 = arith.constant 24 : i32
    %289 = arith.addi %0, %c24_i32 : i32
    %290 = arith.index_cast %289 : i32 to index
    %291 = memref.load %arg1[%290] : memref<64xi32, #tpu.memory_space<smem>>
    %c24_i32_159 = arith.constant 24 : i32
    %292 = arith.addi %0, %c24_i32_159 : i32
    %293 = arith.index_cast %292 : i32 to index
    %294 = memref.load %arg2[%293] : memref<64xi32, #tpu.memory_space<smem>>
    %295 = arith.index_cast %291 : i32 to index
    %c0_160 = arith.constant 0 : index
    %296 = vector.load %arg3[%295, %c0_160] : memref<50x32xf32, #tpu.memory_space<vmem>>, vector<1x32xf32>
    %c6 = arith.constant 6 : index
    %c0_161 = arith.constant 0 : index
    %297 = vector.load %arg6[%c6, %c0_161] : memref<16x128xf32, #tpu.memory_space<vmem>>, vector<1x32xf32>
    tpu.vector_store %arg6[%c6, %c0_161], %296 {strides = array<i32>} : memref<16x128xf32, #tpu.memory_space<vmem>>, vector<1x32xf32>,
    %298 = arith.index_cast %294 : i32 to index
    %c0_162 = arith.constant 0 : index
    %299 = vector.load %arg4[%298, %c0_162] : memref<2079x32xf32, #tpu.memory_space<vmem>>, vector<1x32xf32>
    %c6_163 = arith.constant 6 : index
    %c0_164 = arith.constant 0 : index
    %300 = vector.load %arg7[%c6_163, %c0_164] : memref<16x128xf32, #tpu.memory_space<vmem>>, vector<1x32xf32>
    tpu.vector_store %arg7[%c6_163, %c0_164], %299 {strides = array<i32>} : memref<16x128xf32, #tpu.memory_space<vmem>>, vector<1x32xf32>,
    %c25_i32 = arith.constant 25 : i32
    %301 = arith.addi %0, %c25_i32 : i32
    %302 = arith.index_cast %301 : i32 to index
    %303 = memref.load %arg1[%302] : memref<64xi32, #tpu.memory_space<smem>>
    %c25_i32_165 = arith.constant 25 : i32
    %304 = arith.addi %0, %c25_i32_165 : i32
    %305 = arith.index_cast %304 : i32 to index
    %306 = memref.load %arg2[%305] : memref<64xi32, #tpu.memory_space<smem>>
    %307 = arith.index_cast %303 : i32 to index
    %c0_166 = arith.constant 0 : index
    %308 = vector.load %arg3[%307, %c0_166] : memref<50x32xf32, #tpu.memory_space<vmem>>, vector<1x32xf32>
    %c6_167 = arith.constant 6 : index
    %c32_168 = arith.constant 32 : index
    %309 = vector.load %arg6[%c6_167, %c32_168] : memref<16x128xf32, #tpu.memory_space<vmem>>, vector<1x32xf32>
    tpu.vector_store %arg6[%c6_167, %c32_168], %308 {strides = array<i32>} : memref<16x128xf32, #tpu.memory_space<vmem>>, vector<1x32xf32>,
    %310 = arith.index_cast %306 : i32 to index
    %c0_169 = arith.constant 0 : index
    %311 = vector.load %arg4[%310, %c0_169] : memref<2079x32xf32, #tpu.memory_space<vmem>>, vector<1x32xf32>
    %c6_170 = arith.constant 6 : index
    %c32_171 = arith.constant 32 : index
    %312 = vector.load %arg7[%c6_170, %c32_171] : memref<16x128xf32, #tpu.memory_space<vmem>>, vector<1x32xf32>
    tpu.vector_store %arg7[%c6_170, %c32_171], %311 {strides = array<i32>} : memref<16x128xf32, #tpu.memory_space<vmem>>, vector<1x32xf32>,
    %c26_i32 = arith.constant 26 : i32
    %313 = arith.addi %0, %c26_i32 : i32
    %314 = arith.index_cast %313 : i32 to index
    %315 = memref.load %arg1[%314] : memref<64xi32, #tpu.memory_space<smem>>
    %c26_i32_172 = arith.constant 26 : i32
    %316 = arith.addi %0, %c26_i32_172 : i32
    %317 = arith.index_cast %316 : i32 to index
    %318 = memref.load %arg2[%317] : memref<64xi32, #tpu.memory_space<smem>>
    %319 = arith.index_cast %315 : i32 to index
    %c0_173 = arith.constant 0 : index
    %320 = vector.load %arg3[%319, %c0_173] : memref<50x32xf32, #tpu.memory_space<vmem>>, vector<1x32xf32>
    %c6_174 = arith.constant 6 : index
    %c64_175 = arith.constant 64 : index
    %321 = vector.load %arg6[%c6_174, %c64_175] : memref<16x128xf32, #tpu.memory_space<vmem>>, vector<1x32xf32>
    tpu.vector_store %arg6[%c6_174, %c64_175], %320 {strides = array<i32>} : memref<16x128xf32, #tpu.memory_space<vmem>>, vector<1x32xf32>,
    %322 = arith.index_cast %318 : i32 to index
    %c0_176 = arith.constant 0 : index
    %323 = vector.load %arg4[%322, %c0_176] : memref<2079x32xf32, #tpu.memory_space<vmem>>, vector<1x32xf32>
    %c6_177 = arith.constant 6 : index
    %c64_178 = arith.constant 64 : index
    %324 = vector.load %arg7[%c6_177, %c64_178] : memref<16x128xf32, #tpu.memory_space<vmem>>, vector<1x32xf32>
    tpu.vector_store %arg7[%c6_177, %c64_178], %323 {strides = array<i32>} : memref<16x128xf32, #tpu.memory_space<vmem>>, vector<1x32xf32>,
    %c27_i32 = arith.constant 27 : i32
    %325 = arith.addi %0, %c27_i32 : i32
    %326 = arith.index_cast %325 : i32 to index
    %327 = memref.load %arg1[%326] : memref<64xi32, #tpu.memory_space<smem>>
    %c27_i32_179 = arith.constant 27 : i32
    %328 = arith.addi %0, %c27_i32_179 : i32
    %329 = arith.index_cast %328 : i32 to index
    %330 = memref.load %arg2[%329] : memref<64xi32, #tpu.memory_space<smem>>
    %331 = arith.index_cast %327 : i32 to index
    %c0_180 = arith.constant 0 : index
    %332 = vector.load %arg3[%331, %c0_180] : memref<50x32xf32, #tpu.memory_space<vmem>>, vector<1x32xf32>
    %c6_181 = arith.constant 6 : index
    %c96_182 = arith.constant 96 : index
    %333 = vector.load %arg6[%c6_181, %c96_182] : memref<16x128xf32, #tpu.memory_space<vmem>>, vector<1x32xf32>
    tpu.vector_store %arg6[%c6_181, %c96_182], %332 {strides = array<i32>} : memref<16x128xf32, #tpu.memory_space<vmem>>, vector<1x32xf32>,
    %334 = arith.index_cast %330 : i32 to index
    %c0_183 = arith.constant 0 : index
    %335 = vector.load %arg4[%334, %c0_183] : memref<2079x32xf32, #tpu.memory_space<vmem>>, vector<1x32xf32>
    %c6_184 = arith.constant 6 : index
    %c96_185 = arith.constant 96 : index
    %336 = vector.load %arg7[%c6_184, %c96_185] : memref<16x128xf32, #tpu.memory_space<vmem>>, vector<1x32xf32>
    tpu.vector_store %arg7[%c6_184, %c96_185], %335 {strides = array<i32>} : memref<16x128xf32, #tpu.memory_space<vmem>>, vector<1x32xf32>,
    %c28_i32 = arith.constant 28 : i32
    %337 = arith.addi %0, %c28_i32 : i32
    %338 = arith.index_cast %337 : i32 to index
    %339 = memref.load %arg1[%338] : memref<64xi32, #tpu.memory_space<smem>>
    %c28_i32_186 = arith.constant 28 : i32
    %340 = arith.addi %0, %c28_i32_186 : i32
    %341 = arith.index_cast %340 : i32 to index
    %342 = memref.load %arg2[%341] : memref<64xi32, #tpu.memory_space<smem>>
    %343 = arith.index_cast %339 : i32 to index
    %c0_187 = arith.constant 0 : index
    %344 = vector.load %arg3[%343, %c0_187] : memref<50x32xf32, #tpu.memory_space<vmem>>, vector<1x32xf32>
    %c7 = arith.constant 7 : index
    %c0_188 = arith.constant 0 : index
    %345 = vector.load %arg6[%c7, %c0_188] : memref<16x128xf32, #tpu.memory_space<vmem>>, vector<1x32xf32>
    tpu.vector_store %arg6[%c7, %c0_188], %344 {strides = array<i32>} : memref<16x128xf32, #tpu.memory_space<vmem>>, vector<1x32xf32>,
    %346 = arith.index_cast %342 : i32 to index
    %c0_189 = arith.constant 0 : index
    %347 = vector.load %arg4[%346, %c0_189] : memref<2079x32xf32, #tpu.memory_space<vmem>>, vector<1x32xf32>
    %c7_190 = arith.constant 7 : index
    %c0_191 = arith.constant 0 : index
    %348 = vector.load %arg7[%c7_190, %c0_191] : memref<16x128xf32, #tpu.memory_space<vmem>>, vector<1x32xf32>
    tpu.vector_store %arg7[%c7_190, %c0_191], %347 {strides = array<i32>} : memref<16x128xf32, #tpu.memory_space<vmem>>, vector<1x32xf32>,
    %c29_i32 = arith.constant 29 : i32
    %349 = arith.addi %0, %c29_i32 : i32
    %350 = arith.index_cast %349 : i32 to index
    %351 = memref.load %arg1[%350] : memref<64xi32, #tpu.memory_space<smem>>
    %c29_i32_192 = arith.constant 29 : i32
    %352 = arith.addi %0, %c29_i32_192 : i32
    %353 = arith.index_cast %352 : i32 to index
    %354 = memref.load %arg2[%353] : memref<64xi32, #tpu.memory_space<smem>>
    %355 = arith.index_cast %351 : i32 to index
    %c0_193 = arith.constant 0 : index
    %356 = vector.load %arg3[%355, %c0_193] : memref<50x32xf32, #tpu.memory_space<vmem>>, vector<1x32xf32>
    %c7_194 = arith.constant 7 : index
    %c32_195 = arith.constant 32 : index
    %357 = vector.load %arg6[%c7_194, %c32_195] : memref<16x128xf32, #tpu.memory_space<vmem>>, vector<1x32xf32>
    tpu.vector_store %arg6[%c7_194, %c32_195], %356 {strides = array<i32>} : memref<16x128xf32, #tpu.memory_space<vmem>>, vector<1x32xf32>,
    %358 = arith.index_cast %354 : i32 to index
    %c0_196 = arith.constant 0 : index
    %359 = vector.load %arg4[%358, %c0_196] : memref<2079x32xf32, #tpu.memory_space<vmem>>, vector<1x32xf32>
    %c7_197 = arith.constant 7 : index
    %c32_198 = arith.constant 32 : index
    %360 = vector.load %arg7[%c7_197, %c32_198] : memref<16x128xf32, #tpu.memory_space<vmem>>, vector<1x32xf32>
    tpu.vector_store %arg7[%c7_197, %c32_198], %359 {strides = array<i32>} : memref<16x128xf32, #tpu.memory_space<vmem>>, vector<1x32xf32>,
    %c30_i32 = arith.constant 30 : i32
    %361 = arith.addi %0, %c30_i32 : i32
    %362 = arith.index_cast %361 : i32 to index
    %363 = memref.load %arg1[%362] : memref<64xi32, #tpu.memory_space<smem>>
    %c30_i32_199 = arith.constant 30 : i32
    %364 = arith.addi %0, %c30_i32_199 : i32
    %365 = arith.index_cast %364 : i32 to index
    %366 = memref.load %arg2[%365] : memref<64xi32, #tpu.memory_space<smem>>
    %367 = arith.index_cast %363 : i32 to index
    %c0_200 = arith.constant 0 : index
    %368 = vector.load %arg3[%367, %c0_200] : memref<50x32xf32, #tpu.memory_space<vmem>>, vector<1x32xf32>
    %c7_201 = arith.constant 7 : index
    %c64_202 = arith.constant 64 : index
    %369 = vector.load %arg6[%c7_201, %c64_202] : memref<16x128xf32, #tpu.memory_space<vmem>>, vector<1x32xf32>
    tpu.vector_store %arg6[%c7_201, %c64_202], %368 {strides = array<i32>} : memref<16x128xf32, #tpu.memory_space<vmem>>, vector<1x32xf32>,
    %370 = arith.index_cast %366 : i32 to index
    %c0_203 = arith.constant 0 : index
    %371 = vector.load %arg4[%370, %c0_203] : memref<2079x32xf32, #tpu.memory_space<vmem>>, vector<1x32xf32>
    %c7_204 = arith.constant 7 : index
    %c64_205 = arith.constant 64 : index
    %372 = vector.load %arg7[%c7_204, %c64_205] : memref<16x128xf32, #tpu.memory_space<vmem>>, vector<1x32xf32>
    tpu.vector_store %arg7[%c7_204, %c64_205], %371 {strides = array<i32>} : memref<16x128xf32, #tpu.memory_space<vmem>>, vector<1x32xf32>,
    %c31_i32 = arith.constant 31 : i32
    %373 = arith.addi %0, %c31_i32 : i32
    %374 = arith.index_cast %373 : i32 to index
    %375 = memref.load %arg1[%374] : memref<64xi32, #tpu.memory_space<smem>>
    %c31_i32_206 = arith.constant 31 : i32
    %376 = arith.addi %0, %c31_i32_206 : i32
    %377 = arith.index_cast %376 : i32 to index
    %378 = memref.load %arg2[%377] : memref<64xi32, #tpu.memory_space<smem>>
    %379 = arith.index_cast %375 : i32 to index
    %c0_207 = arith.constant 0 : index
    %380 = vector.load %arg3[%379, %c0_207] : memref<50x32xf32, #tpu.memory_space<vmem>>, vector<1x32xf32>
    %c7_208 = arith.constant 7 : index
    %c96_209 = arith.constant 96 : index
    %381 = vector.load %arg6[%c7_208, %c96_209] : memref<16x128xf32, #tpu.memory_space<vmem>>, vector<1x32xf32>
    tpu.vector_store %arg6[%c7_208, %c96_209], %380 {strides = array<i32>} : memref<16x128xf32, #tpu.memory_space<vmem>>, vector<1x32xf32>,
    %382 = arith.index_cast %378 : i32 to index
    %c0_210 = arith.constant 0 : index
    %383 = vector.load %arg4[%382, %c0_210] : memref<2079x32xf32, #tpu.memory_space<vmem>>, vector<1x32xf32>
    %c7_211 = arith.constant 7 : index
    %c96_212 = arith.constant 96 : index
    %384 = vector.load %arg7[%c7_211, %c96_212] : memref<16x128xf32, #tpu.memory_space<vmem>>, vector<1x32xf32>
    tpu.vector_store %arg7[%c7_211, %c96_212], %383 {strides = array<i32>} : memref<16x128xf32, #tpu.memory_space<vmem>>, vector<1x32xf32>,
    %c32_i32 = arith.constant 32 : i32
    %385 = arith.addi %0, %c32_i32 : i32
    %386 = arith.index_cast %385 : i32 to index
    %387 = memref.load %arg1[%386] : memref<64xi32, #tpu.memory_space<smem>>
    %c32_i32_213 = arith.constant 32 : i32
    %388 = arith.addi %0, %c32_i32_213 : i32
    %389 = arith.index_cast %388 : i32 to index
    %390 = memref.load %arg2[%389] : memref<64xi32, #tpu.memory_space<smem>>
    %391 = arith.index_cast %387 : i32 to index
    %c0_214 = arith.constant 0 : index
    %392 = vector.load %arg3[%391, %c0_214] : memref<50x32xf32, #tpu.memory_space<vmem>>, vector<1x32xf32>
    %c8 = arith.constant 8 : index
    %c0_215 = arith.constant 0 : index
    %393 = vector.load %arg6[%c8, %c0_215] : memref<16x128xf32, #tpu.memory_space<vmem>>, vector<1x32xf32>
    tpu.vector_store %arg6[%c8, %c0_215], %392 {strides = array<i32>} : memref<16x128xf32, #tpu.memory_space<vmem>>, vector<1x32xf32>,
    %394 = arith.index_cast %390 : i32 to index
    %c0_216 = arith.constant 0 : index
    %395 = vector.load %arg4[%394, %c0_216] : memref<2079x32xf32, #tpu.memory_space<vmem>>, vector<1x32xf32>
    %c8_217 = arith.constant 8 : index
    %c0_218 = arith.constant 0 : index
    %396 = vector.load %arg7[%c8_217, %c0_218] : memref<16x128xf32, #tpu.memory_space<vmem>>, vector<1x32xf32>
    tpu.vector_store %arg7[%c8_217, %c0_218], %395 {strides = array<i32>} : memref<16x128xf32, #tpu.memory_space<vmem>>, vector<1x32xf32>,
    %c33_i32 = arith.constant 33 : i32
    %397 = arith.addi %0, %c33_i32 : i32
    %398 = arith.index_cast %397 : i32 to index
    %399 = memref.load %arg1[%398] : memref<64xi32, #tpu.memory_space<smem>>
    %c33_i32_219 = arith.constant 33 : i32
    %400 = arith.addi %0, %c33_i32_219 : i32
    %401 = arith.index_cast %400 : i32 to index
    %402 = memref.load %arg2[%401] : memref<64xi32, #tpu.memory_space<smem>>
    %403 = arith.index_cast %399 : i32 to index
    %c0_220 = arith.constant 0 : index
    %404 = vector.load %arg3[%403, %c0_220] : memref<50x32xf32, #tpu.memory_space<vmem>>, vector<1x32xf32>
    %c8_221 = arith.constant 8 : index
    %c32_222 = arith.constant 32 : index
    %405 = vector.load %arg6[%c8_221, %c32_222] : memref<16x128xf32, #tpu.memory_space<vmem>>, vector<1x32xf32>
    tpu.vector_store %arg6[%c8_221, %c32_222], %404 {strides = array<i32>} : memref<16x128xf32, #tpu.memory_space<vmem>>, vector<1x32xf32>,
    %406 = arith.index_cast %402 : i32 to index
    %c0_223 = arith.constant 0 : index
    %407 = vector.load %arg4[%406, %c0_223] : memref<2079x32xf32, #tpu.memory_space<vmem>>, vector<1x32xf32>
    %c8_224 = arith.constant 8 : index
    %c32_225 = arith.constant 32 : index
    %408 = vector.load %arg7[%c8_224, %c32_225] : memref<16x128xf32, #tpu.memory_space<vmem>>, vector<1x32xf32>
    tpu.vector_store %arg7[%c8_224, %c32_225], %407 {strides = array<i32>} : memref<16x128xf32, #tpu.memory_space<vmem>>, vector<1x32xf32>,
    %c34_i32 = arith.constant 34 : i32
    %409 = arith.addi %0, %c34_i32 : i32
    %410 = arith.index_cast %409 : i32 to index
    %411 = memref.load %arg1[%410] : memref<64xi32, #tpu.memory_space<smem>>
    %c34_i32_226 = arith.constant 34 : i32
    %412 = arith.addi %0, %c34_i32_226 : i32
    %413 = arith.index_cast %412 : i32 to index
    %414 = memref.load %arg2[%413] : memref<64xi32, #tpu.memory_space<smem>>
    %415 = arith.index_cast %411 : i32 to index
    %c0_227 = arith.constant 0 : index
    %416 = vector.load %arg3[%415, %c0_227] : memref<50x32xf32, #tpu.memory_space<vmem>>, vector<1x32xf32>
    %c8_228 = arith.constant 8 : index
    %c64_229 = arith.constant 64 : index
    %417 = vector.load %arg6[%c8_228, %c64_229] : memref<16x128xf32, #tpu.memory_space<vmem>>, vector<1x32xf32>
    tpu.vector_store %arg6[%c8_228, %c64_229], %416 {strides = array<i32>} : memref<16x128xf32, #tpu.memory_space<vmem>>, vector<1x32xf32>,
    %418 = arith.index_cast %414 : i32 to index
    %c0_230 = arith.constant 0 : index
    %419 = vector.load %arg4[%418, %c0_230] : memref<2079x32xf32, #tpu.memory_space<vmem>>, vector<1x32xf32>
    %c8_231 = arith.constant 8 : index
    %c64_232 = arith.constant 64 : index
    %420 = vector.load %arg7[%c8_231, %c64_232] : memref<16x128xf32, #tpu.memory_space<vmem>>, vector<1x32xf32>
    tpu.vector_store %arg7[%c8_231, %c64_232], %419 {strides = array<i32>} : memref<16x128xf32, #tpu.memory_space<vmem>>, vector<1x32xf32>,
    %c35_i32 = arith.constant 35 : i32
    %421 = arith.addi %0, %c35_i32 : i32
    %422 = arith.index_cast %421 : i32 to index
    %423 = memref.load %arg1[%422] : memref<64xi32, #tpu.memory_space<smem>>
    %c35_i32_233 = arith.constant 35 : i32
    %424 = arith.addi %0, %c35_i32_233 : i32
    %425 = arith.index_cast %424 : i32 to index
    %426 = memref.load %arg2[%425] : memref<64xi32, #tpu.memory_space<smem>>
    %427 = arith.index_cast %423 : i32 to index
    %c0_234 = arith.constant 0 : index
    %428 = vector.load %arg3[%427, %c0_234] : memref<50x32xf32, #tpu.memory_space<vmem>>, vector<1x32xf32>
    %c8_235 = arith.constant 8 : index
    %c96_236 = arith.constant 96 : index
    %429 = vector.load %arg6[%c8_235, %c96_236] : memref<16x128xf32, #tpu.memory_space<vmem>>, vector<1x32xf32>
    tpu.vector_store %arg6[%c8_235, %c96_236], %428 {strides = array<i32>} : memref<16x128xf32, #tpu.memory_space<vmem>>, vector<1x32xf32>,
    %430 = arith.index_cast %426 : i32 to index
    %c0_237 = arith.constant 0 : index
    %431 = vector.load %arg4[%430, %c0_237] : memref<2079x32xf32, #tpu.memory_space<vmem>>, vector<1x32xf32>
    %c8_238 = arith.constant 8 : index
    %c96_239 = arith.constant 96 : index
    %432 = vector.load %arg7[%c8_238, %c96_239] : memref<16x128xf32, #tpu.memory_space<vmem>>, vector<1x32xf32>
    tpu.vector_store %arg7[%c8_238, %c96_239], %431 {strides = array<i32>} : memref<16x128xf32, #tpu.memory_space<vmem>>, vector<1x32xf32>,
    %c36_i32 = arith.constant 36 : i32
    %433 = arith.addi %0, %c36_i32 : i32
    %434 = arith.index_cast %433 : i32 to index
    %435 = memref.load %arg1[%434] : memref<64xi32, #tpu.memory_space<smem>>
    %c36_i32_240 = arith.constant 36 : i32
    %436 = arith.addi %0, %c36_i32_240 : i32
    %437 = arith.index_cast %436 : i32 to index
    %438 = memref.load %arg2[%437] : memref<64xi32, #tpu.memory_space<smem>>
    %439 = arith.index_cast %435 : i32 to index
    %c0_241 = arith.constant 0 : index
    %440 = vector.load %arg3[%439, %c0_241] : memref<50x32xf32, #tpu.memory_space<vmem>>, vector<1x32xf32>
    %c9 = arith.constant 9 : index
    %c0_242 = arith.constant 0 : index
    %441 = vector.load %arg6[%c9, %c0_242] : memref<16x128xf32, #tpu.memory_space<vmem>>, vector<1x32xf32>
    tpu.vector_store %arg6[%c9, %c0_242], %440 {strides = array<i32>} : memref<16x128xf32, #tpu.memory_space<vmem>>, vector<1x32xf32>,
    %442 = arith.index_cast %438 : i32 to index
    %c0_243 = arith.constant 0 : index
    %443 = vector.load %arg4[%442, %c0_243] : memref<2079x32xf32, #tpu.memory_space<vmem>>, vector<1x32xf32>
    %c9_244 = arith.constant 9 : index
    %c0_245 = arith.constant 0 : index
    %444 = vector.load %arg7[%c9_244, %c0_245] : memref<16x128xf32, #tpu.memory_space<vmem>>, vector<1x32xf32>
    tpu.vector_store %arg7[%c9_244, %c0_245], %443 {strides = array<i32>} : memref<16x128xf32, #tpu.memory_space<vmem>>, vector<1x32xf32>,
    %c37_i32 = arith.constant 37 : i32
    %445 = arith.addi %0, %c37_i32 : i32
    %446 = arith.index_cast %445 : i32 to index
    %447 = memref.load %arg1[%446] : memref<64xi32, #tpu.memory_space<smem>>
    %c37_i32_246 = arith.constant 37 : i32
    %448 = arith.addi %0, %c37_i32_246 : i32
    %449 = arith.index_cast %448 : i32 to index
    %450 = memref.load %arg2[%449] : memref<64xi32, #tpu.memory_space<smem>>
    %451 = arith.index_cast %447 : i32 to index
    %c0_247 = arith.constant 0 : index
    %452 = vector.load %arg3[%451, %c0_247] : memref<50x32xf32, #tpu.memory_space<vmem>>, vector<1x32xf32>
    %c9_248 = arith.constant 9 : index
    %c32_249 = arith.constant 32 : index
    %453 = vector.load %arg6[%c9_248, %c32_249] : memref<16x128xf32, #tpu.memory_space<vmem>>, vector<1x32xf32>
    tpu.vector_store %arg6[%c9_248, %c32_249], %452 {strides = array<i32>} : memref<16x128xf32, #tpu.memory_space<vmem>>, vector<1x32xf32>,
    %454 = arith.index_cast %450 : i32 to index
    %c0_250 = arith.constant 0 : index
    %455 = vector.load %arg4[%454, %c0_250] : memref<2079x32xf32, #tpu.memory_space<vmem>>, vector<1x32xf32>
    %c9_251 = arith.constant 9 : index
    %c32_252 = arith.constant 32 : index
    %456 = vector.load %arg7[%c9_251, %c32_252] : memref<16x128xf32, #tpu.memory_space<vmem>>, vector<1x32xf32>
    tpu.vector_store %arg7[%c9_251, %c32_252], %455 {strides = array<i32>} : memref<16x128xf32, #tpu.memory_space<vmem>>, vector<1x32xf32>,
    %c38_i32 = arith.constant 38 : i32
    %457 = arith.addi %0, %c38_i32 : i32
    %458 = arith.index_cast %457 : i32 to index
    %459 = memref.load %arg1[%458] : memref<64xi32, #tpu.memory_space<smem>>
    %c38_i32_253 = arith.constant 38 : i32
    %460 = arith.addi %0, %c38_i32_253 : i32
    %461 = arith.index_cast %460 : i32 to index
    %462 = memref.load %arg2[%461] : memref<64xi32, #tpu.memory_space<smem>>
    %463 = arith.index_cast %459 : i32 to index
    %c0_254 = arith.constant 0 : index
    %464 = vector.load %arg3[%463, %c0_254] : memref<50x32xf32, #tpu.memory_space<vmem>>, vector<1x32xf32>
    %c9_255 = arith.constant 9 : index
    %c64_256 = arith.constant 64 : index
    %465 = vector.load %arg6[%c9_255, %c64_256] : memref<16x128xf32, #tpu.memory_space<vmem>>, vector<1x32xf32>
    tpu.vector_store %arg6[%c9_255, %c64_256], %464 {strides = array<i32>} : memref<16x128xf32, #tpu.memory_space<vmem>>, vector<1x32xf32>,
    %466 = arith.index_cast %462 : i32 to index
    %c0_257 = arith.constant 0 : index
    %467 = vector.load %arg4[%466, %c0_257] : memref<2079x32xf32, #tpu.memory_space<vmem>>, vector<1x32xf32>
    %c9_258 = arith.constant 9 : index
    %c64_259 = arith.constant 64 : index
    %468 = vector.load %arg7[%c9_258, %c64_259] : memref<16x128xf32, #tpu.memory_space<vmem>>, vector<1x32xf32>
    tpu.vector_store %arg7[%c9_258, %c64_259], %467 {strides = array<i32>} : memref<16x128xf32, #tpu.memory_space<vmem>>, vector<1x32xf32>,
    %c39_i32 = arith.constant 39 : i32
    %469 = arith.addi %0, %c39_i32 : i32
    %470 = arith.index_cast %469 : i32 to index
    %471 = memref.load %arg1[%470] : memref<64xi32, #tpu.memory_space<smem>>
    %c39_i32_260 = arith.constant 39 : i32
    %472 = arith.addi %0, %c39_i32_260 : i32
    %473 = arith.index_cast %472 : i32 to index
    %474 = memref.load %arg2[%473] : memref<64xi32, #tpu.memory_space<smem>>
    %475 = arith.index_cast %471 : i32 to index
    %c0_261 = arith.constant 0 : index
    %476 = vector.load %arg3[%475, %c0_261] : memref<50x32xf32, #tpu.memory_space<vmem>>, vector<1x32xf32>
    %c9_262 = arith.constant 9 : index
    %c96_263 = arith.constant 96 : index
    %477 = vector.load %arg6[%c9_262, %c96_263] : memref<16x128xf32, #tpu.memory_space<vmem>>, vector<1x32xf32>
    tpu.vector_store %arg6[%c9_262, %c96_263], %476 {strides = array<i32>} : memref<16x128xf32, #tpu.memory_space<vmem>>, vector<1x32xf32>,
    %478 = arith.index_cast %474 : i32 to index
    %c0_264 = arith.constant 0 : index
    %479 = vector.load %arg4[%478, %c0_264] : memref<2079x32xf32, #tpu.memory_space<vmem>>, vector<1x32xf32>
    %c9_265 = arith.constant 9 : index
    %c96_266 = arith.constant 96 : index
    %480 = vector.load %arg7[%c9_265, %c96_266] : memref<16x128xf32, #tpu.memory_space<vmem>>, vector<1x32xf32>
    tpu.vector_store %arg7[%c9_265, %c96_266], %479 {strides = array<i32>} : memref<16x128xf32, #tpu.memory_space<vmem>>, vector<1x32xf32>,
    %c40_i32 = arith.constant 40 : i32
    %481 = arith.addi %0, %c40_i32 : i32
    %482 = arith.index_cast %481 : i32 to index
    %483 = memref.load %arg1[%482] : memref<64xi32, #tpu.memory_space<smem>>
    %c40_i32_267 = arith.constant 40 : i32
    %484 = arith.addi %0, %c40_i32_267 : i32
    %485 = arith.index_cast %484 : i32 to index
    %486 = memref.load %arg2[%485] : memref<64xi32, #tpu.memory_space<smem>>
    %487 = arith.index_cast %483 : i32 to index
    %c0_268 = arith.constant 0 : index
    %488 = vector.load %arg3[%487, %c0_268] : memref<50x32xf32, #tpu.memory_space<vmem>>, vector<1x32xf32>
    %c10 = arith.constant 10 : index
    %c0_269 = arith.constant 0 : index
    %489 = vector.load %arg6[%c10, %c0_269] : memref<16x128xf32, #tpu.memory_space<vmem>>, vector<1x32xf32>
    tpu.vector_store %arg6[%c10, %c0_269], %488 {strides = array<i32>} : memref<16x128xf32, #tpu.memory_space<vmem>>, vector<1x32xf32>,
    %490 = arith.index_cast %486 : i32 to index
    %c0_270 = arith.constant 0 : index
    %491 = vector.load %arg4[%490, %c0_270] : memref<2079x32xf32, #tpu.memory_space<vmem>>, vector<1x32xf32>
    %c10_271 = arith.constant 10 : index
    %c0_272 = arith.constant 0 : index
    %492 = vector.load %arg7[%c10_271, %c0_272] : memref<16x128xf32, #tpu.memory_space<vmem>>, vector<1x32xf32>
    tpu.vector_store %arg7[%c10_271, %c0_272], %491 {strides = array<i32>} : memref<16x128xf32, #tpu.memory_space<vmem>>, vector<1x32xf32>,
    %c41_i32 = arith.constant 41 : i32
    %493 = arith.addi %0, %c41_i32 : i32
    %494 = arith.index_cast %493 : i32 to index
    %495 = memref.load %arg1[%494] : memref<64xi32, #tpu.memory_space<smem>>
    %c41_i32_273 = arith.constant 41 : i32
    %496 = arith.addi %0, %c41_i32_273 : i32
    %497 = arith.index_cast %496 : i32 to index
    %498 = memref.load %arg2[%497] : memref<64xi32, #tpu.memory_space<smem>>
    %499 = arith.index_cast %495 : i32 to index
    %c0_274 = arith.constant 0 : index
    %500 = vector.load %arg3[%499, %c0_274] : memref<50x32xf32, #tpu.memory_space<vmem>>, vector<1x32xf32>
    %c10_275 = arith.constant 10 : index
    %c32_276 = arith.constant 32 : index
    %501 = vector.load %arg6[%c10_275, %c32_276] : memref<16x128xf32, #tpu.memory_space<vmem>>, vector<1x32xf32>
    tpu.vector_store %arg6[%c10_275, %c32_276], %500 {strides = array<i32>} : memref<16x128xf32, #tpu.memory_space<vmem>>, vector<1x32xf32>,
    %502 = arith.index_cast %498 : i32 to index
    %c0_277 = arith.constant 0 : index
    %503 = vector.load %arg4[%502, %c0_277] : memref<2079x32xf32, #tpu.memory_space<vmem>>, vector<1x32xf32>
    %c10_278 = arith.constant 10 : index
    %c32_279 = arith.constant 32 : index
    %504 = vector.load %arg7[%c10_278, %c32_279] : memref<16x128xf32, #tpu.memory_space<vmem>>, vector<1x32xf32>
    tpu.vector_store %arg7[%c10_278, %c32_279], %503 {strides = array<i32>} : memref<16x128xf32, #tpu.memory_space<vmem>>, vector<1x32xf32>,
    %c42_i32 = arith.constant 42 : i32
    %505 = arith.addi %0, %c42_i32 : i32
    %506 = arith.index_cast %505 : i32 to index
    %507 = memref.load %arg1[%506] : memref<64xi32, #tpu.memory_space<smem>>
    %c42_i32_280 = arith.constant 42 : i32
    %508 = arith.addi %0, %c42_i32_280 : i32
    %509 = arith.index_cast %508 : i32 to index
    %510 = memref.load %arg2[%509] : memref<64xi32, #tpu.memory_space<smem>>
    %511 = arith.index_cast %507 : i32 to index
    %c0_281 = arith.constant 0 : index
    %512 = vector.load %arg3[%511, %c0_281] : memref<50x32xf32, #tpu.memory_space<vmem>>, vector<1x32xf32>
    %c10_282 = arith.constant 10 : index
    %c64_283 = arith.constant 64 : index
    %513 = vector.load %arg6[%c10_282, %c64_283] : memref<16x128xf32, #tpu.memory_space<vmem>>, vector<1x32xf32>
    tpu.vector_store %arg6[%c10_282, %c64_283], %512 {strides = array<i32>} : memref<16x128xf32, #tpu.memory_space<vmem>>, vector<1x32xf32>,
    %514 = arith.index_cast %510 : i32 to index
    %c0_284 = arith.constant 0 : index
    %515 = vector.load %arg4[%514, %c0_284] : memref<2079x32xf32, #tpu.memory_space<vmem>>, vector<1x32xf32>
    %c10_285 = arith.constant 10 : index
    %c64_286 = arith.constant 64 : index
    %516 = vector.load %arg7[%c10_285, %c64_286] : memref<16x128xf32, #tpu.memory_space<vmem>>, vector<1x32xf32>
    tpu.vector_store %arg7[%c10_285, %c64_286], %515 {strides = array<i32>} : memref<16x128xf32, #tpu.memory_space<vmem>>, vector<1x32xf32>,
    %c43_i32 = arith.constant 43 : i32
    %517 = arith.addi %0, %c43_i32 : i32
    %518 = arith.index_cast %517 : i32 to index
    %519 = memref.load %arg1[%518] : memref<64xi32, #tpu.memory_space<smem>>
    %c43_i32_287 = arith.constant 43 : i32
    %520 = arith.addi %0, %c43_i32_287 : i32
    %521 = arith.index_cast %520 : i32 to index
    %522 = memref.load %arg2[%521] : memref<64xi32, #tpu.memory_space<smem>>
    %523 = arith.index_cast %519 : i32 to index
    %c0_288 = arith.constant 0 : index
    %524 = vector.load %arg3[%523, %c0_288] : memref<50x32xf32, #tpu.memory_space<vmem>>, vector<1x32xf32>
    %c10_289 = arith.constant 10 : index
    %c96_290 = arith.constant 96 : index
    %525 = vector.load %arg6[%c10_289, %c96_290] : memref<16x128xf32, #tpu.memory_space<vmem>>, vector<1x32xf32>
    tpu.vector_store %arg6[%c10_289, %c96_290], %524 {strides = array<i32>} : memref<16x128xf32, #tpu.memory_space<vmem>>, vector<1x32xf32>,
    %526 = arith.index_cast %522 : i32 to index
    %c0_291 = arith.constant 0 : index
    %527 = vector.load %arg4[%526, %c0_291] : memref<2079x32xf32, #tpu.memory_space<vmem>>, vector<1x32xf32>
    %c10_292 = arith.constant 10 : index
    %c96_293 = arith.constant 96 : index
    %528 = vector.load %arg7[%c10_292, %c96_293] : memref<16x128xf32, #tpu.memory_space<vmem>>, vector<1x32xf32>
    tpu.vector_store %arg7[%c10_292, %c96_293], %527 {strides = array<i32>} : memref<16x128xf32, #tpu.memory_space<vmem>>, vector<1x32xf32>,
    %c44_i32 = arith.constant 44 : i32
    %529 = arith.addi %0, %c44_i32 : i32
    %530 = arith.index_cast %529 : i32 to index
    %531 = memref.load %arg1[%530] : memref<64xi32, #tpu.memory_space<smem>>
    %c44_i32_294 = arith.constant 44 : i32
    %532 = arith.addi %0, %c44_i32_294 : i32
    %533 = arith.index_cast %532 : i32 to index
    %534 = memref.load %arg2[%533] : memref<64xi32, #tpu.memory_space<smem>>
    %535 = arith.index_cast %531 : i32 to index
    %c0_295 = arith.constant 0 : index
    %536 = vector.load %arg3[%535, %c0_295] : memref<50x32xf32, #tpu.memory_space<vmem>>, vector<1x32xf32>
    %c11 = arith.constant 11 : index
    %c0_296 = arith.constant 0 : index
    %537 = vector.load %arg6[%c11, %c0_296] : memref<16x128xf32, #tpu.memory_space<vmem>>, vector<1x32xf32>
    tpu.vector_store %arg6[%c11, %c0_296], %536 {strides = array<i32>} : memref<16x128xf32, #tpu.memory_space<vmem>>, vector<1x32xf32>,
    %538 = arith.index_cast %534 : i32 to index
    %c0_297 = arith.constant 0 : index
    %539 = vector.load %arg4[%538, %c0_297] : memref<2079x32xf32, #tpu.memory_space<vmem>>, vector<1x32xf32>
    %c11_298 = arith.constant 11 : index
    %c0_299 = arith.constant 0 : index
    %540 = vector.load %arg7[%c11_298, %c0_299] : memref<16x128xf32, #tpu.memory_space<vmem>>, vector<1x32xf32>
    tpu.vector_store %arg7[%c11_298, %c0_299], %539 {strides = array<i32>} : memref<16x128xf32, #tpu.memory_space<vmem>>, vector<1x32xf32>,
    %c45_i32 = arith.constant 45 : i32
    %541 = arith.addi %0, %c45_i32 : i32
    %542 = arith.index_cast %541 : i32 to index
    %543 = memref.load %arg1[%542] : memref<64xi32, #tpu.memory_space<smem>>
    %c45_i32_300 = arith.constant 45 : i32
    %544 = arith.addi %0, %c45_i32_300 : i32
    %545 = arith.index_cast %544 : i32 to index
    %546 = memref.load %arg2[%545] : memref<64xi32, #tpu.memory_space<smem>>
    %547 = arith.index_cast %543 : i32 to index
    %c0_301 = arith.constant 0 : index
    %548 = vector.load %arg3[%547, %c0_301] : memref<50x32xf32, #tpu.memory_space<vmem>>, vector<1x32xf32>
    %c11_302 = arith.constant 11 : index
    %c32_303 = arith.constant 32 : index
    %549 = vector.load %arg6[%c11_302, %c32_303] : memref<16x128xf32, #tpu.memory_space<vmem>>, vector<1x32xf32>
    tpu.vector_store %arg6[%c11_302, %c32_303], %548 {strides = array<i32>} : memref<16x128xf32, #tpu.memory_space<vmem>>, vector<1x32xf32>,
    %550 = arith.index_cast %546 : i32 to index
    %c0_304 = arith.constant 0 : index
    %551 = vector.load %arg4[%550, %c0_304] : memref<2079x32xf32, #tpu.memory_space<vmem>>, vector<1x32xf32>
    %c11_305 = arith.constant 11 : index
    %c32_306 = arith.constant 32 : index
    %552 = vector.load %arg7[%c11_305, %c32_306] : memref<16x128xf32, #tpu.memory_space<vmem>>, vector<1x32xf32>
    tpu.vector_store %arg7[%c11_305, %c32_306], %551 {strides = array<i32>} : memref<16x128xf32, #tpu.memory_space<vmem>>, vector<1x32xf32>,
    %c46_i32 = arith.constant 46 : i32
    %553 = arith.addi %0, %c46_i32 : i32
    %554 = arith.index_cast %553 : i32 to index
    %555 = memref.load %arg1[%554] : memref<64xi32, #tpu.memory_space<smem>>
    %c46_i32_307 = arith.constant 46 : i32
    %556 = arith.addi %0, %c46_i32_307 : i32
    %557 = arith.index_cast %556 : i32 to index
    %558 = memref.load %arg2[%557] : memref<64xi32, #tpu.memory_space<smem>>
    %559 = arith.index_cast %555 : i32 to index
    %c0_308 = arith.constant 0 : index
    %560 = vector.load %arg3[%559, %c0_308] : memref<50x32xf32, #tpu.memory_space<vmem>>, vector<1x32xf32>
    %c11_309 = arith.constant 11 : index
    %c64_310 = arith.constant 64 : index
    %561 = vector.load %arg6[%c11_309, %c64_310] : memref<16x128xf32, #tpu.memory_space<vmem>>, vector<1x32xf32>
    tpu.vector_store %arg6[%c11_309, %c64_310], %560 {strides = array<i32>} : memref<16x128xf32, #tpu.memory_space<vmem>>, vector<1x32xf32>,
    %562 = arith.index_cast %558 : i32 to index
    %c0_311 = arith.constant 0 : index
    %563 = vector.load %arg4[%562, %c0_311] : memref<2079x32xf32, #tpu.memory_space<vmem>>, vector<1x32xf32>
    %c11_312 = arith.constant 11 : index
    %c64_313 = arith.constant 64 : index
    %564 = vector.load %arg7[%c11_312, %c64_313] : memref<16x128xf32, #tpu.memory_space<vmem>>, vector<1x32xf32>
    tpu.vector_store %arg7[%c11_312, %c64_313], %563 {strides = array<i32>} : memref<16x128xf32, #tpu.memory_space<vmem>>, vector<1x32xf32>,
    %c47_i32 = arith.constant 47 : i32
    %565 = arith.addi %0, %c47_i32 : i32
    %566 = arith.index_cast %565 : i32 to index
    %567 = memref.load %arg1[%566] : memref<64xi32, #tpu.memory_space<smem>>
    %c47_i32_314 = arith.constant 47 : i32
    %568 = arith.addi %0, %c47_i32_314 : i32
    %569 = arith.index_cast %568 : i32 to index
    %570 = memref.load %arg2[%569] : memref<64xi32, #tpu.memory_space<smem>>
    %571 = arith.index_cast %567 : i32 to index
    %c0_315 = arith.constant 0 : index
    %572 = vector.load %arg3[%571, %c0_315] : memref<50x32xf32, #tpu.memory_space<vmem>>, vector<1x32xf32>
    %c11_316 = arith.constant 11 : index
    %c96_317 = arith.constant 96 : index
    %573 = vector.load %arg6[%c11_316, %c96_317] : memref<16x128xf32, #tpu.memory_space<vmem>>, vector<1x32xf32>
    tpu.vector_store %arg6[%c11_316, %c96_317], %572 {strides = array<i32>} : memref<16x128xf32, #tpu.memory_space<vmem>>, vector<1x32xf32>,
    %574 = arith.index_cast %570 : i32 to index
    %c0_318 = arith.constant 0 : index
    %575 = vector.load %arg4[%574, %c0_318] : memref<2079x32xf32, #tpu.memory_space<vmem>>, vector<1x32xf32>
    %c11_319 = arith.constant 11 : index
    %c96_320 = arith.constant 96 : index
    %576 = vector.load %arg7[%c11_319, %c96_320] : memref<16x128xf32, #tpu.memory_space<vmem>>, vector<1x32xf32>
    tpu.vector_store %arg7[%c11_319, %c96_320], %575 {strides = array<i32>} : memref<16x128xf32, #tpu.memory_space<vmem>>, vector<1x32xf32>,
    %c48_i32 = arith.constant 48 : i32
    %577 = arith.addi %0, %c48_i32 : i32
    %578 = arith.index_cast %577 : i32 to index
    %579 = memref.load %arg1[%578] : memref<64xi32, #tpu.memory_space<smem>>
    %c48_i32_321 = arith.constant 48 : i32
    %580 = arith.addi %0, %c48_i32_321 : i32
    %581 = arith.index_cast %580 : i32 to index
    %582 = memref.load %arg2[%581] : memref<64xi32, #tpu.memory_space<smem>>
    %583 = arith.index_cast %579 : i32 to index
    %c0_322 = arith.constant 0 : index
    %584 = vector.load %arg3[%583, %c0_322] : memref<50x32xf32, #tpu.memory_space<vmem>>, vector<1x32xf32>
    %c12 = arith.constant 12 : index
    %c0_323 = arith.constant 0 : index
    %585 = vector.load %arg6[%c12, %c0_323] : memref<16x128xf32, #tpu.memory_space<vmem>>, vector<1x32xf32>
    tpu.vector_store %arg6[%c12, %c0_323], %584 {strides = array<i32>} : memref<16x128xf32, #tpu.memory_space<vmem>>, vector<1x32xf32>,
    %586 = arith.index_cast %582 : i32 to index
    %c0_324 = arith.constant 0 : index
    %587 = vector.load %arg4[%586, %c0_324] : memref<2079x32xf32, #tpu.memory_space<vmem>>, vector<1x32xf32>
    %c12_325 = arith.constant 12 : index
    %c0_326 = arith.constant 0 : index
    %588 = vector.load %arg7[%c12_325, %c0_326] : memref<16x128xf32, #tpu.memory_space<vmem>>, vector<1x32xf32>
    tpu.vector_store %arg7[%c12_325, %c0_326], %587 {strides = array<i32>} : memref<16x128xf32, #tpu.memory_space<vmem>>, vector<1x32xf32>,
    %c49_i32 = arith.constant 49 : i32
    %589 = arith.addi %0, %c49_i32 : i32
    %590 = arith.index_cast %589 : i32 to index
    %591 = memref.load %arg1[%590] : memref<64xi32, #tpu.memory_space<smem>>
    %c49_i32_327 = arith.constant 49 : i32
    %592 = arith.addi %0, %c49_i32_327 : i32
    %593 = arith.index_cast %592 : i32 to index
    %594 = memref.load %arg2[%593] : memref<64xi32, #tpu.memory_space<smem>>
    %595 = arith.index_cast %591 : i32 to index
    %c0_328 = arith.constant 0 : index
    %596 = vector.load %arg3[%595, %c0_328] : memref<50x32xf32, #tpu.memory_space<vmem>>, vector<1x32xf32>
    %c12_329 = arith.constant 12 : index
    %c32_330 = arith.constant 32 : index
    %597 = vector.load %arg6[%c12_329, %c32_330] : memref<16x128xf32, #tpu.memory_space<vmem>>, vector<1x32xf32>
    tpu.vector_store %arg6[%c12_329, %c32_330], %596 {strides = array<i32>} : memref<16x128xf32, #tpu.memory_space<vmem>>, vector<1x32xf32>,
    %598 = arith.index_cast %594 : i32 to index
    %c0_331 = arith.constant 0 : index
    %599 = vector.load %arg4[%598, %c0_331] : memref<2079x32xf32, #tpu.memory_space<vmem>>, vector<1x32xf32>
    %c12_332 = arith.constant 12 : index
    %c32_333 = arith.constant 32 : index
    %600 = vector.load %arg7[%c12_332, %c32_333] : memref<16x128xf32, #tpu.memory_space<vmem>>, vector<1x32xf32>
    tpu.vector_store %arg7[%c12_332, %c32_333], %599 {strides = array<i32>} : memref<16x128xf32, #tpu.memory_space<vmem>>, vector<1x32xf32>,
    %c50_i32 = arith.constant 50 : i32
    %601 = arith.addi %0, %c50_i32 : i32
    %602 = arith.index_cast %601 : i32 to index
    %603 = memref.load %arg1[%602] : memref<64xi32, #tpu.memory_space<smem>>
    %c50_i32_334 = arith.constant 50 : i32
    %604 = arith.addi %0, %c50_i32_334 : i32
    %605 = arith.index_cast %604 : i32 to index
    %606 = memref.load %arg2[%605] : memref<64xi32, #tpu.memory_space<smem>>
    %607 = arith.index_cast %603 : i32 to index
    %c0_335 = arith.constant 0 : index
    %608 = vector.load %arg3[%607, %c0_335] : memref<50x32xf32, #tpu.memory_space<vmem>>, vector<1x32xf32>
    %c12_336 = arith.constant 12 : index
    %c64_337 = arith.constant 64 : index
    %609 = vector.load %arg6[%c12_336, %c64_337] : memref<16x128xf32, #tpu.memory_space<vmem>>, vector<1x32xf32>
    tpu.vector_store %arg6[%c12_336, %c64_337], %608 {strides = array<i32>} : memref<16x128xf32, #tpu.memory_space<vmem>>, vector<1x32xf32>,
    %610 = arith.index_cast %606 : i32 to index
    %c0_338 = arith.constant 0 : index
    %611 = vector.load %arg4[%610, %c0_338] : memref<2079x32xf32, #tpu.memory_space<vmem>>, vector<1x32xf32>
    %c12_339 = arith.constant 12 : index
    %c64_340 = arith.constant 64 : index
    %612 = vector.load %arg7[%c12_339, %c64_340] : memref<16x128xf32, #tpu.memory_space<vmem>>, vector<1x32xf32>
    tpu.vector_store %arg7[%c12_339, %c64_340], %611 {strides = array<i32>} : memref<16x128xf32, #tpu.memory_space<vmem>>, vector<1x32xf32>,
    %c51_i32 = arith.constant 51 : i32
    %613 = arith.addi %0, %c51_i32 : i32
    %614 = arith.index_cast %613 : i32 to index
    %615 = memref.load %arg1[%614] : memref<64xi32, #tpu.memory_space<smem>>
    %c51_i32_341 = arith.constant 51 : i32
    %616 = arith.addi %0, %c51_i32_341 : i32
    %617 = arith.index_cast %616 : i32 to index
    %618 = memref.load %arg2[%617] : memref<64xi32, #tpu.memory_space<smem>>
    %619 = arith.index_cast %615 : i32 to index
    %c0_342 = arith.constant 0 : index
    %620 = vector.load %arg3[%619, %c0_342] : memref<50x32xf32, #tpu.memory_space<vmem>>, vector<1x32xf32>
    %c12_343 = arith.constant 12 : index
    %c96_344 = arith.constant 96 : index
    %621 = vector.load %arg6[%c12_343, %c96_344] : memref<16x128xf32, #tpu.memory_space<vmem>>, vector<1x32xf32>
    tpu.vector_store %arg6[%c12_343, %c96_344], %620 {strides = array<i32>} : memref<16x128xf32, #tpu.memory_space<vmem>>, vector<1x32xf32>,
    %622 = arith.index_cast %618 : i32 to index
    %c0_345 = arith.constant 0 : index
    %623 = vector.load %arg4[%622, %c0_345] : memref<2079x32xf32, #tpu.memory_space<vmem>>, vector<1x32xf32>
    %c12_346 = arith.constant 12 : index
    %c96_347 = arith.constant 96 : index
    %624 = vector.load %arg7[%c12_346, %c96_347] : memref<16x128xf32, #tpu.memory_space<vmem>>, vector<1x32xf32>
    tpu.vector_store %arg7[%c12_346, %c96_347], %623 {strides = array<i32>} : memref<16x128xf32, #tpu.memory_space<vmem>>, vector<1x32xf32>,
    %c52_i32 = arith.constant 52 : i32
    %625 = arith.addi %0, %c52_i32 : i32
    %626 = arith.index_cast %625 : i32 to index
    %627 = memref.load %arg1[%626] : memref<64xi32, #tpu.memory_space<smem>>
    %c52_i32_348 = arith.constant 52 : i32
    %628 = arith.addi %0, %c52_i32_348 : i32
    %629 = arith.index_cast %628 : i32 to index
    %630 = memref.load %arg2[%629] : memref<64xi32, #tpu.memory_space<smem>>
    %631 = arith.index_cast %627 : i32 to index
    %c0_349 = arith.constant 0 : index
    %632 = vector.load %arg3[%631, %c0_349] : memref<50x32xf32, #tpu.memory_space<vmem>>, vector<1x32xf32>
    %c13 = arith.constant 13 : index
    %c0_350 = arith.constant 0 : index
    %633 = vector.load %arg6[%c13, %c0_350] : memref<16x128xf32, #tpu.memory_space<vmem>>, vector<1x32xf32>
    tpu.vector_store %arg6[%c13, %c0_350], %632 {strides = array<i32>} : memref<16x128xf32, #tpu.memory_space<vmem>>, vector<1x32xf32>,
    %634 = arith.index_cast %630 : i32 to index
    %c0_351 = arith.constant 0 : index
    %635 = vector.load %arg4[%634, %c0_351] : memref<2079x32xf32, #tpu.memory_space<vmem>>, vector<1x32xf32>
    %c13_352 = arith.constant 13 : index
    %c0_353 = arith.constant 0 : index
    %636 = vector.load %arg7[%c13_352, %c0_353] : memref<16x128xf32, #tpu.memory_space<vmem>>, vector<1x32xf32>
    tpu.vector_store %arg7[%c13_352, %c0_353], %635 {strides = array<i32>} : memref<16x128xf32, #tpu.memory_space<vmem>>, vector<1x32xf32>,
    %c53_i32 = arith.constant 53 : i32
    %637 = arith.addi %0, %c53_i32 : i32
    %638 = arith.index_cast %637 : i32 to index
    %639 = memref.load %arg1[%638] : memref<64xi32, #tpu.memory_space<smem>>
    %c53_i32_354 = arith.constant 53 : i32
    %640 = arith.addi %0, %c53_i32_354 : i32
    %641 = arith.index_cast %640 : i32 to index
    %642 = memref.load %arg2[%641] : memref<64xi32, #tpu.memory_space<smem>>
    %643 = arith.index_cast %639 : i32 to index
    %c0_355 = arith.constant 0 : index
    %644 = vector.load %arg3[%643, %c0_355] : memref<50x32xf32, #tpu.memory_space<vmem>>, vector<1x32xf32>
    %c13_356 = arith.constant 13 : index
    %c32_357 = arith.constant 32 : index
    %645 = vector.load %arg6[%c13_356, %c32_357] : memref<16x128xf32, #tpu.memory_space<vmem>>, vector<1x32xf32>
    tpu.vector_store %arg6[%c13_356, %c32_357], %644 {strides = array<i32>} : memref<16x128xf32, #tpu.memory_space<vmem>>, vector<1x32xf32>,
    %646 = arith.index_cast %642 : i32 to index
    %c0_358 = arith.constant 0 : index
    %647 = vector.load %arg4[%646, %c0_358] : memref<2079x32xf32, #tpu.memory_space<vmem>>, vector<1x32xf32>
    %c13_359 = arith.constant 13 : index
    %c32_360 = arith.constant 32 : index
    %648 = vector.load %arg7[%c13_359, %c32_360] : memref<16x128xf32, #tpu.memory_space<vmem>>, vector<1x32xf32>
    tpu.vector_store %arg7[%c13_359, %c32_360], %647 {strides = array<i32>} : memref<16x128xf32, #tpu.memory_space<vmem>>, vector<1x32xf32>,
    %c54_i32 = arith.constant 54 : i32
    %649 = arith.addi %0, %c54_i32 : i32
    %650 = arith.index_cast %649 : i32 to index
    %651 = memref.load %arg1[%650] : memref<64xi32, #tpu.memory_space<smem>>
    %c54_i32_361 = arith.constant 54 : i32
    %652 = arith.addi %0, %c54_i32_361 : i32
    %653 = arith.index_cast %652 : i32 to index
    %654 = memref.load %arg2[%653] : memref<64xi32, #tpu.memory_space<smem>>
    %655 = arith.index_cast %651 : i32 to index
    %c0_362 = arith.constant 0 : index
    %656 = vector.load %arg3[%655, %c0_362] : memref<50x32xf32, #tpu.memory_space<vmem>>, vector<1x32xf32>
    %c13_363 = arith.constant 13 : index
    %c64_364 = arith.constant 64 : index
    %657 = vector.load %arg6[%c13_363, %c64_364] : memref<16x128xf32, #tpu.memory_space<vmem>>, vector<1x32xf32>
    tpu.vector_store %arg6[%c13_363, %c64_364], %656 {strides = array<i32>} : memref<16x128xf32, #tpu.memory_space<vmem>>, vector<1x32xf32>,
    %658 = arith.index_cast %654 : i32 to index
    %c0_365 = arith.constant 0 : index
    %659 = vector.load %arg4[%658, %c0_365] : memref<2079x32xf32, #tpu.memory_space<vmem>>, vector<1x32xf32>
    %c13_366 = arith.constant 13 : index
    %c64_367 = arith.constant 64 : index
    %660 = vector.load %arg7[%c13_366, %c64_367] : memref<16x128xf32, #tpu.memory_space<vmem>>, vector<1x32xf32>
    tpu.vector_store %arg7[%c13_366, %c64_367], %659 {strides = array<i32>} : memref<16x128xf32, #tpu.memory_space<vmem>>, vector<1x32xf32>,
    %c55_i32 = arith.constant 55 : i32
    %661 = arith.addi %0, %c55_i32 : i32
    %662 = arith.index_cast %661 : i32 to index
    %663 = memref.load %arg1[%662] : memref<64xi32, #tpu.memory_space<smem>>
    %c55_i32_368 = arith.constant 55 : i32
    %664 = arith.addi %0, %c55_i32_368 : i32
    %665 = arith.index_cast %664 : i32 to index
    %666 = memref.load %arg2[%665] : memref<64xi32, #tpu.memory_space<smem>>
    %667 = arith.index_cast %663 : i32 to index
    %c0_369 = arith.constant 0 : index
    %668 = vector.load %arg3[%667, %c0_369] : memref<50x32xf32, #tpu.memory_space<vmem>>, vector<1x32xf32>
    %c13_370 = arith.constant 13 : index
    %c96_371 = arith.constant 96 : index
    %669 = vector.load %arg6[%c13_370, %c96_371] : memref<16x128xf32, #tpu.memory_space<vmem>>, vector<1x32xf32>
    tpu.vector_store %arg6[%c13_370, %c96_371], %668 {strides = array<i32>} : memref<16x128xf32, #tpu.memory_space<vmem>>, vector<1x32xf32>,
    %670 = arith.index_cast %666 : i32 to index
    %c0_372 = arith.constant 0 : index
    %671 = vector.load %arg4[%670, %c0_372] : memref<2079x32xf32, #tpu.memory_space<vmem>>, vector<1x32xf32>
    %c13_373 = arith.constant 13 : index
    %c96_374 = arith.constant 96 : index
    %672 = vector.load %arg7[%c13_373, %c96_374] : memref<16x128xf32, #tpu.memory_space<vmem>>, vector<1x32xf32>
    tpu.vector_store %arg7[%c13_373, %c96_374], %671 {strides = array<i32>} : memref<16x128xf32, #tpu.memory_space<vmem>>, vector<1x32xf32>,
    %c56_i32 = arith.constant 56 : i32
    %673 = arith.addi %0, %c56_i32 : i32
    %674 = arith.index_cast %673 : i32 to index
    %675 = memref.load %arg1[%674] : memref<64xi32, #tpu.memory_space<smem>>
    %c56_i32_375 = arith.constant 56 : i32
    %676 = arith.addi %0, %c56_i32_375 : i32
    %677 = arith.index_cast %676 : i32 to index
    %678 = memref.load %arg2[%677] : memref<64xi32, #tpu.memory_space<smem>>
    %679 = arith.index_cast %675 : i32 to index
    %c0_376 = arith.constant 0 : index
    %680 = vector.load %arg3[%679, %c0_376] : memref<50x32xf32, #tpu.memory_space<vmem>>, vector<1x32xf32>
    %c14 = arith.constant 14 : index
    %c0_377 = arith.constant 0 : index
    %681 = vector.load %arg6[%c14, %c0_377] : memref<16x128xf32, #tpu.memory_space<vmem>>, vector<1x32xf32>
    tpu.vector_store %arg6[%c14, %c0_377], %680 {strides = array<i32>} : memref<16x128xf32, #tpu.memory_space<vmem>>, vector<1x32xf32>,
    %682 = arith.index_cast %678 : i32 to index
    %c0_378 = arith.constant 0 : index
    %683 = vector.load %arg4[%682, %c0_378] : memref<2079x32xf32, #tpu.memory_space<vmem>>, vector<1x32xf32>
    %c14_379 = arith.constant 14 : index
    %c0_380 = arith.constant 0 : index
    %684 = vector.load %arg7[%c14_379, %c0_380] : memref<16x128xf32, #tpu.memory_space<vmem>>, vector<1x32xf32>
    tpu.vector_store %arg7[%c14_379, %c0_380], %683 {strides = array<i32>} : memref<16x128xf32, #tpu.memory_space<vmem>>, vector<1x32xf32>,
    %c57_i32 = arith.constant 57 : i32
    %685 = arith.addi %0, %c57_i32 : i32
    %686 = arith.index_cast %685 : i32 to index
    %687 = memref.load %arg1[%686] : memref<64xi32, #tpu.memory_space<smem>>
    %c57_i32_381 = arith.constant 57 : i32
    %688 = arith.addi %0, %c57_i32_381 : i32
    %689 = arith.index_cast %688 : i32 to index
    %690 = memref.load %arg2[%689] : memref<64xi32, #tpu.memory_space<smem>>
    %691 = arith.index_cast %687 : i32 to index
    %c0_382 = arith.constant 0 : index
    %692 = vector.load %arg3[%691, %c0_382] : memref<50x32xf32, #tpu.memory_space<vmem>>, vector<1x32xf32>
    %c14_383 = arith.constant 14 : index
    %c32_384 = arith.constant 32 : index
    %693 = vector.load %arg6[%c14_383, %c32_384] : memref<16x128xf32, #tpu.memory_space<vmem>>, vector<1x32xf32>
    tpu.vector_store %arg6[%c14_383, %c32_384], %692 {strides = array<i32>} : memref<16x128xf32, #tpu.memory_space<vmem>>, vector<1x32xf32>,
    %694 = arith.index_cast %690 : i32 to index
    %c0_385 = arith.constant 0 : index
    %695 = vector.load %arg4[%694, %c0_385] : memref<2079x32xf32, #tpu.memory_space<vmem>>, vector<1x32xf32>
    %c14_386 = arith.constant 14 : index
    %c32_387 = arith.constant 32 : index
    %696 = vector.load %arg7[%c14_386, %c32_387] : memref<16x128xf32, #tpu.memory_space<vmem>>, vector<1x32xf32>
    tpu.vector_store %arg7[%c14_386, %c32_387], %695 {strides = array<i32>} : memref<16x128xf32, #tpu.memory_space<vmem>>, vector<1x32xf32>,
    %c58_i32 = arith.constant 58 : i32
    %697 = arith.addi %0, %c58_i32 : i32
    %698 = arith.index_cast %697 : i32 to index
    %699 = memref.load %arg1[%698] : memref<64xi32, #tpu.memory_space<smem>>
    %c58_i32_388 = arith.constant 58 : i32
    %700 = arith.addi %0, %c58_i32_388 : i32
    %701 = arith.index_cast %700 : i32 to index
    %702 = memref.load %arg2[%701] : memref<64xi32, #tpu.memory_space<smem>>
    %703 = arith.index_cast %699 : i32 to index
    %c0_389 = arith.constant 0 : index
    %704 = vector.load %arg3[%703, %c0_389] : memref<50x32xf32, #tpu.memory_space<vmem>>, vector<1x32xf32>
    %c14_390 = arith.constant 14 : index
    %c64_391 = arith.constant 64 : index
    %705 = vector.load %arg6[%c14_390, %c64_391] : memref<16x128xf32, #tpu.memory_space<vmem>>, vector<1x32xf32>
    tpu.vector_store %arg6[%c14_390, %c64_391], %704 {strides = array<i32>} : memref<16x128xf32, #tpu.memory_space<vmem>>, vector<1x32xf32>,
    %706 = arith.index_cast %702 : i32 to index
    %c0_392 = arith.constant 0 : index
    %707 = vector.load %arg4[%706, %c0_392] : memref<2079x32xf32, #tpu.memory_space<vmem>>, vector<1x32xf32>
    %c14_393 = arith.constant 14 : index
    %c64_394 = arith.constant 64 : index
    %708 = vector.load %arg7[%c14_393, %c64_394] : memref<16x128xf32, #tpu.memory_space<vmem>>, vector<1x32xf32>
    tpu.vector_store %arg7[%c14_393, %c64_394], %707 {strides = array<i32>} : memref<16x128xf32, #tpu.memory_space<vmem>>, vector<1x32xf32>,
    %c59_i32 = arith.constant 59 : i32
    %709 = arith.addi %0, %c59_i32 : i32
    %710 = arith.index_cast %709 : i32 to index
    %711 = memref.load %arg1[%710] : memref<64xi32, #tpu.memory_space<smem>>
    %c59_i32_395 = arith.constant 59 : i32
    %712 = arith.addi %0, %c59_i32_395 : i32
    %713 = arith.index_cast %712 : i32 to index
    %714 = memref.load %arg2[%713] : memref<64xi32, #tpu.memory_space<smem>>
    %715 = arith.index_cast %711 : i32 to index
    %c0_396 = arith.constant 0 : index
    %716 = vector.load %arg3[%715, %c0_396] : memref<50x32xf32, #tpu.memory_space<vmem>>, vector<1x32xf32>
    %c14_397 = arith.constant 14 : index
    %c96_398 = arith.constant 96 : index
    %717 = vector.load %arg6[%c14_397, %c96_398] : memref<16x128xf32, #tpu.memory_space<vmem>>, vector<1x32xf32>
    tpu.vector_store %arg6[%c14_397, %c96_398], %716 {strides = array<i32>} : memref<16x128xf32, #tpu.memory_space<vmem>>, vector<1x32xf32>,
    %718 = arith.index_cast %714 : i32 to index
    %c0_399 = arith.constant 0 : index
    %719 = vector.load %arg4[%718, %c0_399] : memref<2079x32xf32, #tpu.memory_space<vmem>>, vector<1x32xf32>
    %c14_400 = arith.constant 14 : index
    %c96_401 = arith.constant 96 : index
    %720 = vector.load %arg7[%c14_400, %c96_401] : memref<16x128xf32, #tpu.memory_space<vmem>>, vector<1x32xf32>
    tpu.vector_store %arg7[%c14_400, %c96_401], %719 {strides = array<i32>} : memref<16x128xf32, #tpu.memory_space<vmem>>, vector<1x32xf32>,
    %c60_i32 = arith.constant 60 : i32
    %721 = arith.addi %0, %c60_i32 : i32
    %722 = arith.index_cast %721 : i32 to index
    %723 = memref.load %arg1[%722] : memref<64xi32, #tpu.memory_space<smem>>
    %c60_i32_402 = arith.constant 60 : i32
    %724 = arith.addi %0, %c60_i32_402 : i32
    %725 = arith.index_cast %724 : i32 to index
    %726 = memref.load %arg2[%725] : memref<64xi32, #tpu.memory_space<smem>>
    %727 = arith.index_cast %723 : i32 to index
    %c0_403 = arith.constant 0 : index
    %728 = vector.load %arg3[%727, %c0_403] : memref<50x32xf32, #tpu.memory_space<vmem>>, vector<1x32xf32>
    %c15 = arith.constant 15 : index
    %c0_404 = arith.constant 0 : index
    %729 = vector.load %arg6[%c15, %c0_404] : memref<16x128xf32, #tpu.memory_space<vmem>>, vector<1x32xf32>
    tpu.vector_store %arg6[%c15, %c0_404], %728 {strides = array<i32>} : memref<16x128xf32, #tpu.memory_space<vmem>>, vector<1x32xf32>,
    %730 = arith.index_cast %726 : i32 to index
    %c0_405 = arith.constant 0 : index
    %731 = vector.load %arg4[%730, %c0_405] : memref<2079x32xf32, #tpu.memory_space<vmem>>, vector<1x32xf32>
    %c15_406 = arith.constant 15 : index
    %c0_407 = arith.constant 0 : index
    %732 = vector.load %arg7[%c15_406, %c0_407] : memref<16x128xf32, #tpu.memory_space<vmem>>, vector<1x32xf32>
    tpu.vector_store %arg7[%c15_406, %c0_407], %731 {strides = array<i32>} : memref<16x128xf32, #tpu.memory_space<vmem>>, vector<1x32xf32>,
    %c61_i32 = arith.constant 61 : i32
    %733 = arith.addi %0, %c61_i32 : i32
    %734 = arith.index_cast %733 : i32 to index
    %735 = memref.load %arg1[%734] : memref<64xi32, #tpu.memory_space<smem>>
    %c61_i32_408 = arith.constant 61 : i32
    %736 = arith.addi %0, %c61_i32_408 : i32
    %737 = arith.index_cast %736 : i32 to index
    %738 = memref.load %arg2[%737] : memref<64xi32, #tpu.memory_space<smem>>
    %739 = arith.index_cast %735 : i32 to index
    %c0_409 = arith.constant 0 : index
    %740 = vector.load %arg3[%739, %c0_409] : memref<50x32xf32, #tpu.memory_space<vmem>>, vector<1x32xf32>
    %c15_410 = arith.constant 15 : index
    %c32_411 = arith.constant 32 : index
    %741 = vector.load %arg6[%c15_410, %c32_411] : memref<16x128xf32, #tpu.memory_space<vmem>>, vector<1x32xf32>
    tpu.vector_store %arg6[%c15_410, %c32_411], %740 {strides = array<i32>} : memref<16x128xf32, #tpu.memory_space<vmem>>, vector<1x32xf32>,
    %742 = arith.index_cast %738 : i32 to index
    %c0_412 = arith.constant 0 : index
    %743 = vector.load %arg4[%742, %c0_412] : memref<2079x32xf32, #tpu.memory_space<vmem>>, vector<1x32xf32>
    %c15_413 = arith.constant 15 : index
    %c32_414 = arith.constant 32 : index
    %744 = vector.load %arg7[%c15_413, %c32_414] : memref<16x128xf32, #tpu.memory_space<vmem>>, vector<1x32xf32>
    tpu.vector_store %arg7[%c15_413, %c32_414], %743 {strides = array<i32>} : memref<16x128xf32, #tpu.memory_space<vmem>>, vector<1x32xf32>,
    %c62_i32 = arith.constant 62 : i32
    %745 = arith.addi %0, %c62_i32 : i32
    %746 = arith.index_cast %745 : i32 to index
    %747 = memref.load %arg1[%746] : memref<64xi32, #tpu.memory_space<smem>>
    %c62_i32_415 = arith.constant 62 : i32
    %748 = arith.addi %0, %c62_i32_415 : i32
    %749 = arith.index_cast %748 : i32 to index
    %750 = memref.load %arg2[%749] : memref<64xi32, #tpu.memory_space<smem>>
    %751 = arith.index_cast %747 : i32 to index
    %c0_416 = arith.constant 0 : index
    %752 = vector.load %arg3[%751, %c0_416] : memref<50x32xf32, #tpu.memory_space<vmem>>, vector<1x32xf32>
    %c15_417 = arith.constant 15 : index
    %c64_418 = arith.constant 64 : index
    %753 = vector.load %arg6[%c15_417, %c64_418] : memref<16x128xf32, #tpu.memory_space<vmem>>, vector<1x32xf32>
    tpu.vector_store %arg6[%c15_417, %c64_418], %752 {strides = array<i32>} : memref<16x128xf32, #tpu.memory_space<vmem>>, vector<1x32xf32>,
    %754 = arith.index_cast %750 : i32 to index
    %c0_419 = arith.constant 0 : index
    %755 = vector.load %arg4[%754, %c0_419] : memref<2079x32xf32, #tpu.memory_space<vmem>>, vector<1x32xf32>
    %c15_420 = arith.constant 15 : index
    %c64_421 = arith.constant 64 : index
    %756 = vector.load %arg7[%c15_420, %c64_421] : memref<16x128xf32, #tpu.memory_space<vmem>>, vector<1x32xf32>
    tpu.vector_store %arg7[%c15_420, %c64_421], %755 {strides = array<i32>} : memref<16x128xf32, #tpu.memory_space<vmem>>, vector<1x32xf32>,
    %c63_i32 = arith.constant 63 : i32
    %757 = arith.addi %0, %c63_i32 : i32
    %758 = arith.index_cast %757 : i32 to index
    %759 = memref.load %arg1[%758] : memref<64xi32, #tpu.memory_space<smem>>
    %c63_i32_422 = arith.constant 63 : i32
    %760 = arith.addi %0, %c63_i32_422 : i32
    %761 = arith.index_cast %760 : i32 to index
    %762 = memref.load %arg2[%761] : memref<64xi32, #tpu.memory_space<smem>>
    %763 = arith.index_cast %759 : i32 to index
    %c0_423 = arith.constant 0 : index
    %764 = vector.load %arg3[%763, %c0_423] : memref<50x32xf32, #tpu.memory_space<vmem>>, vector<1x32xf32>
    %c15_424 = arith.constant 15 : index
    %c96_425 = arith.constant 96 : index
    %765 = vector.load %arg6[%c15_424, %c96_425] : memref<16x128xf32, #tpu.memory_space<vmem>>, vector<1x32xf32>
    tpu.vector_store %arg6[%c15_424, %c96_425], %764 {strides = array<i32>} : memref<16x128xf32, #tpu.memory_space<vmem>>, vector<1x32xf32>,
    %766 = arith.index_cast %762 : i32 to index
    %c0_426 = arith.constant 0 : index
    %767 = vector.load %arg4[%766, %c0_426] : memref<2079x32xf32, #tpu.memory_space<vmem>>, vector<1x32xf32>
    %c15_427 = arith.constant 15 : index
    %c96_428 = arith.constant 96 : index
    %768 = vector.load %arg7[%c15_427, %c96_428] : memref<16x128xf32, #tpu.memory_space<vmem>>, vector<1x32xf32>
    tpu.vector_store %arg7[%c15_427, %c96_428], %767 {strides = array<i32>} : memref<16x128xf32, #tpu.memory_space<vmem>>, vector<1x32xf32>,
    %c0_429 = arith.constant 0 : index
    %c0_430 = arith.constant 0 : index
    %769 = vector.load %arg6[%c0_429, %c0_430] : memref<16x128xf32, #tpu.memory_space<vmem>>, vector<16x128xf32>
    %c0_431 = arith.constant 0 : index
    %c0_432 = arith.constant 0 : index
    %770 = vector.load %arg7[%c0_431, %c0_432] : memref<16x128xf32, #tpu.memory_space<vmem>>, vector<16x128xf32>
    %771 = arith.mulf %769, %770 : vector<16x128xf32>
    %c0_433 = arith.constant 0 : index
    %c0_434 = arith.constant 0 : index
    %772 = vector.load %arg5[%c0_433, %c0_434] : memref<16x128xf32, #tpu.memory_space<vmem>>, vector<16x128xf32>
    tpu.vector_store %arg5[%c0_433, %c0_434], %771 {strides = array<i32>} : memref<16x128xf32, #tpu.memory_space<vmem>>, vector<16x128xf32>,
    return
  }
  func.func @transform_0(%arg0: i32, %arg1: memref<64xi32, #tpu.memory_space<smem>>, %arg2: memref<64xi32, #tpu.memory_space<smem>>) -> (i32, i32) {
    %c0_i32 = arith.constant 0 : i32
    %c0_i32_0 = arith.constant 0 : i32
    %c0_i32_1 = arith.constant 0 : i32
    return %c0_i32, %c0_i32_0 : i32, i32
  }
  func.func @transform_1(%arg0: i32, %arg1: memref<64xi32, #tpu.memory_space<smem>>, %arg2: memref<64xi32, #tpu.memory_space<smem>>) -> (i32, i32) {
    %c0_i32 = arith.constant 0 : i32
    %c0_i32_0 = arith.constant 0 : i32
    %c0_i32_1 = arith.constant 0 : i32
    return %c0_i32, %c0_i32_0 : i32, i32
  }
  func.func @transform_2(%arg0: i32, %arg1: memref<64xi32, #tpu.memory_space<smem>>, %arg2: memref<64xi32, #tpu.memory_space<smem>>) -> (i32, i32) {
    %c0_i32 = arith.constant 0 : i32
    %c0_i32_0 = arith.constant 0 : i32
    return %arg0, %c0_i32 : i32, i32
  }
}

</mosaic_0001>

<bundles_post_ra>
// kernel: tpu_custom_call.1
= control target key start
LH: loop header
LB: loop body
LE: loop exit
PB: predicated region body
PF: predicated region fallthrough
CT: control target
= control target key end

     0   :  { %s2260_s0 = inlined_call_operand.vmem [shape: s32[64], index: 0, kind: input, shape index: {}]   ;;  %s2261_s2 = inlined_call_operand.vmem [shape: f32[50,32], index: 2, kind: input, shape index: {}]   ;;  %s2262_s3 = inlined_call_operand.vmem [shape: f32[2079,32], index: 3, kind: input, shape index: {}]   ;;  %s2263_s4 = inlined_call_operand.hbm [shape: f32[16,128], index: 4, kind: output, shape index: {}]   ;;  %s2264_s1 = inlined_call_operand.vmem [shape: s32[64], index: 1, kind: input, shape index: {}]  }
   0x1   :  { %2271 = sst [smem:[#allocation15_spill]] %s2263_s4  ;;  %s9_s17 = sshll.u32 %s2260_s0, 4  ;;  %s10_s17 = int_to_ptr.vmem [resolvable:$true] %s9_s17 }
   0x2   :  { %s13_s20 = sshll.u32 %s2264_s1, 4  ;;  %s1274_s21 = scalar_lea.vmem %s10_s17, 16  ;;  %s14_s20 = int_to_ptr.vmem [resolvable:$true] %s13_s20 }
   0x3   :  { %p1275_p0 = scmp.ne.s32.totalorder %s10_s17, %s1274_s21  ;;  %p1279_p1 = scmp.lt.s32.totalorder %s10_s17, %s10_s17 }
   0x4   :  { %p1280_p2 = scmp.lt.s32.totalorder %s1274_s21, %s1274_s21 }
   0x6   :  { %p1281_p3 = por %p1280_p2, %p1279_p1 }
   0x8   :  { %p1282_p4 = pnand %p1281_p3, %p1275_p0 }
   0xa   :  { %1285 = shalt.err (!%p1282_p4)  }
   0xb   :  { %s1322_s22 = smov [#allocation5]   ;;  %s1286_s23 = scalar_lea.vmem %s14_s20, 16 }
   0xc   :  { %12 = dma.vmem_to_smem %s10_s17, 16, %s1322_s22, [#allocation4] }
   0xd   :  { %p1287_p5 = scmp.ne.s32.totalorder %s14_s20, %s1286_s23  ;;  %p1291_p6 = scmp.lt.s32.totalorder %s14_s20, %s14_s20 }
   0xe   :  { %p1292_p7 = scmp.lt.s32.totalorder %s1286_s23, %s1286_s23 }
  0x10   :  { %p1293_p8 = por %p1292_p7, %p1291_p6 }
  0x12   :  { %p1294_p9 = pnand %p1293_p8, %p1287_p5 }
  0x14   :  { %1297 = shalt.err (!%p1294_p9)  }
  0x15   :  { %s1323_s0 = smov [#allocation6]  }
  0x16   :  { %16 = dma.vmem_to_smem %s14_s20, 16, %s1323_s0, [#allocation4] }
  0x17   :  { %1318 = dma.done.wait [#allocation4], 32 }
  0x18   :  { %1319 = vsyncadd [#allocation4], 4294967264 }
  0x19   :  { %18 = sfence }
  0x1a   :  { %s1142_s1 = sld [smem:[#allocation5 + $0x2]] }
  0x1b   :  { %s1140_s24 = sld [smem:[#allocation5 + $0x1]] }
  0x1c   :  { %19 = vsyncpa [#allocation8], 0  ;;  %s1143_s25 = sld [smem:[#allocation6 + $0x2]]  ;;  %s2265_s11 = smov 64   ;;  %vm29_vm0 = vcmask 253952   ;;  %vm43_vm1 = vcmask 516352  }
  0x1d   :  { %s1141_s26 = sld [smem:[#allocation6 + $0x1]]  ;;  %s2269_s15 = smov 32   ;;  %vm61_vm2 = vcmask 778752   ;;  %vm79_vm3 = vcmask 1041152  }
  0x1e   :  { %s1145_s27 = sld [smem:[#allocation6 + $0x3]] }
  0x1f   :  { %s1144_s28 = sld [smem:[#allocation5 + $0x3]] }
  0x20   :  { %s55_s5 = scalar_lea.vmem %s2261_s2, %s1142_s1  ;;  %s1149_s6 = sld [smem:[#allocation6 + $0x5]] }
  0x21   :  { %v56_v0 = vld [vmem:[%s55_s5] sm:$0x1]  ;;  %s37_s9 = scalar_lea.vmem %s2261_s2, %s1140_s24  ;;  %s1148_s10 = sld [smem:[#allocation5 + $0x5]] }
  0x22   :  { %58 = vrot.lane.b32.xlu1 %v56_v0, %s2265_s11  ;;  %v38_v1 = vld [vmem:[%s37_s9] sm:$0x1]  ;;  %s63_s14 = scalar_lea.vmem %s2262_s3, %s1143_s25  ;;  %s1151_s22 = sld [smem:[#allocation6 + $0x6]] }
  0x23   :  { %40 = vrot.lane.b32.xlu0 %v38_v1, %s2269_s15  ;;  %v64_v2 = vld [vmem:[%s63_s14] sm:$0x1]  ;;  %s45_s18 = scalar_lea.vmem %s2262_s3, %s1141_s26  ;;  %s1150_s24 = sld [smem:[#allocation5 + $0x6]] }
  0x24   :  { %v46_v3 = vld [vmem:[%s45_s18] sm:$0x1]  ;;  %s81_s21 = scalar_lea.vmem %s2262_s3, %s1145_s27  ;;  %s1153_s30 = sld [smem:[#allocation6 + $0x7]] }
  0x25   :  { %s73_s1 = scalar_lea.vmem %s2261_s2, %s1144_s28  ;;  %v82_v4 = vld [vmem:[%s81_s21] sm:$0x1]  ;;  %s1152_s8 = sld [smem:[#allocation5 + $0x7]] }
  0x26   :  { %66 = vrot.lane.b32.xlu1 %v64_v2, %s2265_s11  ;;  %v74_v5 = vld [vmem:[%s73_s1] sm:$0x1]  ;;  %s107_s26 = scalar_lea.vmem %s2262_s3, %s1149_s6  ;;  %s2267_s9 = smov 96  }
  0x27   :  { %48 = vrot.lane.b32.xlu0 %v46_v3, %s2269_s15  ;;  %s100_s27 = scalar_lea.vmem %s2261_s2, %s1148_s10  ;;  %v108_v6 = vld [vmem:[%s107_s26] sm:$0x1]  ;;  %s1157_s14 = sld [smem:[#allocation6 + $0x9]] }
  0x28   :  { %v101_v7 = vld [vmem:[%s100_s27] sm:$0x1]  ;;  %s124_s13 = scalar_lea.vmem %s2262_s3, %s1151_s22  ;;  %s1156_s18 = sld [smem:[#allocation5 + $0x9]] }
  0x29   :  { %s117_s17 = scalar_lea.vmem %s2261_s2, %s1150_s24  ;;  %v125_v8 = vld [vmem:[%s124_s13] sm:$0x1]  ;;  %s1159_s21 = sld [smem:[#allocation6 + $0xa]] }
  0x2a   :  { %84 = vrot.lane.b32.xlu1 %v82_v4, %s2267_s9  ;;  %v118_v9 = vld [vmem:[%s117_s17] sm:$0x1]  ;;  %s141_s20 = scalar_lea.vmem %s2262_s3, %s1153_s30  ;;  %s1158_s1 = sld [smem:[#allocation5 + $0xa]] }
  0x2b   :  { %76 = vrot.lane.b32.xlu0 %v74_v5, %s2267_s9  ;;  %s134_s22 = scalar_lea.vmem %s2261_s2, %s1152_s8  ;;  %v142_v10 = vld [vmem:[%s141_s20] sm:$0x1]  ;;  %s1161_s26 = sld [smem:[#allocation6 + $0xb]] }
  0x2c   :  { %v135_v11 = vld [vmem:[%s134_s22] sm:$0x1]  ;;  %s1160_s27 = sld [smem:[#allocation5 + $0xb]] }
  0x2d   :  { %s167_s29 = scalar_lea.vmem %s2262_s3, %s1157_s14  ;;  %s1165_s13 = sld [smem:[#allocation6 + $0xd]] }
  0x2e   :  { %110 = vrot.lane.b32.xlu1 %v108_v6, %s2269_s15  ;;  %s160_s30 = scalar_lea.vmem %s2261_s2, %s1156_s18  ;;  %v168_v12 = vld [vmem:[%s167_s29] sm:$0x1]  ;;  %s1164_s17 = sld [smem:[#allocation5 + $0xd]] }
  0x2f   :  { %103 = vrot.lane.b32.xlu0 %v101_v7, %s2269_s15  ;;  %v161_v13 = vld [vmem:[%s160_s30] sm:$0x1]  ;;  %s184_s12 = scalar_lea.vmem %s2262_s3, %s1159_s21  ;;  %s1167_s20 = sld [smem:[#allocation6 + $0xe]] }
  0x30   :  { %s177_s14 = scalar_lea.vmem %s2261_s2, %s1158_s1  ;;  %v185_v14 = vld [vmem:[%s184_s12] sm:$0x1]  ;;  %s1166_s22 = sld [smem:[#allocation5 + $0xe]] }
  0x31   :  { %v178_v15 = vld [vmem:[%s177_s14] sm:$0x1]  ;;  %s201_s19 = scalar_lea.vmem %s2262_s3, %s1161_s26  ;;  %s1169_s29 = sld [smem:[#allocation6 + $0xf]] }
  0x32   :  { %127 = vrot.lane.b32.xlu1 %v125_v8, %s2265_s11  ;;  %s194_s21 = scalar_lea.vmem %s2261_s2, %s1160_s27  ;;  %v202_v16 = vld [vmem:[%s201_s19] sm:$0x1]  ;;  %s1168_s30 = sld [smem:[#allocation5 + $0xf]] }
  0x33   :  { %120 = vrot.lane.b32.xlu0 %v118_v9, %s2265_s11  ;;  %v195_v17 = vld [vmem:[%s194_s21] sm:$0x1]  ;;  %s227_s25 = scalar_lea.vmem %s2262_s3, %s1165_s13  ;;  %s1173_s12 = sld [smem:[#allocation6 + $0x11]] }
  0x34   :  { %s220_s26 = scalar_lea.vmem %s2261_s2, %s1164_s17  ;;  %v228_v18 = vld [vmem:[%s227_s25] sm:$0x1]  ;;  %s1172_s14 = sld [smem:[#allocation5 + $0x11]] }
  0x35   :  { %v221_v19 = vld [vmem:[%s220_s26] sm:$0x1]  ;;  %s244_s28 = scalar_lea.vmem %s2262_s3, %s1167_s20  ;;  %s1175_s19 = sld [smem:[#allocation6 + $0x12]] }
  0x36   :  { %144 = vrot.lane.b32.xlu1 %v142_v10, %s2267_s9  ;;  %s237_s13 = scalar_lea.vmem %s2261_s2, %s1166_s22  ;;  %v245_v20 = vld [vmem:[%s244_s28] sm:$0x1]  ;;  %s1174_s21 = sld [smem:[#allocation5 + $0x12]] }
  0x37   :  { %137 = vrot.lane.b32.xlu0 %v135_v11, %s2267_s9  ;;  %v238_v21 = vld [vmem:[%s237_s13] sm:$0x1]  ;;  %s261_s10 = scalar_lea.vmem %s2262_s3, %s1169_s29  ;;  %s1177_s25 = sld [smem:[#allocation6 + $0x13]] }
  0x38   :  { %s254_s20 = scalar_lea.vmem %s2261_s2, %s1168_s30  ;;  %v262_v22 = vld [vmem:[%s261_s10] sm:$0x1]  ;;  %s1176_s26 = sld [smem:[#allocation5 + $0x13]] }
  0x39   :  { %v255_v23 = vld [vmem:[%s254_s20] sm:$0x1]  ;;  %s287_s24 = scalar_lea.vmem %s2262_s3, %s1173_s12  ;;  %s1181_s28 = sld [smem:[#allocation6 + $0x15]] }
  0x3a   :  { %170 = vrot.lane.b32.xlu1 %v168_v12, %s2269_s15  ;;  %s280_s29 = scalar_lea.vmem %s2261_s2, %s1172_s14  ;;  %v288_v24 = vld [vmem:[%s287_s24] sm:$0x1]  ;;  %s1180_s13 = sld [smem:[#allocation5 + $0x15]] }
  0x3b   :  { %163 = vrot.lane.b32.xlu0 %v161_v13, %s2269_s15  ;;  %v281_v25 = vld [vmem:[%s280_s29] sm:$0x1]  ;;  %s304_s8 = scalar_lea.vmem %s2262_s3, %s1175_s19  ;;  %s1470_s14 = sld [smem:[#allocation6 + $0x16]] }
  0x3c   :  { %s297_s12 = scalar_lea.vmem %s2261_s2, %s1174_s21  ;;  %v305_v26 = vld [vmem:[%s304_s8] sm:$0x1]  ;;  %s1473_s17 = sld [smem:[#allocation5 + $0x16]] }
  0x3d   :  { %v298_v27 = vld [vmem:[%s297_s12] sm:$0x1]  ;;  %s321_s19 = scalar_lea.vmem %s2262_s3, %s1177_s25  ;;  %s25_s23 = sld [smem:[#allocation5]] }
  0x3e   :  { %187 = vrot.lane.b32.xlu1 %v185_v14, %s2265_s11  ;;  %s314_s21 = scalar_lea.vmem %s2261_s2, %s1176_s26  ;;  %v322_v28 = vld [vmem:[%s321_s19] sm:$0x1]  ;;  %s26_s22 = sld [smem:[#allocation6]] }
  0x3f   :  { %180 = vrot.lane.b32.xlu0 %v178_v15, %s2265_s11  ;;  %v315_v29 = vld [vmem:[%s314_s21] sm:$0x1]  ;;  %s347_s5 = scalar_lea.vmem %s2262_s3, %s1181_s28  ;;  %s1486_s7 = sld [smem:[#allocation6 + $0x17]] }
  0x40   :  { %s340_s30 = scalar_lea.vmem %s2261_s2, %s1180_s13  ;;  %s1491_s26 = sld [smem:[#allocation5 + $0x17]]  ;;  %v348_v30 = vld [vmem:[%s347_s5] sm:$0x1] }
  0x41   :  { %s1494_s27 = sld [smem:[#allocation6 + $0x19]]  ;;  %s364_s18 = scalar_lea.vmem %s2262_s3, %s1470_s14  ;;  %v341_v32 = vld [vmem:[%s340_s30] sm:$0x1] }
  0x42   :  { %204 = vrot.lane.b32.xlu1 %v202_v16, %s2267_s9  ;;  %s1504_s13 = sld [smem:[#allocation5 + $0x19]]  ;;  %s357_s0 = scalar_lea.vmem %s2261_s2, %s1473_s17  ;;  %v365_v34 = vld [vmem:[%s364_s18] sm:$0x1] }
  0x43   :  { %197 = vrot.lane.b32.xlu0 %v195_v17, %s2267_s9  ;;  %s27_s6 = scalar_lea.vmem %s2261_s2, %s25_s23  ;;  %s1147_s23 = sld [smem:[#allocation6 + $0x4]]  ;;  %v358_v35 = vld [vmem:[%s357_s0] sm:$0x1] }
  0x44   :  { %v28_v31 = vld [vmem:[%s27_s6] sm:$0x1]  ;;  %s31_s1 = scalar_lea.vmem %s2262_s3, %s26_s22  ;;  %s1146_s24 = sld [smem:[#allocation5 + $0x4]] }
  0x45   :  { %30 = vst.msk [vmem:[#allocation2] sm:$0x1] %vm29_vm0, %v28_v31  ;;  %v32_v33 = vld [vmem:[%s31_s1] sm:$0x1]  ;;  %s381_s5 = scalar_lea.vmem %s2262_s3, %s1486_s7  ;;  %s1521_s25 = sld [smem:[#allocation6 + $0x1a]] }
  0x46   :  { %230 = vrot.lane.b32.xlu1 %v228_v18, %s2269_s15  ;;  %33 = vst.msk [vmem:[#allocation3] sm:$0x1] %vm29_vm0, %v32_v33  ;;  %s374_s22 = scalar_lea.vmem %s2261_s2, %s1491_s26  ;;  %s1527_s8 = sld [smem:[#allocation5 + $0x1a]]  ;;  %v382_v36 = vld [vmem:[%s381_s5] sm:$0x1] }
  0x47   :  { %223 = vrot.lane.b32.xlu0 %v221_v19, %s2269_s15  ;;  %s1530_s16 = sld [smem:[#allocation6 + $0x1b]]  ;;  %v375_v38 = vld [vmem:[%s374_s22] sm:$0x1]  ;;  %s407_s20 = scalar_lea.vmem %s2262_s3, %s1494_s27 }
  0x48   :  { %s1536_s7 = sld [smem:[#allocation5 + $0x1b]]  ;;  %s400_s14 = scalar_lea.vmem %s2261_s2, %s1504_s13  ;;  %v408_v40 = vld [vmem:[%s407_s20] sm:$0x1] }
  0x49   :  { %s94_s12 = scalar_lea.vmem %s2262_s3, %s1147_s23  ;;  %s1155_s23 = sld [smem:[#allocation6 + $0x8]]  ;;  %v401_v41 = vld [vmem:[%s400_s14] sm:$0x1] }
  0x4a   :  { %247 = vrot.lane.b32.xlu1 %v245_v20, %s2265_s11  ;;  %v95_v37 = vld [vmem:[%s94_s12] sm:$0x1]  ;;  %s91_s26 = scalar_lea.vmem %s2261_s2, %s1146_s24  ;;  %s1154_s17 = sld [smem:[#allocation5 + $0x8]] }
  0x4b   :  { %240 = vrot.lane.b32.xlu0 %v238_v21, %s2265_s11  ;;  %96 = vst.msk [vmem:[#allocation3 + $0x1] sm:$0x1] %vm29_vm0, %v95_v37  ;;  %v92_v39 = vld [vmem:[%s91_s26] sm:$0x1]  ;;  %s1552_s24 = sld [smem:[#allocation6 + $0x1d]]  ;;  %s424_s30 = scalar_lea.vmem %s2262_s3, %s1521_s25 }
  0x4c   :  { %93 = vst.msk [vmem:[#allocation2 + $0x1] sm:$0x1] %vm29_vm0, %v92_v39  ;;  %s1555_s27 = sld [smem:[#allocation5 + $0x1d]]  ;;  %s417_s28 = scalar_lea.vmem %s2261_s2, %s1527_s8  ;;  %v425_v42 = vld [vmem:[%s424_s30] sm:$0x1] }
  0x4d   :  { %s1561_s22 = sld [smem:[#allocation6 + $0x1e]]  ;;  %v418_v44 = vld [vmem:[%s417_s28] sm:$0x1]  ;;  %s441_s14 = scalar_lea.vmem %s2262_s3, %s1530_s16 }
  0x4e   :  { %264 = vrot.lane.b32.xlu1 %v262_v22, %s2267_s9  ;;  %s1567_s12 = sld [smem:[#allocation5 + $0x1e]]  ;;  %s434_s30 = scalar_lea.vmem %s2261_s2, %s1536_s7  ;;  %v442_v46 = vld [vmem:[%s441_s14] sm:$0x1] }
  0x4f   :  { %257 = vrot.lane.b32.xlu0 %v255_v23, %s2267_s9  ;;  %s1570_s18 = sld [smem:[#allocation6 + $0x1f]]  ;;  %s154_s19 = scalar_lea.vmem %s2262_s3, %s1155_s23  ;;  %v435_v47 = vld [vmem:[%s434_s30] sm:$0x1] }
  0x50   :  { %s1576_s25 = sld [smem:[#allocation5 + $0x1f]]  ;;  %v155_v43 = vld [vmem:[%s154_s19] sm:$0x1]  ;;  %s151_s8 = scalar_lea.vmem %s2261_s2, %s1154_s17 }
  0x51   :  { %156 = vst.msk [vmem:[#allocation3 + $0x2] sm:$0x1] %vm29_vm0, %v155_v43  ;;  %v152_v45 = vld [vmem:[%s151_s8] sm:$0x1]  ;;  %s1163_s23 = sld [smem:[#allocation6 + $0xc]]  ;;  %s467_s10 = scalar_lea.vmem %s2262_s3, %s1552_s24 }
  0x52   :  { %290 = vrot.lane.b32.xlu1 %v288_v24, %s2269_s15  ;;  %153 = vst.msk [vmem:[#allocation2 + $0x2] sm:$0x1] %vm29_vm0, %v152_v45  ;;  %s1162_s13 = sld [smem:[#allocation5 + $0xc]]  ;;  %s460_s0 = scalar_lea.vmem %s2261_s2, %s1555_s27  ;;  %v468_v48 = vld [vmem:[%s467_s10] sm:$0x1] }
  0x53   :  { %283 = vrot.lane.b32.xlu0 %v281_v25, %s2269_s15  ;;  %s1592_s17 = sld [smem:[#allocation6 + $0x21]]  ;;  %v461_v50 = vld [vmem:[%s460_s0] sm:$0x1]  ;;  %s484_s28 = scalar_lea.vmem %s2262_s3, %s1561_s22 }
  0x54   :  { %s1595_s16 = sld [smem:[#allocation5 + $0x21]]  ;;  %s477_s19 = scalar_lea.vmem %s2261_s2, %s1567_s12  ;;  %v485_v52 = vld [vmem:[%s484_s28] sm:$0x1] }
  0x55   :  { %s1601_s26 = sld [smem:[#allocation6 + $0x22]]  ;;  %s501_s1 = scalar_lea.vmem %s2262_s3, %s1570_s18  ;;  %v478_v53 = vld [vmem:[%s477_s19] sm:$0x1] }
  0x56   :  { %307 = vrot.lane.b32.xlu1 %v305_v26, %s2265_s11  ;;  %s1607_s20 = sld [smem:[#allocation5 + $0x22]]  ;;  %s494_s27 = scalar_lea.vmem %s2261_s2, %s1576_s25  ;;  %v502_v54 = vld [vmem:[%s501_s1] sm:$0x1] }
  0x57   :  { %300 = vrot.lane.b32.xlu0 %v298_v27, %s2265_s11  ;;  %s1610_s8 = sld [smem:[#allocation6 + $0x23]]  ;;  %s214_s14 = scalar_lea.vmem %s2262_s3, %s1163_s23  ;;  %v495_v56 = vld [vmem:[%s494_s27] sm:$0x1] }
  0x58   :  { %s1616_s24 = sld [smem:[#allocation5 + $0x23]]  ;;  %v215_v49 = vld [vmem:[%s214_s14] sm:$0x1]  ;;  %s211_s29 = scalar_lea.vmem %s2261_s2, %s1162_s13 }
  0x59   :  { %216 = vst.msk [vmem:[#allocation3 + $0x3] sm:$0x1] %vm29_vm0, %v215_v49  ;;  %v212_v51 = vld [vmem:[%s211_s29] sm:$0x1]  ;;  %s1171_s23 = sld [smem:[#allocation6 + $0x10]]  ;;  %s527_s6 = scalar_lea.vmem %s2262_s3, %s1592_s17 }
  0x5a   :  { %324 = vrot.lane.b32.xlu1 %v322_v28, %s2267_s9  ;;  %213 = vst.msk [vmem:[#allocation2 + $0x3] sm:$0x1] %vm29_vm0, %v212_v51  ;;  %s1170_s21 = sld [smem:[#allocation5 + $0x10]]  ;;  %s520_s13 = scalar_lea.vmem %s2261_s2, %s1595_s16  ;;  %v528_v58 = vld [vmem:[%s527_s6] sm:$0x1] }
  0x5b   :  { %317 = vrot.lane.b32.xlu0 %v315_v29, %s2267_s9  ;;  %s1636_s14 = sld [smem:[#allocation6 + $0x25]]  ;;  %s544_s7 = scalar_lea.vmem %s2262_s3, %s1601_s26  ;;  %v521_v59 = vld [vmem:[%s520_s13] sm:$0x1] }
  0x5c   :  { %s1643_s12 = sld [smem:[#allocation5 + $0x25]]  ;;  %s537_s22 = scalar_lea.vmem %s2261_s2, %s1607_s20  ;;  %v545_v60 = vld [vmem:[%s544_s7] sm:$0x1] }
  0x5d   :  { %s1649_s10 = sld [smem:[#allocation6 + $0x26]]  ;;  %s561_s5 = scalar_lea.vmem %s2262_s3, %s1610_s8  ;;  %v538_v62 = vld [vmem:[%s537_s22] sm:$0x1] }
  0x5e   :  { %350 = vrot.lane.b32.xlu1 %v348_v30, %s2269_s15  ;;  %s1655_s28 = sld [smem:[#allocation5 + $0x26]]  ;;  %v562_v0 = vld [vmem:[%s561_s5] sm:$0x1] }
  0x5f   :  { %343 = vrot.lane.b32.xlu0 %v341_v32, %s2269_s15  ;;  %s1658_s25 = sld [smem:[#allocation6 + $0x27]]  ;;  %s274_s19 = scalar_lea.vmem %s2262_s3, %s1171_s23 }
  0x60   :  { %s1664_s17 = sld [smem:[#allocation5 + $0x27]]  ;;  %v275_v55 = vld [vmem:[%s274_s19] sm:$0x1]  ;;  %s271_s29 = scalar_lea.vmem %s2261_s2, %s1170_s21 }
  0x61   :  { %276 = vst.msk [vmem:[#allocation3 + $0x4] sm:$0x1] %vm29_vm0, %v275_v55  ;;  %v272_v57 = vld [vmem:[%s271_s29] sm:$0x1]  ;;  %s1179_s23 = sld [smem:[#allocation6 + $0x14]]  ;;  %s2278_s29 = smov 96  }
  0x62   :  { %367 = vrot.lane.b32.xlu1 %v365_v34, %s2265_s11  ;;  %273 = vst.msk [vmem:[#allocation2 + $0x4] sm:$0x1] %vm29_vm0, %v272_v57  ;;  %s1178_s19 = sld [smem:[#allocation5 + $0x14]]  ;;  %s2279_s4 = scalar_lea.vmem %s2262_s3, %s1636_s14 }
  0x63   :  { %360 = vrot.lane.b32.xlu0 %v358_v35, %s2265_s11  ;;  %s1684_s16 = sld [smem:[#allocation6 + $0x29]]  ;;  %v588_v2 = vld [vmem:[%s2279_s4] sm:$0x1] }
  0x64   :  { %s1691_s20 = sld [smem:[#allocation5 + $0x29]] }
  0x65   :  { %s1703_s6 = sld [smem:[#allocation5 + $0x2d]] }
  0x66   :  { %384 = vrot.lane.b32.xlu1 %v382_v36, %s2267_s9  ;;  %s1706_s26 = sld [smem:[#allocation6 + $0x31]] }
  0x67   :  { %377 = vrot.lane.b32.xlu0 %v375_v38, %s2267_s9  ;;  %s334_s13 = scalar_lea.vmem %s2262_s3, %s1179_s23  ;;  %s1712_s18 = sld [smem:[#allocation5 + $0x31]] }
  0x68   :  { %v335_v61 = vld [vmem:[%s334_s13] sm:$0x1]  ;;  %s331_s27 = scalar_lea.vmem %s2261_s2, %s1178_s19  ;;  %s1187_s7 = sld [smem:[#allocation6 + $0x18]] }
  0x69   :  { %336 = vst.msk [vmem:[#allocation3 + $0x5] sm:$0x1] %vm29_vm0, %v335_v61  ;;  %v332_v63 = vld [vmem:[%s331_s27] sm:$0x1]  ;;  %s1186_s1 = sld [smem:[#allocation5 + $0x18]]  ;;  %s2274_s19 = smov 64  }
  0x6a   :  { %410 = vrot.lane.b32.xlu1 %v408_v40, %s2269_s15  ;;  %333 = vst.msk [vmem:[#allocation2 + $0x5] sm:$0x1] %vm29_vm0, %v332_v63  ;;  %s1732_s0 = sld [smem:[#allocation6 + $0x35]] }
  0x6b   :  { %403 = vrot.lane.b32.xlu0 %v401_v41, %s2269_s15  ;;  %s1195_s30 = sld [smem:[#allocation6 + $0x1c]] }
  0x6c   :  { %2272 = sst [smem:[#allocation11_spill]] %s1706_s26 }
  0x6d   :  { %2273 = sst [smem:[#allocation12_spill]] %s1712_s18  ;;  %s2284_s18 = scalar_lea.vmem %s2262_s3, %s1658_s25 }
  0x6e   :  { %427 = vrot.lane.b32.xlu1 %v425_v42, %s2265_s11  ;;  %s1194_s23 = sld [smem:[#allocation5 + $0x1c]]  ;;  %s394_s26 = scalar_lea.vmem %s2262_s3, %s1187_s7  ;;  %v622_v12 = vld [vmem:[%s2284_s18] sm:$0x1] }
  0x6f   :  { %420 = vrot.lane.b32.xlu0 %v418_v44, %s2265_s11  ;;  %s1203_s22 = sld [smem:[#allocation6 + $0x20]]  ;;  %v395_v3 = vld [vmem:[%s394_s26] sm:$0x1]  ;;  %s391_s8 = scalar_lea.vmem %s2261_s2, %s1186_s1 }
  0x70   :  { %2275 = sst [smem:[#allocation13_spill]] %s1732_s0  ;;  %396 = vst.msk [vmem:[#allocation3 + $0x6] sm:$0x1] %vm29_vm0, %v395_v3  ;;  %v392_v5 = vld [vmem:[%s391_s8] sm:$0x1]  ;;  %s2282_s7 = scalar_lea.vmem %s2262_s3, %s1649_s10 }
  0x71   :  { %s1772_s5 = sld [smem:[#allocation5 + $0x20]]  ;;  %393 = vst.msk [vmem:[#allocation2 + $0x6] sm:$0x1] %vm29_vm0, %v392_v5  ;;  %s454_s0 = scalar_lea.vmem %s2262_s3, %s1195_s30  ;;  %v605_v6 = vld [vmem:[%s2282_s7] sm:$0x1] }
  0x72   :  { %444 = vrot.lane.b32.xlu1 %v442_v46, %s2267_s9  ;;  %s1784_s14 = sld [smem:[#allocation6 + $0x24]]  ;;  %v455_v7 = vld [vmem:[%s454_s0] sm:$0x1]  ;;  %s2283_s30 = scalar_lea.vmem %s2261_s2, %s1655_s28 }
  0x73   :  { %437 = vrot.lane.b32.xlu0 %v435_v47, %s2267_s9  ;;  %s1791_s4 = sld [smem:[#allocation5 + $0x24]]  ;;  %v598_v8 = vld [vmem:[%s2283_s30] sm:$0x1]  ;;  %456 = vst.msk [vmem:[#allocation3 + $0x7] sm:$0x1] %vm29_vm0, %v455_v7 }
  0x74   :  { %s1797_s21 = sld [smem:[#allocation6 + $0x28]] }
  0x75   :  { %s1808_s1 = sld [smem:[#allocation5 + $0x28]]  ;;  %s514_s0 = scalar_lea.vmem %s2262_s3, %s1203_s22 }
  0x76   :  { %470 = vrot.lane.b32.xlu1 %v468_v48, %s2269_s15  ;;  %s1819_s8 = sld [smem:[#allocation6 + $0x2c]]  ;;  %v515_v10 = vld [vmem:[%s514_s0] sm:$0x1] }
  0x77   :  { %463 = vrot.lane.b32.xlu0 %v461_v50, %s2269_s15  ;;  %s1826_s28 = sld [smem:[#allocation5 + $0x2c]]  ;;  %516 = vst.msk [vmem:[#allocation3 + $0x8] sm:$0x1] %vm29_vm0, %v515_v10 }
  0x78   :  { %s574_s13 = scalar_lea.vmem %s2262_s3, %s1784_s14  ;;  %s1834_s26 = sld [smem:[#allocation6 + $0x30]] }
  0x79   :  { %v575_v13 = vld [vmem:[%s574_s13] sm:$0x1]  ;;  %s571_s10 = scalar_lea.vmem %s2261_s2, %s1791_s4  ;;  %s1847_s0 = sld [smem:[#allocation5 + $0x30]] }
  0x7a   :  { %487 = vrot.lane.b32.xlu1 %v485_v52, %s2265_s11  ;;  %576 = vst.msk [vmem:[#allocation3 + $0x9] sm:$0x1] %vm29_vm0, %v575_v13  ;;  %v572_v16 = vld [vmem:[%s571_s10] sm:$0x1]  ;;  %s634_s22 = scalar_lea.vmem %s2262_s3, %s1797_s21  ;;  %s1859_s7 = sld [smem:[#allocation6 + $0x34]] }
  0x7b   :  { %480 = vrot.lane.b32.xlu0 %v478_v53, %s2265_s11  ;;  %s1697_s11 = sld [smem:[#allocation6 + $0x2d]]  ;;  %573 = vst.msk [vmem:[#allocation2 + $0x9] sm:$0x1] %vm29_vm0, %v572_v16  ;;  %v635_v18 = vld [vmem:[%s634_s22] sm:$0x1]  ;;  %s2286_s10 = scalar_lea.vmem %s2262_s3, %s1684_s16 }
  0x7c   :  { %636 = vst.msk [vmem:[#allocation3 + $0xa] sm:$0x1] %vm29_vm0, %v635_v18  ;;  %s694_s18 = scalar_lea.vmem %s2262_s3, %s1819_s8  ;;  %s1875_s30 = sld [smem:[#allocation6 + $0x38]]  ;;  %v648_v20 = vld [vmem:[%s2286_s10] sm:$0x1] }
  0x7d   :  { %v695_v21 = vld [vmem:[%s694_s18] sm:$0x1]  ;;  %s1889_s8 = sld [smem:[#allocation5 + $0x38]]  ;;  %s2287_s22 = scalar_lea.vmem %s2261_s2, %s1691_s20 }
  0x7e   :  { %504 = vrot.lane.b32.xlu1 %v502_v54, %s2267_s9  ;;  %v641_v23 = vld [vmem:[%s2287_s22] sm:$0x1]  ;;  %s1896_s16 = sld [smem:[#allocation6 + $0x39]]  ;;  %696 = vst.msk [vmem:[#allocation3 + $0xb] sm:$0x1] %vm29_vm0, %v695_v21 }
  0x7f   :  { %497 = vrot.lane.b32.xlu0 %v495_v56, %s2267_s9  ;;  %s2277_s9 = scalar_lea.vmem %s2261_s2, %s1616_s24  ;;  %s511_s24 = scalar_lea.vmem %s2261_s2, %s1772_s5 }
  0x80   :  { %v555_v1 = vld [vmem:[%s2277_s9] sm:$0x1]  ;;  %s451_s9 = scalar_lea.vmem %s2261_s2, %s1194_s23  ;;  %s1866_s5 = sld [smem:[#allocation5 + $0x34]] }
  0x81   :  { %v452_v9 = vld [vmem:[%s451_s9] sm:$0x1]  ;;  %s751_s20 = scalar_lea.vmem %s2261_s2, %s1847_s0  ;;  %s1908_s9 = sld [smem:[#allocation6 + $0x3c]] }
  0x82   :  { %530 = vrot.lane.b32.xlu1 %v528_v58, %s2269_s15  ;;  %453 = vst.msk [vmem:[#allocation2 + $0x7] sm:$0x1] %vm29_vm0, %v452_v9  ;;  %v512_v11 = vld [vmem:[%s511_s24] sm:$0x1]  ;;  %s2288_s18 = sld [smem:[#allocation11_spill]]  ;;  %s814_s27 = scalar_lea.vmem %s2262_s3, %s1859_s7 }
  0x83   :  { %523 = vrot.lane.b32.xlu0 %v521_v59, %s2269_s15  ;;  %s1744_s15 = sld [smem:[#allocation5 + $0x35]]  ;;  %513 = vst.msk [vmem:[#allocation2 + $0x8] sm:$0x1] %vm29_vm0, %v512_v11  ;;  %v752_v27 = vld [vmem:[%s751_s20] sm:$0x1] }
  0x84   :  { %s1917_s10 = sld [smem:[#allocation5 + $0x3c]]  ;;  %753 = vst.msk [vmem:[#allocation2 + $0xc] sm:$0x1] %vm29_vm0, %v752_v27  ;;  %v815_v29 = vld [vmem:[%s814_s27] sm:$0x1]  ;;  %s874_s27 = scalar_lea.vmem %s2262_s3, %s1875_s30 }
  0x85   :  { %s2289_s0 = sld [smem:[#allocation12_spill]]  ;;  %816 = vst.msk [vmem:[#allocation3 + $0xd] sm:$0x1] %vm29_vm0, %v815_v29  ;;  %v875_v34 = vld [vmem:[%s874_s27] sm:$0x1]  ;;  %s887_s27 = scalar_lea.vmem %s2262_s3, %s1896_s16 }
  0x86   :  { %547 = vrot.lane.b32.xlu1 %v545_v60, %s2274_s19  ;;  %s1926_s25 = sld [smem:[#allocation5 + $0x39]]  ;;  %s811_s22 = scalar_lea.vmem %s2261_s2, %s1866_s5  ;;  %876 = vst.msk [vmem:[#allocation3 + $0xe] sm:$0x1] %vm29_vm0, %v875_v34  ;;  %v888_v46 = vld [vmem:[%s887_s27] sm:$0x1] }
  0x87   :  { %540 = vrot.lane.b32.xlu0 %v538_v62, %s2274_s19  ;;  %s2292_s20 = sld [smem:[#allocation13_spill]]  ;;  %v812_v32 = vld [vmem:[%s811_s22] sm:$0x1] }
  0x88   :  { %813 = vst.msk [vmem:[#allocation2 + $0xd] sm:$0x1] %vm29_vm0, %v812_v32  ;;  %s1970_s13 = sld [smem:[#allocation6 + $0x3d]] }
  0x89   :  { %2276 = sst [smem:[#allocation14_spill]] %s1744_s15  ;;  %s2280_s15 = scalar_lea.vmem %s2261_s2, %s1643_s12 }
  0x8a   :  { %564 = vrot.lane.b32.xlu1 %v562_v0, %s2278_s29  ;;  %v581_v4 = vld [vmem:[%s2280_s15] sm:$0x1]  ;;  %s2281_s12 = smov 32   ;;  %s2285_s15 = scalar_lea.vmem %s2261_s2, %s1664_s17 }
  0x8b   :  { %557 = vrot.lane.b32.xlu0 %v555_v1, %s2278_s29  ;;  %v615_v15 = vld [vmem:[%s2285_s15] sm:$0x1]  ;;  %s631_s17 = scalar_lea.vmem %s2261_s2, %s1808_s1  ;;  %s691_s15 = scalar_lea.vmem %s2261_s2, %s1826_s28 }
  0x8c   :  { %v632_v19 = vld [vmem:[%s631_s17] sm:$0x1]  ;;  %s754_s17 = scalar_lea.vmem %s2262_s3, %s1834_s26  ;;  %s2293_s24 = sld [smem:[#allocation14_spill]] }
  0x8d   :  { %633 = vst.msk [vmem:[#allocation2 + $0xa] sm:$0x1] %vm29_vm0, %v632_v19  ;;  %v692_v24 = vld [vmem:[%s691_s15] sm:$0x1]  ;;  %s2290_s15 = scalar_lea.vmem %s2262_s3, %s1697_s11  ;;  %s767_s11 = scalar_lea.vmem %s2262_s3, %s2288_s18 }
  0x8e   :  { %590 = vrot.lane.b32.xlu1 %v588_v2, %s2281_s12  ;;  %693 = vst.msk [vmem:[#allocation2 + $0xb] sm:$0x1] %vm29_vm0, %v692_v24  ;;  %v755_v26 = vld [vmem:[%s754_s17] sm:$0x1]  ;;  %s2291_s17 = scalar_lea.vmem %s2261_s2, %s1703_s6  ;;  %s760_s6 = scalar_lea.vmem %s2261_s2, %s2289_s0 }
  0x8f   :  { %583 = vrot.lane.b32.xlu0 %v581_v4, %s2281_s12  ;;  %756 = vst.msk [vmem:[#allocation3 + $0xc] sm:$0x1] %vm29_vm0, %v755_v26  ;;  %v708_v28 = vld [vmem:[%s2290_s15] sm:$0x1]  ;;  %s871_s15 = scalar_lea.vmem %s2261_s2, %s1889_s8  ;;  %s827_s7 = scalar_lea.vmem %s2262_s3, %s2292_s20 }
  0x90   :  { %v701_v31 = vld [vmem:[%s2291_s17] sm:$0x1]  ;;  %s934_s8 = scalar_lea.vmem %s2262_s3, %s1908_s9  ;;  %s931_s21 = scalar_lea.vmem %s2261_s2, %s1917_s10 }
  0x91   :  { %v872_v35 = vld [vmem:[%s871_s15] sm:$0x1]  ;;  %s1981_s1 = sld [smem:[#allocation5 + $0x3d]]  ;;  %s880_s18 = scalar_lea.vmem %s2261_s2, %s1926_s25 }
  0x92   :  { %607 = vrot.lane.b32.xlu1 %v605_v6, %s2274_s19  ;;  %v768_v36 = vld [vmem:[%s767_s11] sm:$0x1]  ;;  %873 = vst.msk [vmem:[#allocation2 + $0xe] sm:$0x1] %vm29_vm0, %v872_v35  ;;  %s820_s26 = scalar_lea.vmem %s2261_s2, %s2293_s24  ;;  %s1992_s5 = sld [smem:[#allocation6 + $0x2a]] }
  0x93   :  { %600 = vrot.lane.b32.xlu0 %v598_v8, %s2274_s19  ;;  %v761_v38 = vld [vmem:[%s760_s6] sm:$0x1]  ;;  %s1999_s23 = sld [smem:[#allocation5 + $0x2a]]  ;;  %s947_s24 = scalar_lea.vmem %s2262_s3, %s1970_s13 }
  0x94   :  { %v59_v14 = vpop.permute.xlu1 %58  ;;  %v935_v39 = vld [vmem:[%s934_s8] sm:$0x1]  ;;  %s2008_s30 = sld [smem:[#allocation6 + $0x2e]] }
  0x95   :  { %v41_v17 = vpop.permute.xlu0 %40  ;;  %936 = vst.msk [vmem:[#allocation3 + $0xf] sm:$0x1] %vm29_vm0, %v935_v39  ;;  %v932_v41 = vld [vmem:[%s931_s21] sm:$0x1]  ;;  %s2015_s22 = sld [smem:[#allocation5 + $0x2e]] }
  0x96   :  { %44 = vst.msk [vmem:[#allocation2] sm:$0x1] %vm43_vm1, %v41_v17  ;;  %624 = vrot.lane.b32.xlu1 %v622_v12, %s2278_s29  ;;  %v828_v42 = vld [vmem:[%s827_s7] sm:$0x1]  ;;  %s2024_s17 = sld [smem:[#allocation6 + $0x32]] }
  0x97   :  { %617 = vrot.lane.b32.xlu0 %v615_v15, %s2278_s29  ;;  %62 = vst.msk [vmem:[#allocation2] sm:$0x1] %vm61_vm2, %v59_v14  ;;  %v821_v44 = vld [vmem:[%s820_s26] sm:$0x1]  ;;  %s940_s7 = scalar_lea.vmem %s2261_s2, %s1981_s1  ;;  %s2031_s20 = sld [smem:[#allocation5 + $0x32]] }
  0x98   :  { %v67_v22 = vpop.permute.xlu1 %66  ;;  %933 = vst.msk [vmem:[#allocation2 + $0xf] sm:$0x1] %vm29_vm0, %v932_v41  ;;  %v881_v48 = vld [vmem:[%s880_s18] sm:$0x1]  ;;  %s664_s13 = scalar_lea.vmem %s2262_s3, %s1992_s5  ;;  %s2040_s10 = sld [smem:[#allocation6 + $0x36]] }
  0x99   :  { %v49_v25 = vpop.permute.xlu0 %48  ;;  %v948_v50 = vld [vmem:[%s947_s24] sm:$0x1]  ;;  %s657_s11 = scalar_lea.vmem %s2261_s2, %s1999_s23  ;;  %s2047_s6 = sld [smem:[#allocation5 + $0x36]] }
  0x9a   :  { %51 = vst.msk [vmem:[#allocation3] sm:$0x1] %vm43_vm1, %v49_v25  ;;  %650 = vrot.lane.b32.xlu1 %v648_v20, %s2281_s12  ;;  %v941_v52 = vld [vmem:[%s940_s7] sm:$0x1]  ;;  %s724_s9 = scalar_lea.vmem %s2262_s3, %s2008_s30  ;;  %s2056_s16 = sld [smem:[#allocation6 + $0x3a]] }
  0x9b   :  { %643 = vrot.lane.b32.xlu0 %v641_v23, %s2281_s12  ;;  %69 = vst.msk [vmem:[#allocation3] sm:$0x1] %vm61_vm2, %v67_v22  ;;  %v665_v54 = vld [vmem:[%s664_s13] sm:$0x1]  ;;  %s717_s14 = scalar_lea.vmem %s2261_s2, %s2015_s22  ;;  %s2063_s25 = sld [smem:[#allocation5 + $0x3a]] }
  0x9c   :  { %v85_v30 = vpop.permute.xlu1 %84  ;;  %v658_v56 = vld [vmem:[%s657_s11] sm:$0x1]  ;;  %s784_s23 = scalar_lea.vmem %s2262_s3, %s2024_s17  ;;  %s2072_s4 = sld [smem:[#allocation6 + $0x3e]] }
  0x9d   :  { %87 = vst.msk [vmem:[#allocation3] sm:$0x1] %vm79_vm3, %v85_v30  ;;  %v77_v33 = vpop.permute.xlu0 %76  ;;  %v725_v58 = vld [vmem:[%s724_s9] sm:$0x1]  ;;  %s777_s30 = scalar_lea.vmem %s2261_s2, %s2031_s20  ;;  %s2079_s28 = sld [smem:[#allocation5 + $0x3e]] }
  0x9e   :  { %80 = vst.msk [vmem:[#allocation2] sm:$0x1] %vm79_vm3, %v77_v33  ;;  %710 = vrot.lane.b32.xlu1 %v708_v28, %s2281_s12  ;;  %v718_v60 = vld [vmem:[%s717_s14] sm:$0x1]  ;;  %s844_s22 = scalar_lea.vmem %s2262_s3, %s2040_s10  ;;  %s2088_s26 = sld [smem:[#allocation6 + $0x2b]] }
  0x9f   :  { %703 = vrot.lane.b32.xlu0 %v701_v31, %s2281_s12  ;;  %v785_v62 = vld [vmem:[%s784_s23] sm:$0x1]  ;;  %s837_s17 = scalar_lea.vmem %s2261_s2, %s2047_s6  ;;  %s2095_s27 = sld [smem:[#allocation5 + $0x2b]] }
  0xa0   :  { %v111_v37 = vpop.permute.xlu1 %110  ;;  %v778_v0 = vld [vmem:[%s777_s30] sm:$0x1]  ;;  %s904_s20 = scalar_lea.vmem %s2262_s3, %s2056_s16  ;;  %s2111_s15 = sld [smem:[#allocation5 + $0x2f]] }
  0xa1   :  { %113 = vst.msk [vmem:[#allocation3 + $0x1] sm:$0x1] %vm43_vm1, %v111_v37  ;;  %v104_v40 = vpop.permute.xlu0 %103  ;;  %v845_v2 = vld [vmem:[%s844_s22] sm:$0x1]  ;;  %s897_s10 = scalar_lea.vmem %s2261_s2, %s2063_s25  ;;  %s2120_s0 = sld [smem:[#allocation6 + $0x33]] }
  0xa2   :  { %106 = vst.msk [vmem:[#allocation2 + $0x1] sm:$0x1] %vm43_vm1, %v104_v40  ;;  %770 = vrot.lane.b32.xlu1 %v768_v36, %s2281_s12  ;;  %v838_v4 = vld [vmem:[%s837_s17] sm:$0x1]  ;;  %s964_s6 = scalar_lea.vmem %s2262_s3, %s2072_s4  ;;  %s2127_s8 = sld [smem:[#allocation5 + $0x33]] }
  0xa3   :  { %763 = vrot.lane.b32.xlu0 %v761_v38, %s2281_s12  ;;  %v905_v6 = vld [vmem:[%s904_s20] sm:$0x1]  ;;  %s957_s16 = scalar_lea.vmem %s2261_s2, %s2079_s28  ;;  %s2136_s21 = sld [smem:[#allocation6 + $0x37]] }
  0xa4   :  { %v128_v43 = vpop.permute.xlu1 %127  ;;  %v898_v8 = vld [vmem:[%s897_s10] sm:$0x1]  ;;  %s681_s25 = scalar_lea.vmem %s2262_s3, %s2088_s26  ;;  %s2143_s1 = sld [smem:[#allocation5 + $0x37]] }
  0xa5   :  { %130 = vst.msk [vmem:[#allocation3 + $0x1] sm:$0x1] %vm61_vm2, %v128_v43  ;;  %v121_v45 = vpop.permute.xlu0 %120  ;;  %v965_v10 = vld [vmem:[%s964_s6] sm:$0x1]  ;;  %s674_s4 = scalar_lea.vmem %s2261_s2, %s2095_s27  ;;  %s2152_s27 = sld [smem:[#allocation6 + $0x3b]] }
  0xa6   :  { %123 = vst.msk [vmem:[#allocation2 + $0x1] sm:$0x1] %vm61_vm2, %v121_v45  ;;  %830 = vrot.lane.b32.xlu1 %v828_v42, %s2281_s12  ;;  %v958_v12 = vld [vmem:[%s957_s16] sm:$0x1]  ;;  %s734_s26 = scalar_lea.vmem %s2261_s2, %s2111_s15  ;;  %s1265_s15 = sld [smem:[#allocation6 + $0x3f]] }
  0xa7   :  { %823 = vrot.lane.b32.xlu0 %v821_v44, %s2281_s12  ;;  %v682_v14 = vld [vmem:[%s681_s25] sm:$0x1]  ;;  %s801_s10 = scalar_lea.vmem %s2262_s3, %s2120_s0  ;;  %s1264_s0 = sld [smem:[#allocation5 + $0x3f]] }
  0xa8   :  { %v145_v47 = vpop.permute.xlu1 %144  ;;  %v675_v16 = vld [vmem:[%s674_s4] sm:$0x1]  ;;  %s794_s6 = scalar_lea.vmem %s2261_s2, %s2127_s8 }
  0xa9   :  { %147 = vst.msk [vmem:[#allocation3 + $0x1] sm:$0x1] %vm79_vm3, %v145_v47  ;;  %v138_v49 = vpop.permute.xlu0 %137  ;;  %v735_v20 = vld [vmem:[%s734_s26] sm:$0x1]  ;;  %s861_s16 = scalar_lea.vmem %s2262_s3, %s2136_s21 }
  0xaa   :  { %140 = vst.msk [vmem:[#allocation2 + $0x1] sm:$0x1] %vm79_vm3, %v138_v49  ;;  %890 = vrot.lane.b32.xlu1 %v888_v46, %s2281_s12  ;;  %v802_v22 = vld [vmem:[%s801_s10] sm:$0x1]  ;;  %s854_s25 = scalar_lea.vmem %s2261_s2, %s2143_s1 }
  0xab   :  { %883 = vrot.lane.b32.xlu0 %v881_v48, %s2281_s12  ;;  %v795_v24 = vld [vmem:[%s794_s6] sm:$0x1]  ;;  %s921_s4 = scalar_lea.vmem %s2262_s3, %s2152_s27 }
  0xac   :  { %v171_v51 = vpop.permute.xlu1 %170  ;;  %v862_v26 = vld [vmem:[%s861_s16] sm:$0x1]  ;;  %s981_s11 = scalar_lea.vmem %s2262_s3, %s1265_s15 }
  0xad   :  { %173 = vst.msk [vmem:[#allocation3 + $0x2] sm:$0x1] %vm43_vm1, %v171_v51  ;;  %v164_v53 = vpop.permute.xlu0 %163  ;;  %v855_v28 = vld [vmem:[%s854_s25] sm:$0x1]  ;;  %s974_s1 = scalar_lea.vmem %s2261_s2, %s1264_s0 }
  0xae   :  { %166 = vst.msk [vmem:[#allocation2 + $0x2] sm:$0x1] %vm43_vm1, %v164_v53  ;;  %950 = vrot.lane.b32.xlu1 %v948_v50, %s2281_s12  ;;  %v922_v30 = vld [vmem:[%s921_s4] sm:$0x1] }
  0xaf   :  { %943 = vrot.lane.b32.xlu0 %v941_v52, %s2281_s12  ;;  %s2104_s12 = sld [smem:[#allocation6 + $0x2f]]  ;;  %v982_v34 = vld [vmem:[%s981_s11] sm:$0x1] }
  0xb0   :  { %v188_v55 = vpop.permute.xlu1 %187  ;;  %v975_v36 = vld [vmem:[%s974_s1] sm:$0x1] }
  0xb1   :  { %190 = vst.msk [vmem:[#allocation3 + $0x2] sm:$0x1] %vm61_vm2, %v188_v55  ;;  %v181_v57 = vpop.permute.xlu0 %180 }
  0xb2   :  { %183 = vst.msk [vmem:[#allocation2 + $0x2] sm:$0x1] %vm61_vm2, %v181_v57  ;;  %667 = vrot.lane.b32.xlu1 %v665_v54, %s2274_s19 }
  0xb3   :  { %660 = vrot.lane.b32.xlu0 %v658_v56, %s2274_s19 }
  0xb4   :  { %v205_v59 = vpop.permute.xlu1 %204 }
  0xb5   :  { %207 = vst.msk [vmem:[#allocation3 + $0x2] sm:$0x1] %vm79_vm3, %v205_v59  ;;  %v198_v61 = vpop.permute.xlu0 %197  ;;  %s741_s28 = scalar_lea.vmem %s2262_s3, %s2104_s12  ;;  %s1256_s12 = sld [smem:[#allocation5 + $0x3b]] }
  0xb6   :  { %200 = vst.msk [vmem:[#allocation2 + $0x2] sm:$0x1] %vm79_vm3, %v198_v61  ;;  %727 = vrot.lane.b32.xlu1 %v725_v58, %s2274_s19  ;;  %v742_v18 = vld [vmem:[%s741_s28] sm:$0x1] }
  0xb7   :  { %720 = vrot.lane.b32.xlu0 %v718_v60, %s2274_s19 }
  0xb8   :  { %v231_v63 = vpop.permute.xlu1 %230 }
  0xb9   :  { %233 = vst.msk [vmem:[#allocation3 + $0x3] sm:$0x1] %vm43_vm1, %v231_v63  ;;  %v224_v1 = vpop.permute.xlu0 %223 }
  0xba   :  { %226 = vst.msk [vmem:[#allocation2 + $0x3] sm:$0x1] %vm43_vm1, %v224_v1  ;;  %787 = vrot.lane.b32.xlu1 %v785_v62, %s2274_s19 }
  0xbb   :  { %780 = vrot.lane.b32.xlu0 %v778_v0, %s2274_s19  ;;  %s914_s17 = scalar_lea.vmem %s2261_s2, %s1256_s12  ;;  %s1327_s2 = smov [#allocation7]  }
  0xbc   :  { %v248_v3 = vpop.permute.xlu1 %247  ;;  %v915_v32 = vld [vmem:[%s914_s17] sm:$0x1]  ;;  %s1001_s3 = sshll.u32 %s1327_s2, 4  ;;  %s1002_s3 = int_to_ptr.vmem [resolvable:$true] %s1001_s3 }
  0xbd   :  { %250 = vst.msk [vmem:[#allocation3 + $0x3] sm:$0x1] %vm61_vm2, %v248_v3  ;;  %v241_v5 = vpop.permute.xlu0 %240  ;;  %p1303_p11 = scmp.lt.s32.totalorder %s1002_s3, %s1002_s3 }
  0xbe   :  { %243 = vst.msk [vmem:[#allocation2 + $0x3] sm:$0x1] %vm61_vm2, %v241_v5  ;;  %847 = vrot.lane.b32.xlu1 %v845_v2, %s2274_s19 }
  0xbf   :  { %840 = vrot.lane.b32.xlu0 %v838_v4, %s2274_s19 }
  0xc0   :  { %v265_v7 = vpop.permute.xlu1 %264 }
  0xc1   :  { %267 = vst.msk [vmem:[#allocation3 + $0x3] sm:$0x1] %vm79_vm3, %v265_v7  ;;  %v258_v9 = vpop.permute.xlu0 %257 }
  0xc2   :  { %260 = vst.msk [vmem:[#allocation2 + $0x3] sm:$0x1] %vm79_vm3, %v258_v9  ;;  %907 = vrot.lane.b32.xlu1 %v905_v6, %s2274_s19 }
  0xc3   :  { %900 = vrot.lane.b32.xlu0 %v898_v8, %s2274_s19 }
  0xc4   :  { %v291_v11 = vpop.permute.xlu1 %290 }
  0xc5   :  { %293 = vst.msk [vmem:[#allocation3 + $0x4] sm:$0x1] %vm43_vm1, %v291_v11  ;;  %v284_v13 = vpop.permute.xlu0 %283 }
  0xc6   :  { %286 = vst.msk [vmem:[#allocation2 + $0x4] sm:$0x1] %vm43_vm1, %v284_v13  ;;  %967 = vrot.lane.b32.xlu1 %v965_v10, %s2274_s19 }
  0xc7   :  { %960 = vrot.lane.b32.xlu0 %v958_v12, %s2274_s19 }
  0xc8   :  { %v308_v15 = vpop.permute.xlu1 %307 }
  0xc9   :  { %310 = vst.msk [vmem:[#allocation3 + $0x4] sm:$0x1] %vm61_vm2, %v308_v15  ;;  %v301_v17 = vpop.permute.xlu0 %300 }
  0xca   :  { %303 = vst.msk [vmem:[#allocation2 + $0x4] sm:$0x1] %vm61_vm2, %v301_v17  ;;  %684 = vrot.lane.b32.xlu1 %v682_v14, %s2278_s29 }
  0xcb   :  { %677 = vrot.lane.b32.xlu0 %v675_v16, %s2278_s29 }
  0xcc   :  { %v325_v19 = vpop.permute.xlu1 %324 }
  0xcd   :  { %327 = vst.msk [vmem:[#allocation3 + $0x4] sm:$0x1] %vm79_vm3, %v325_v19  ;;  %v318_v21 = vpop.permute.xlu0 %317 }
  0xce   :  { %320 = vst.msk [vmem:[#allocation2 + $0x4] sm:$0x1] %vm79_vm3, %v318_v21  ;;  %744 = vrot.lane.b32.xlu1 %v742_v18, %s2278_s29 }
  0xcf   :  { %737 = vrot.lane.b32.xlu0 %v735_v20, %s2278_s29 }
  0xd0   :  { %v351_v23 = vpop.permute.xlu1 %350 }
  0xd1   :  { %353 = vst.msk [vmem:[#allocation3 + $0x5] sm:$0x1] %vm43_vm1, %v351_v23  ;;  %v344_v25 = vpop.permute.xlu0 %343 }
  0xd2   :  { %346 = vst.msk [vmem:[#allocation2 + $0x5] sm:$0x1] %vm43_vm1, %v344_v25  ;;  %804 = vrot.lane.b32.xlu1 %v802_v22, %s2278_s29 }
  0xd3   :  { %797 = vrot.lane.b32.xlu0 %v795_v24, %s2278_s29 }
  0xd4   :  { %v368_v27 = vpop.permute.xlu1 %367 }
  0xd5   :  { %370 = vst.msk [vmem:[#allocation3 + $0x5] sm:$0x1] %vm61_vm2, %v368_v27  ;;  %v361_v29 = vpop.permute.xlu0 %360 }
  0xd6   :  { %363 = vst.msk [vmem:[#allocation2 + $0x5] sm:$0x1] %vm61_vm2, %v361_v29  ;;  %864 = vrot.lane.b32.xlu1 %v862_v26, %s2278_s29 }
  0xd7   :  { %857 = vrot.lane.b32.xlu0 %v855_v28, %s2278_s29 }
  0xd8   :  { %v385_v31 = vpop.permute.xlu1 %384 }
  0xd9   :  { %387 = vst.msk [vmem:[#allocation3 + $0x5] sm:$0x1] %vm79_vm3, %v385_v31  ;;  %v378_v33 = vpop.permute.xlu0 %377 }
  0xda   :  { %380 = vst.msk [vmem:[#allocation2 + $0x5] sm:$0x1] %vm79_vm3, %v378_v33  ;;  %924 = vrot.lane.b32.xlu1 %v922_v30, %s2278_s29 }
  0xdb   :  { %917 = vrot.lane.b32.xlu0 %v915_v32, %s2278_s29 }
  0xdc   :  { %v411_v35 = vpop.permute.xlu1 %410 }
  0xdd   :  { %413 = vst.msk [vmem:[#allocation3 + $0x6] sm:$0x1] %vm43_vm1, %v411_v35  ;;  %v404_v37 = vpop.permute.xlu0 %403 }
  0xde   :  { %406 = vst.msk [vmem:[#allocation2 + $0x6] sm:$0x1] %vm43_vm1, %v404_v37  ;;  %984 = vrot.lane.b32.xlu1 %v982_v34, %s2278_s29 }
  0xdf   :  { %977 = vrot.lane.b32.xlu0 %v975_v36, %s2278_s29  ;;  %s1298_s29 = scalar_lea.vmem %s1002_s3, 256 }
  0xe0   :  { %v428_v38 = vpop.permute.xlu1 %427  ;;  %p1299_p10 = scmp.ne.s32.totalorder %s1002_s3, %s1298_s29  ;;  %p1304_p12 = scmp.lt.s32.totalorder %s1298_s29, %s1298_s29 }
  0xe1   :  { %430 = vst.msk [vmem:[#allocation3 + $0x6] sm:$0x1] %vm61_vm2, %v428_v38  ;;  %v421_v39 = vpop.permute.xlu0 %420 }
  0xe2   :  { %423 = vst.msk [vmem:[#allocation2 + $0x6] sm:$0x1] %vm61_vm2, %v421_v39  ;;  %p1305_p13 = por %p1304_p12, %p1303_p11 }
  0xe4   :  { %v445_v40 = vpop.permute.xlu1 %444  ;;  %p1306_p0 = pnand %p1305_p13, %p1299_p10 }
  0xe5   :  { %447 = vst.msk [vmem:[#allocation3 + $0x6] sm:$0x1] %vm79_vm3, %v445_v40  ;;  %v438_v41 = vpop.permute.xlu0 %437 }
  0xe6   :  { %440 = vst.msk [vmem:[#allocation2 + $0x6] sm:$0x1] %vm79_vm3, %v438_v41 }
  0xe8   :  { %v471_v42 = vpop.permute.xlu1 %470 }
  0xe9   :  { %473 = vst.msk [vmem:[#allocation3 + $0x7] sm:$0x1] %vm43_vm1, %v471_v42  ;;  %v464_v43 = vpop.permute.xlu0 %463 }
  0xea   :  { %466 = vst.msk [vmem:[#allocation2 + $0x7] sm:$0x1] %vm43_vm1, %v464_v43 }
  0xec   :  { %v488_v44 = vpop.permute.xlu1 %487 }
  0xed   :  { %490 = vst.msk [vmem:[#allocation3 + $0x7] sm:$0x1] %vm61_vm2, %v488_v44  ;;  %v481_v45 = vpop.permute.xlu0 %480 }
  0xee   :  { %483 = vst.msk [vmem:[#allocation2 + $0x7] sm:$0x1] %vm61_vm2, %v481_v45 }
  0xf0   :  { %v505_v46 = vpop.permute.xlu1 %504 }
  0xf1   :  { %507 = vst.msk [vmem:[#allocation3 + $0x7] sm:$0x1] %vm79_vm3, %v505_v46  ;;  %v498_v47 = vpop.permute.xlu0 %497 }
  0xf2   :  { %500 = vst.msk [vmem:[#allocation2 + $0x7] sm:$0x1] %vm79_vm3, %v498_v47 }
  0xf4   :  { %v531_v48 = vpop.permute.xlu1 %530 }
  0xf5   :  { %533 = vst.msk [vmem:[#allocation3 + $0x8] sm:$0x1] %vm43_vm1, %v531_v48  ;;  %v524_v49 = vpop.permute.xlu0 %523 }
  0xf6   :  { %526 = vst.msk [vmem:[#allocation2 + $0x8] sm:$0x1] %vm43_vm1, %v524_v49 }
  0xf8   :  { %v548_v50 = vpop.permute.xlu1 %547  ;;  %v990_v51 = vld [vmem:[#allocation3] sm:$0xff] }
  0xf9   :  { %550 = vst.msk [vmem:[#allocation3 + $0x8] sm:$0x1] %vm61_vm2, %v548_v50  ;;  %v541_v52 = vpop.permute.xlu0 %540  ;;  %v988_v53 = vld [vmem:[#allocation2] sm:$0xff] }
  0xfa   :  { %543 = vst.msk [vmem:[#allocation2 + $0x8] sm:$0x1] %vm61_vm2, %v541_v52  ;;  %v992_v54 = vmul.f32 %v990_v51, %v988_v53 }
  0xfc   :  { %v565_v55 = vpop.permute.xlu1 %564  ;;  %994 = vst [vmem:[#allocation7] sm:$0xff] %v992_v54 }
  0xfd   :  { %567 = vst.msk [vmem:[#allocation3 + $0x8] sm:$0x1] %vm79_vm3, %v565_v55  ;;  %v558_v56 = vpop.permute.xlu0 %557 }
  0xfe   :  { %560 = vst.msk [vmem:[#allocation2 + $0x8] sm:$0x1] %vm79_vm3, %v558_v56 }
 0x100   :  { %v591_v57 = vpop.permute.xlu1 %590 }
 0x101   :  { %593 = vst.msk [vmem:[#allocation3 + $0x9] sm:$0x1] %vm43_vm1, %v591_v57  ;;  %v584_v58 = vpop.permute.xlu0 %583 }
 0x102   :  { %586 = vst.msk [vmem:[#allocation2 + $0x9] sm:$0x1] %vm43_vm1, %v584_v58 }
 0x104   :  { %v608_v59 = vpop.permute.xlu1 %607 }
 0x105   :  { %610 = vst.msk [vmem:[#allocation3 + $0x9] sm:$0x1] %vm61_vm2, %v608_v59  ;;  %v601_v60 = vpop.permute.xlu0 %600 }
 0x106   :  { %603 = vst.msk [vmem:[#allocation2 + $0x9] sm:$0x1] %vm61_vm2, %v601_v60 }
 0x108   :  { %v625_v61 = vpop.permute.xlu1 %624 }
 0x109   :  { %627 = vst.msk [vmem:[#allocation3 + $0x9] sm:$0x1] %vm79_vm3, %v625_v61  ;;  %v618_v62 = vpop.permute.xlu0 %617 }
 0x10a   :  { %620 = vst.msk [vmem:[#allocation2 + $0x9] sm:$0x1] %vm79_vm3, %v618_v62 }
 0x10c   :  { %v651_v63 = vpop.permute.xlu1 %650 }
 0x10d   :  { %653 = vst.msk [vmem:[#allocation3 + $0xa] sm:$0x1] %vm43_vm1, %v651_v63  ;;  %v644_v0 = vpop.permute.xlu0 %643 }
 0x10e   :  { %646 = vst.msk [vmem:[#allocation2 + $0xa] sm:$0x1] %vm43_vm1, %v644_v0 }
 0x110   :  { %v711_v1 = vpop.permute.xlu1 %710 }
 0x111   :  { %713 = vst.msk [vmem:[#allocation3 + $0xb] sm:$0x1] %vm43_vm1, %v711_v1  ;;  %v704_v2 = vpop.permute.xlu0 %703 }
 0x112   :  { %706 = vst.msk [vmem:[#allocation2 + $0xb] sm:$0x1] %vm43_vm1, %v704_v2 }
 0x114   :  { %v771_v3 = vpop.permute.xlu1 %770 }
 0x115   :  { %773 = vst.msk [vmem:[#allocation3 + $0xc] sm:$0x1] %vm43_vm1, %v771_v3  ;;  %v764_v4 = vpop.permute.xlu0 %763 }
 0x116   :  { %766 = vst.msk [vmem:[#allocation2 + $0xc] sm:$0x1] %vm43_vm1, %v764_v4 }
 0x118   :  { %v831_v5 = vpop.permute.xlu1 %830 }
 0x119   :  { %833 = vst.msk [vmem:[#allocation3 + $0xd] sm:$0x1] %vm43_vm1, %v831_v5  ;;  %v824_v6 = vpop.permute.xlu0 %823 }
 0x11a   :  { %826 = vst.msk [vmem:[#allocation2 + $0xd] sm:$0x1] %vm43_vm1, %v824_v6 }
 0x11c   :  { %v891_v7 = vpop.permute.xlu1 %890 }
 0x11d   :  { %893 = vst.msk [vmem:[#allocation3 + $0xe] sm:$0x1] %vm43_vm1, %v891_v7  ;;  %v884_v8 = vpop.permute.xlu0 %883 }
 0x11e   :  { %886 = vst.msk [vmem:[#allocation2 + $0xe] sm:$0x1] %vm43_vm1, %v884_v8 }
 0x120   :  { %v951_v9 = vpop.permute.xlu1 %950 }
 0x121   :  { %953 = vst.msk [vmem:[#allocation3 + $0xf] sm:$0x1] %vm43_vm1, %v951_v9  ;;  %v944_v10 = vpop.permute.xlu0 %943 }
 0x122   :  { %946 = vst.msk [vmem:[#allocation2 + $0xf] sm:$0x1] %vm43_vm1, %v944_v10 }
 0x124   :  { %v668_v11 = vpop.permute.xlu1 %667 }
 0x125   :  { %670 = vst.msk [vmem:[#allocation3 + $0xa] sm:$0x1] %vm61_vm2, %v668_v11  ;;  %v661_v12 = vpop.permute.xlu0 %660 }
 0x126   :  { %663 = vst.msk [vmem:[#allocation2 + $0xa] sm:$0x1] %vm61_vm2, %v661_v12 }
 0x128   :  { %v728_v13 = vpop.permute.xlu1 %727 }
 0x129   :  { %730 = vst.msk [vmem:[#allocation3 + $0xb] sm:$0x1] %vm61_vm2, %v728_v13  ;;  %v721_v14 = vpop.permute.xlu0 %720 }
 0x12a   :  { %723 = vst.msk [vmem:[#allocation2 + $0xb] sm:$0x1] %vm61_vm2, %v721_v14 }
 0x12c   :  { %v788_v15 = vpop.permute.xlu1 %787 }
 0x12d   :  { %790 = vst.msk [vmem:[#allocation3 + $0xc] sm:$0x1] %vm61_vm2, %v788_v15  ;;  %v781_v16 = vpop.permute.xlu0 %780 }
 0x12e   :  { %783 = vst.msk [vmem:[#allocation2 + $0xc] sm:$0x1] %vm61_vm2, %v781_v16 }
 0x130   :  { %v848_v17 = vpop.permute.xlu1 %847 }
 0x131   :  { %850 = vst.msk [vmem:[#allocation3 + $0xd] sm:$0x1] %vm61_vm2, %v848_v17  ;;  %v841_v18 = vpop.permute.xlu0 %840 }
 0x132   :  { %843 = vst.msk [vmem:[#allocation2 + $0xd] sm:$0x1] %vm61_vm2, %v841_v18 }
 0x134   :  { %v908_v19 = vpop.permute.xlu1 %907 }
 0x135   :  { %910 = vst.msk [vmem:[#allocation3 + $0xe] sm:$0x1] %vm61_vm2, %v908_v19  ;;  %v901_v20 = vpop.permute.xlu0 %900 }
 0x136   :  { %903 = vst.msk [vmem:[#allocation2 + $0xe] sm:$0x1] %vm61_vm2, %v901_v20 }
 0x138   :  { %v968_v21 = vpop.permute.xlu1 %967 }
 0x139   :  { %970 = vst.msk [vmem:[#allocation3 + $0xf] sm:$0x1] %vm61_vm2, %v968_v21  ;;  %v961_v22 = vpop.permute.xlu0 %960 }
 0x13a   :  { %963 = vst.msk [vmem:[#allocation2 + $0xf] sm:$0x1] %vm61_vm2, %v961_v22 }
 0x13c   :  { %v685_v23 = vpop.permute.xlu1 %684 }
 0x13d   :  { %687 = vst.msk [vmem:[#allocation3 + $0xa] sm:$0x1] %vm79_vm3, %v685_v23  ;;  %v678_v24 = vpop.permute.xlu0 %677 }
 0x13e   :  { %680 = vst.msk [vmem:[#allocation2 + $0xa] sm:$0x1] %vm79_vm3, %v678_v24 }
 0x140   :  { %v745_v25 = vpop.permute.xlu1 %744 }
 0x141   :  { %747 = vst.msk [vmem:[#allocation3 + $0xb] sm:$0x1] %vm79_vm3, %v745_v25  ;;  %v738_v26 = vpop.permute.xlu0 %737 }
 0x142   :  { %740 = vst.msk [vmem:[#allocation2 + $0xb] sm:$0x1] %vm79_vm3, %v738_v26 }
 0x144   :  { %v805_v27 = vpop.permute.xlu1 %804 }
 0x145   :  { %807 = vst.msk [vmem:[#allocation3 + $0xc] sm:$0x1] %vm79_vm3, %v805_v27  ;;  %v798_v28 = vpop.permute.xlu0 %797 }
 0x146   :  { %800 = vst.msk [vmem:[#allocation2 + $0xc] sm:$0x1] %vm79_vm3, %v798_v28 }
 0x148   :  { %v865_v29 = vpop.permute.xlu1 %864 }
 0x149   :  { %867 = vst.msk [vmem:[#allocation3 + $0xd] sm:$0x1] %vm79_vm3, %v865_v29  ;;  %v858_v30 = vpop.permute.xlu0 %857 }
 0x14a   :  { %860 = vst.msk [vmem:[#allocation2 + $0xd] sm:$0x1] %vm79_vm3, %v858_v30 }
 0x14c   :  { %v925_v31 = vpop.permute.xlu1 %924 }
 0x14d   :  { %927 = vst.msk [vmem:[#allocation3 + $0xe] sm:$0x1] %vm79_vm3, %v925_v31  ;;  %v918_v32 = vpop.permute.xlu0 %917 }
 0x14e   :  { %920 = vst.msk [vmem:[#allocation2 + $0xe] sm:$0x1] %vm79_vm3, %v918_v32 }
 0x150   :  { %v985_v33 = vpop.permute.xlu1 %984 }
 0x151   :  { %987 = vst.msk [vmem:[#allocation3 + $0xf] sm:$0x1] %vm79_vm3, %v985_v33  ;;  %v978_v34 = vpop.permute.xlu0 %977 }
 0x152   :  { %980 = vst.msk [vmem:[#allocation2 + $0xf] sm:$0x1] %vm79_vm3, %v978_v34 }
 0x158   :  { %v991_v35 = vld [vmem:[#allocation3 + $0x8] sm:$0xff] }
 0x159   :  { %v989_v36 = vld [vmem:[#allocation2 + $0x8] sm:$0xff] }
 0x15a   :  { %v993_v37 = vmul.f32 %v991_v35, %v989_v36 }
 0x15c   :  { %995 = vst [vmem:[#allocation7 + $0x8] sm:$0xff] %v993_v37 }
 0x15d   :  { %1309 = shalt.err (!%p1306_p0)
}
 0x15e   :  { %s1328_s19 = smov 128   ;;  %s1329_s9 = smov 8  }
 0x15f   :  { %s2294_s5 = sld [smem:[#allocation15_spill]] }
 0x165   :  { %1007 = dma.vmem_to_hbm [thread:$0]  %s1002_s3, 256, %s2294_s5, [#allocation8], %s1328_s19, %s1328_s19, %s1329_s9  }
 0x166   :  { %1320 = dma.done.wait [#allocation8], 256  }
 0x167   :  { %1321 = vsyncadd [#allocation8], 4294967040 }
 0x168   :  { %1011 = vsyncpa [#allocation8], 1 }

</bundles_post_ra>
